<compile_context>
chip_gen: v7x
topology: tpu7x:2x2x1
jax: 0.10.0
libtpu: 0.0.40
codegen_flags: <defaults>
</compile_context>

<pallas_src>
import functools

import jax
import jax.numpy as jnp
import numpy as np
from jax import lax
from jax.experimental import pallas as pl
from jax.experimental.pallas import tpu as pltpu  # noqa: F401  (kept for clarity)

SEQ = 8          # sequence length
BATCH = 4        # batch size
INPUT_DIM = 16   # input_dim argument of Myrnn
HIDDEN = 32      # hidden_size argument of Myrnn
NUM_LAYERS = 5   # nn.RNN(num_layers=5, bidirectional=True)
HEAD_PAD = 128   # lane-dense padded width of the fused Linear2|Linear3 head


# -------------------- single fused Pallas kernel --------------------

def _fused_myrnn_kernel(x_ref, w1_ref, b1_ref,
                        wih0_ref, b0_ref, whh0_ref,
                        wihL_ref, bL_ref, whhL_ref,
                        w23_ref, b23_ref,
                        out_ref,
                        *, seq, batch, hidden, num_layers):
    S, Bp, H = seq, batch, hidden
    H2 = 2 * H

    def mm(a, b):
        # Single-pass MXU matmul: bf16 operands, f32 accumulation.
        return jnp.dot(a.astype(jnp.bfloat16), b,
                       preferred_element_type=jnp.float32)

    # ---- Linear1 + ReLU : (S*Bp, D) -> (S*Bp, H), stays in registers ----
    a_cur = jnp.maximum(mm(x_ref[...], w1_ref[...]) + b1_ref[...], 0.0)

    # ---- 5-layer bidirectional tanh RNN (fwd+bwd fused per layer) ----
    for layer in range(num_layers):
        if layer == 0:
            wih = wih0_ref[...]            # (H, 2H)  = [W_ih_f^T | W_ih_b^T] bf16
            bih = b0_ref[...]              # (1, 2H)  = [b_f | b_b]  (b_ih+b_hh) f32
            whh = whh0_ref[...]            # (2H, 2H) block-diag of W_hh^T, bf16
        else:
            wih = wihL_ref[layer - 1]      # (2H, 2H) bf16
            bih = bL_ref[layer - 1]        # (1, 2H)  f32
            whh = whhL_ref[layer - 1]      # (2H, 2H) block-diag, bf16

        # Fused fwd+bwd input projection for all time steps in one matmul.
        xp = mm(a_cur, wih) + bih          # (S*Bp, 2H) f32 = [xp_f | xp_b]

        # Hoist the time reversal of the backward half OUT of the recurrence:
        # build one joint slab whose row-block t is [xp_f(t) | xp_b(S-1-t)].
        xp_b_rev = jnp.concatenate(
            [xp[(S - 1 - t) * Bp:(S - t) * Bp, H:] for t in range(S)], axis=0)
        xp_joint = jnp.concatenate([xp[:, :H], xp_b_rev], axis=-1)   # (S*Bp, 2H)

        # Joint recurrence: h = [h_fwd | h_bwd]; block-diag W_hh keeps the two
        # chains independent inside a single MXU push per step. The unrolled
        # body is just: aligned contiguous slice -> matmul -> add -> tanh.
        h = jnp.zeros((Bp, H2), jnp.float32)
        hs = []
        for t in range(S):                 # fully unrolled, static indices
            h = jnp.tanh(xp_joint[t * Bp:(t + 1) * Bp, :] + mm(h, whh))
            hs.append(h)                   # hs[t] = [h_fwd(t) | h_bwd(S-1-t)]

        # Reassemble the layer output in natural time order (off the chain):
        # row-block t = [h_fwd(t) | h_bwd(t)] = [hs[t][:, :H] | hs[S-1-t][:, H:]]
        a_cur = jnp.concatenate(
            [jnp.concatenate([hs[t][:, :H], hs[S - 1 - t][:, H:]], axis=-1)
             for t in range(S)], axis=0)   # (S*Bp, 2H) f32

    # ---- fused, lane-padded Linear2|Linear3 head: one (2H, 128) matmul ----
    y = mm(a_cur, w23_ref[...]) + b23_ref[...]          # (S*Bp, 128) f32
    lane = lax.broadcasted_iota(jnp.int32, y.shape, 1)
    # lanes 0..1 -> sigmoid(Linear2), lane 2 -> Linear3, lanes 3.. -> padding
    out_ref[...] = jnp.where(lane < 2, jax.nn.sigmoid(y), y)


def _full_spec(shape):
    n = len(shape)
    return pl.BlockSpec(shape, lambda i: (0,) * n)


def _block_diag(a, b):
    H = a.shape[0]
    z = jnp.zeros((H, H), a.dtype)
    return jnp.concatenate(
        [jnp.concatenate([a, z], axis=1),
         jnp.concatenate([z, b], axis=1)], axis=0)


# -------------------- one-time weight packing (out of the per-call path) ----

def prepare_params(params):
    """Pack / pre-transpose / pre-cast weights once per parameter set."""
    bf = jnp.bfloat16
    rnn = params["rnn"]
    H = HIDDEN

    wih0 = jnp.concatenate([rnn[0]["w_ih_f"], rnn[0]["w_ih_b"]], axis=1)   # (H, 2H)
    b0 = jnp.concatenate([rnn[0]["b_f"], rnn[0]["b_b"]], axis=1)           # (1, 2H)
    whh0 = _block_diag(rnn[0]["w_hh_f"], rnn[0]["w_hh_b"])                 # (2H, 2H)

    wihL = jnp.stack([jnp.concatenate([rnn[l]["w_ih_f"], rnn[l]["w_ih_b"]], axis=1)
                      for l in range(1, NUM_LAYERS)])                      # (L-1, 2H, 2H)
    bL = jnp.stack([jnp.concatenate([rnn[l]["b_f"], rnn[l]["b_b"]], axis=1)
                    for l in range(1, NUM_LAYERS)])                        # (L-1, 1, 2H)
    whhL = jnp.stack([_block_diag(rnn[l]["w_hh_f"], rnn[l]["w_hh_b"])
                      for l in range(1, NUM_LAYERS)])                      # (L-1, 2H, 2H)

    # Lane-dense fused head: columns 0:2 = Linear2, column 2 = Linear3, rest 0.
    w23 = jnp.zeros((2 * H, HEAD_PAD), jnp.float32)
    w23 = w23.at[:, 0:2].set(params["w2"]).at[:, 2:3].set(params["w3"])
    b23 = jnp.zeros((1, HEAD_PAD), jnp.float32)
    b23 = b23.at[:, 0:2].set(params["b2"]).at[:, 2:3].set(params["b3"])

    return {
        "w1": params["w1"].astype(bf), "b1": params["b1"],
        "wih0": wih0.astype(bf), "b0": b0, "whh0": whh0.astype(bf),
        "wihL": wihL.astype(bf), "bL": bL, "whhL": whhL.astype(bf),
        "w23": w23.astype(bf), "b23": b23,
    }


# -------------------- forward wrapper --------------------

def myrnn_forward(x, pp):
    """x: (S, B, INPUT_DIM), pp: prepare_params output.
    Returns (out1: (S,B,2), out2: (S,B,1))."""
    S, B, D = x.shape
    H = HIDDEN
    Bp = ((B + 7) // 8) * 8                  # pad batch to the f32 sublane tile
    x_pad = jnp.pad(x, ((0, 0), (0, Bp - B), (0, 0)))
    x_flat = x_pad.reshape(S * Bp, D)

    inputs = (x_flat, pp["w1"], pp["b1"],
              pp["wih0"], pp["b0"], pp["whh0"],
              pp["wihL"], pp["bL"], pp["whhL"],
              pp["w23"], pp["b23"])

    kernel = functools.partial(_fused_myrnn_kernel, seq=S, batch=Bp,
                               hidden=H, num_layers=NUM_LAYERS)

    y = pl.pallas_call(
        kernel,
        out_shape=jax.ShapeDtypeStruct((S * Bp, HEAD_PAD), jnp.float32),
        grid=(1,),
        in_specs=[_full_spec(a.shape) for a in inputs],
        out_specs=_full_spec((S * Bp, HEAD_PAD)),
    )(*inputs)

    y = y.reshape(S, Bp, HEAD_PAD)
    out1 = y[:, :B, 0:2]                     # padded rows / lanes sliced off
    out2 = y[:, :B, 2:3]
    return out1, out2


# -------------------- parameters --------------------

def init_params(key):
    def u(k, shape, fan):
        bound = 1.0 / float(np.sqrt(fan))
        return jax.random.uniform(k, shape, jnp.float32, -bound, bound)

    k1, k2, k3, krnn = jax.random.split(key, 4)
    p = {}
    ka, kb = jax.random.split(k1)
    p["w1"] = u(ka, (INPUT_DIM, HIDDEN), INPUT_DIM)        # Linear1 weight^T
    p["b1"] = u(kb, (1, HIDDEN), INPUT_DIM)
    ka, kb = jax.random.split(k2)
    p["w2"] = u(ka, (2 * HIDDEN, 2), 2 * HIDDEN)           # Linear2 weight^T
    p["b2"] = u(kb, (1, 2), 2 * HIDDEN)
    ka, kb = jax.random.split(k3)
    p["w3"] = u(ka, (2 * HIDDEN, 1), 2 * HIDDEN)           # Linear3 weight^T
    p["b3"] = u(kb, (1, 1), 2 * HIDDEN)

    rnn = []
    for layer in range(NUM_LAYERS):
        in_dim = HIDDEN if layer == 0 else 2 * HIDDEN
        lk = jax.random.fold_in(krnn, layer)
        sub = jax.random.split(lk, 8)
        lp = {}
        for d, dname in enumerate(("f", "b")):
            lp["w_ih_" + dname] = u(sub[4 * d + 0], (in_dim, HIDDEN), HIDDEN)
            lp["w_hh_" + dname] = u(sub[4 * d + 1], (HIDDEN, HIDDEN), HIDDEN)
            b_ih = u(sub[4 * d + 2], (1, HIDDEN), HIDDEN)
            b_hh = u(sub[4 * d + 3], (1, HIDDEN), HIDDEN)
            lp["b_" + dname] = b_ih + b_hh                 # fold b_ih + b_hh
        rnn.append(lp)
    p["rnn"] = rnn
    return p


# -------------------- pure-JAX reference for validation --------------------

def ref_forward(x, params):
    S, B, D = x.shape
    out = jnp.maximum(x.reshape(S * B, D) @ params["w1"] + params["b1"],
                      0.0).reshape(S, B, HIDDEN)
    for layer in range(NUM_LAYERS):
        lp = params["rnn"][layer]

        def run_dir(seq, w_ih, w_hh, b):
            def step(h_prev, x_t):
                h_new = jnp.tanh(x_t @ w_ih + b + h_prev @ w_hh)
                return h_new, h_new
            h0 = jnp.zeros((B, HIDDEN), jnp.float32)
            _, hs = lax.scan(step, h0, seq)
            return hs

        h_f = run_dir(out, lp["w_ih_f"], lp["w_hh_f"], lp["b_f"])
        h_b = run_dir(out[::-1], lp["w_ih_b"], lp["w_hh_b"], lp["b_b"])[::-1]
        out = jnp.concatenate([h_f, h_b], axis=-1)
    flat = out.reshape(S * B, 2 * HIDDEN)
    out1 = jax.nn.sigmoid(flat @ params["w2"] + params["b2"]).reshape(S, B, 2)
    out2 = (flat @ params["w3"] + params["b3"]).reshape(S, B, 1)
    return out1, out2


if __name__ == "__main__":
    key = jax.random.PRNGKey(0)
    kx, kp = jax.random.split(key)
    x = jax.random.normal(kx, (SEQ, BATCH, INPUT_DIM), jnp.float32)
    params = init_params(kp)

    packed = prepare_params(params)          # one-time packing, off the per-call path
    packed = jax.tree_util.tree_map(jnp.asarray, packed)

    fwd = jax.jit(myrnn_forward)
    out1, out2 = fwd(x, packed)
    jax.block_until_ready((out1, out2))

    assert out1.shape == (SEQ, BATCH, 2)
    assert out2.shape == (SEQ, BATCH, 1)

    r1, r2 = ref_forward(x, params)
    # bf16 single-pass MXU operands (per perf review) vs the pure-f32 reference:
    # the f32-accumulated bf16 matmuls plus 40 recurrence steps need a slightly
    # wider tolerance than strict f32-vs-MXU rounding.
    np.testing.assert_allclose(np.asarray(out1), np.asarray(r1), atol=2e-2, rtol=2e-2)
    np.testing.assert_allclose(np.asarray(out2), np.asarray(r2), atol=2e-2, rtol=2e-2)

    print("KERNEL_OK")
</pallas_src>

<mosaic_0001>
module attributes {stable_mosaic.version = 11 : i64} {
  func.func @_fused_myrnn_kernel(%arg0: i32, %arg1: memref<64x16xf32, #tpu.memory_space<vmem>>, %arg2: memref<16x32xbf16, #tpu.memory_space<vmem>>, %arg3: memref<1x32xf32, #tpu.memory_space<vmem>>, %arg4: memref<32x64xbf16, #tpu.memory_space<vmem>>, %arg5: memref<1x64xf32, #tpu.memory_space<vmem>>, %arg6: memref<64x64xbf16, #tpu.memory_space<vmem>>, %arg7: memref<4x64x64xbf16, #tpu.memory_space<vmem>>, %arg8: memref<4x1x64xf32, #tpu.memory_space<vmem>>, %arg9: memref<4x64x64xbf16, #tpu.memory_space<vmem>>, %arg10: memref<64x128xbf16, #tpu.memory_space<vmem>>, %arg11: memref<1x128xf32, #tpu.memory_space<vmem>>, %arg12: memref<64x128xf32, #tpu.memory_space<vmem>>) attributes {dimension_semantics = [#tpu.dimension_semantics<arbitrary>], iteration_bounds = array<i64: 1>, scalar_prefetch = 0 : i64, scratch_operands = 0 : i64, tpu.core_type = #tpu.core_type<tc>, window_params = [{pipeline_mode = #tpu.pipeline_mode<synchronous>, transform_indices = @transform_0, window_bounds = array<i64: 64, 16>}, {pipeline_mode = #tpu.pipeline_mode<synchronous>, transform_indices = @transform_1, window_bounds = array<i64: 16, 32>}, {pipeline_mode = #tpu.pipeline_mode<synchronous>, transform_indices = @transform_2, window_bounds = array<i64: 1, 32>}, {pipeline_mode = #tpu.pipeline_mode<synchronous>, transform_indices = @transform_3, window_bounds = array<i64: 32, 64>}, {pipeline_mode = #tpu.pipeline_mode<synchronous>, transform_indices = @transform_4, window_bounds = array<i64: 1, 64>}, {pipeline_mode = #tpu.pipeline_mode<synchronous>, transform_indices = @transform_5, window_bounds = array<i64: 64, 64>}, {pipeline_mode = #tpu.pipeline_mode<synchronous>, transform_indices = @transform_6, window_bounds = array<i64: 4, 64, 64>}, {pipeline_mode = #tpu.pipeline_mode<synchronous>, transform_indices = @transform_7, window_bounds = array<i64: 4, 1, 64>}, {pipeline_mode = #tpu.pipeline_mode<synchronous>, transform_indices = @transform_8, window_bounds = array<i64: 4, 64, 64>}, {pipeline_mode = #tpu.pipeline_mode<synchronous>, transform_indices = @transform_9, window_bounds = array<i64: 64, 128>}, {pipeline_mode = #tpu.pipeline_mode<synchronous>, transform_indices = @transform_10, window_bounds = array<i64: 1, 128>}, {pipeline_mode = #tpu.pipeline_mode<synchronous>, transform_indices = @transform_11, window_bounds = array<i64: 64, 128>}]} {
    %c0 = arith.constant 0 : index
    %c0_0 = arith.constant 0 : index
    %0 = vector.load %arg1[%c0, %c0_0] : memref<64x16xf32, #tpu.memory_space<vmem>>, vector<64x16xf32>
    %c0_1 = arith.constant 0 : index
    %c0_2 = arith.constant 0 : index
    %1 = vector.load %arg2[%c0_1, %c0_2] : memref<16x32xbf16, #tpu.memory_space<vmem>>, vector<16x32xbf16>
    %2 = arith.truncf %0 : vector<64x16xf32> to vector<64x16xbf16>
    %cst = arith.constant dense<0.000000e+00> : vector<64x32xf32>
    %3 = tpu.matmul %2, %1, %cst {dimension_numbers = #tpu.dot_dimension_numbers<[1], [0], [0], [1], [0, 0, 1, 1], [], []>} : vector<64x16xbf16>, vector<16x32xbf16>, vector<64x32xf32> -> vector<64x32xf32>
    %c0_3 = arith.constant 0 : index
    %c0_4 = arith.constant 0 : index
    %4 = vector.load %arg3[%c0_3, %c0_4] : memref<1x32xf32, #tpu.memory_space<vmem>>, vector<1x32xf32>
    %5 = vector.broadcast %4 : vector<1x32xf32> to vector<64x32xf32>
    %6 = arith.addf %3, %5 : vector<64x32xf32>
    %cst_5 = arith.constant 0.000000e+00 : f32
    %7 = vector.broadcast %cst_5 : f32 to vector<64x32xf32>
    %8 = arith.maximumf %6, %7 : vector<64x32xf32>
    %c0_6 = arith.constant 0 : index
    %c0_7 = arith.constant 0 : index
    %9 = vector.load %arg4[%c0_6, %c0_7] : memref<32x64xbf16, #tpu.memory_space<vmem>>, vector<32x64xbf16>
    %c0_8 = arith.constant 0 : index
    %c0_9 = arith.constant 0 : index
    %10 = vector.load %arg5[%c0_8, %c0_9] : memref<1x64xf32, #tpu.memory_space<vmem>>, vector<1x64xf32>
    %c0_10 = arith.constant 0 : index
    %c0_11 = arith.constant 0 : index
    %11 = vector.load %arg6[%c0_10, %c0_11] : memref<64x64xbf16, #tpu.memory_space<vmem>>, vector<64x64xbf16>
    %12 = arith.truncf %8 : vector<64x32xf32> to vector<64x32xbf16>
    %cst_12 = arith.constant dense<0.000000e+00> : vector<64x64xf32>
    %13 = tpu.matmul %12, %9, %cst_12 {dimension_numbers = #tpu.dot_dimension_numbers<[1], [0], [0], [1], [0, 0, 1, 1], [], []>} : vector<64x32xbf16>, vector<32x64xbf16>, vector<64x64xf32> -> vector<64x64xf32>
    %14 = vector.broadcast %10 : vector<1x64xf32> to vector<64x64xf32>
    %15 = arith.addf %13, %14 : vector<64x64xf32>
    %16 = vector.extract_strided_slice %15 {offsets = [56, 32], sizes = [8, 32], strides = [1, 1]} : vector<64x64xf32> to vector<8x32xf32>
    %17 = vector.extract_strided_slice %15 {offsets = [48, 32], sizes = [8, 32], strides = [1, 1]} : vector<64x64xf32> to vector<8x32xf32>
    %18 = vector.extract_strided_slice %15 {offsets = [40, 32], sizes = [8, 32], strides = [1, 1]} : vector<64x64xf32> to vector<8x32xf32>
    %19 = vector.extract_strided_slice %15 {offsets = [32, 32], sizes = [8, 32], strides = [1, 1]} : vector<64x64xf32> to vector<8x32xf32>
    %20 = vector.extract_strided_slice %15 {offsets = [24, 32], sizes = [8, 32], strides = [1, 1]} : vector<64x64xf32> to vector<8x32xf32>
    %21 = vector.extract_strided_slice %15 {offsets = [16, 32], sizes = [8, 32], strides = [1, 1]} : vector<64x64xf32> to vector<8x32xf32>
    %22 = vector.extract_strided_slice %15 {offsets = [8, 32], sizes = [8, 32], strides = [1, 1]} : vector<64x64xf32> to vector<8x32xf32>
    %23 = vector.extract_strided_slice %15 {offsets = [0, 32], sizes = [8, 32], strides = [1, 1]} : vector<64x64xf32> to vector<8x32xf32>
    %24 = tpu.concatenate %16, %17, %18, %19, %20, %21, %22, %23 in 0 : vector<8x32xf32>, vector<8x32xf32>, vector<8x32xf32>, vector<8x32xf32>, vector<8x32xf32>, vector<8x32xf32>, vector<8x32xf32>, vector<8x32xf32> -> vector<64x32xf32>
    %25 = vector.extract_strided_slice %15 {offsets = [0, 0], sizes = [64, 32], strides = [1, 1]} : vector<64x64xf32> to vector<64x32xf32>
    %26 = tpu.concatenate %25, %24 in 1 : vector<64x32xf32>, vector<64x32xf32> -> vector<64x64xf32>
    %cst_13 = arith.constant 0.000000e+00 : f32
    %27 = vector.broadcast %cst_13 : f32 to vector<8x64xf32>
    %28 = vector.extract_strided_slice %26 {offsets = [0, 0], sizes = [8, 64], strides = [1, 1]} : vector<64x64xf32> to vector<8x64xf32>
    %29 = arith.truncf %27 : vector<8x64xf32> to vector<8x64xbf16>
    %cst_14 = arith.constant dense<0.000000e+00> : vector<8x64xf32>
    %30 = tpu.matmul %29, %11, %cst_14 {dimension_numbers = #tpu.dot_dimension_numbers<[1], [0], [0], [1], [0, 0, 1, 1], [], []>} : vector<8x64xbf16>, vector<64x64xbf16>, vector<8x64xf32> -> vector<8x64xf32>
    %31 = arith.addf %28, %30 : vector<8x64xf32>
    %32 = math.tanh %31 : vector<8x64xf32>
    %33 = vector.extract_strided_slice %26 {offsets = [8, 0], sizes = [8, 64], strides = [1, 1]} : vector<64x64xf32> to vector<8x64xf32>
    %34 = arith.truncf %32 : vector<8x64xf32> to vector<8x64xbf16>
    %cst_15 = arith.constant dense<0.000000e+00> : vector<8x64xf32>
    %35 = tpu.matmul %34, %11, %cst_15 {dimension_numbers = #tpu.dot_dimension_numbers<[1], [0], [0], [1], [0, 0, 1, 1], [], []>} : vector<8x64xbf16>, vector<64x64xbf16>, vector<8x64xf32> -> vector<8x64xf32>
    %36 = arith.addf %33, %35 : vector<8x64xf32>
    %37 = math.tanh %36 : vector<8x64xf32>
    %38 = vector.extract_strided_slice %26 {offsets = [16, 0], sizes = [8, 64], strides = [1, 1]} : vector<64x64xf32> to vector<8x64xf32>
    %39 = arith.truncf %37 : vector<8x64xf32> to vector<8x64xbf16>
    %cst_16 = arith.constant dense<0.000000e+00> : vector<8x64xf32>
    %40 = tpu.matmul %39, %11, %cst_16 {dimension_numbers = #tpu.dot_dimension_numbers<[1], [0], [0], [1], [0, 0, 1, 1], [], []>} : vector<8x64xbf16>, vector<64x64xbf16>, vector<8x64xf32> -> vector<8x64xf32>
    %41 = arith.addf %38, %40 : vector<8x64xf32>
    %42 = math.tanh %41 : vector<8x64xf32>
    %43 = vector.extract_strided_slice %26 {offsets = [24, 0], sizes = [8, 64], strides = [1, 1]} : vector<64x64xf32> to vector<8x64xf32>
    %44 = arith.truncf %42 : vector<8x64xf32> to vector<8x64xbf16>
    %cst_17 = arith.constant dense<0.000000e+00> : vector<8x64xf32>
    %45 = tpu.matmul %44, %11, %cst_17 {dimension_numbers = #tpu.dot_dimension_numbers<[1], [0], [0], [1], [0, 0, 1, 1], [], []>} : vector<8x64xbf16>, vector<64x64xbf16>, vector<8x64xf32> -> vector<8x64xf32>
    %46 = arith.addf %43, %45 : vector<8x64xf32>
    %47 = math.tanh %46 : vector<8x64xf32>
    %48 = vector.extract_strided_slice %26 {offsets = [32, 0], sizes = [8, 64], strides = [1, 1]} : vector<64x64xf32> to vector<8x64xf32>
    %49 = arith.truncf %47 : vector<8x64xf32> to vector<8x64xbf16>
    %cst_18 = arith.constant dense<0.000000e+00> : vector<8x64xf32>
    %50 = tpu.matmul %49, %11, %cst_18 {dimension_numbers = #tpu.dot_dimension_numbers<[1], [0], [0], [1], [0, 0, 1, 1], [], []>} : vector<8x64xbf16>, vector<64x64xbf16>, vector<8x64xf32> -> vector<8x64xf32>
    %51 = arith.addf %48, %50 : vector<8x64xf32>
    %52 = math.tanh %51 : vector<8x64xf32>
    %53 = vector.extract_strided_slice %26 {offsets = [40, 0], sizes = [8, 64], strides = [1, 1]} : vector<64x64xf32> to vector<8x64xf32>
    %54 = arith.truncf %52 : vector<8x64xf32> to vector<8x64xbf16>
    %cst_19 = arith.constant dense<0.000000e+00> : vector<8x64xf32>
    %55 = tpu.matmul %54, %11, %cst_19 {dimension_numbers = #tpu.dot_dimension_numbers<[1], [0], [0], [1], [0, 0, 1, 1], [], []>} : vector<8x64xbf16>, vector<64x64xbf16>, vector<8x64xf32> -> vector<8x64xf32>
    %56 = arith.addf %53, %55 : vector<8x64xf32>
    %57 = math.tanh %56 : vector<8x64xf32>
    %58 = vector.extract_strided_slice %26 {offsets = [48, 0], sizes = [8, 64], strides = [1, 1]} : vector<64x64xf32> to vector<8x64xf32>
    %59 = arith.truncf %57 : vector<8x64xf32> to vector<8x64xbf16>
    %cst_20 = arith.constant dense<0.000000e+00> : vector<8x64xf32>
    %60 = tpu.matmul %59, %11, %cst_20 {dimension_numbers = #tpu.dot_dimension_numbers<[1], [0], [0], [1], [0, 0, 1, 1], [], []>} : vector<8x64xbf16>, vector<64x64xbf16>, vector<8x64xf32> -> vector<8x64xf32>
    %61 = arith.addf %58, %60 : vector<8x64xf32>
    %62 = math.tanh %61 : vector<8x64xf32>
    %63 = vector.extract_strided_slice %26 {offsets = [56, 0], sizes = [8, 64], strides = [1, 1]} : vector<64x64xf32> to vector<8x64xf32>
    %64 = arith.truncf %62 : vector<8x64xf32> to vector<8x64xbf16>
    %cst_21 = arith.constant dense<0.000000e+00> : vector<8x64xf32>
    %65 = tpu.matmul %64, %11, %cst_21 {dimension_numbers = #tpu.dot_dimension_numbers<[1], [0], [0], [1], [0, 0, 1, 1], [], []>} : vector<8x64xbf16>, vector<64x64xbf16>, vector<8x64xf32> -> vector<8x64xf32>
    %66 = arith.addf %63, %65 : vector<8x64xf32>
    %67 = math.tanh %66 : vector<8x64xf32>
    %68 = vector.extract_strided_slice %32 {offsets = [0, 0], sizes = [8, 32], strides = [1, 1]} : vector<8x64xf32> to vector<8x32xf32>
    %69 = vector.extract_strided_slice %67 {offsets = [0, 32], sizes = [8, 32], strides = [1, 1]} : vector<8x64xf32> to vector<8x32xf32>
    %70 = tpu.concatenate %68, %69 in 1 : vector<8x32xf32>, vector<8x32xf32> -> vector<8x64xf32>
    %71 = vector.extract_strided_slice %37 {offsets = [0, 0], sizes = [8, 32], strides = [1, 1]} : vector<8x64xf32> to vector<8x32xf32>
    %72 = vector.extract_strided_slice %62 {offsets = [0, 32], sizes = [8, 32], strides = [1, 1]} : vector<8x64xf32> to vector<8x32xf32>
    %73 = tpu.concatenate %71, %72 in 1 : vector<8x32xf32>, vector<8x32xf32> -> vector<8x64xf32>
    %74 = vector.extract_strided_slice %42 {offsets = [0, 0], sizes = [8, 32], strides = [1, 1]} : vector<8x64xf32> to vector<8x32xf32>
    %75 = vector.extract_strided_slice %57 {offsets = [0, 32], sizes = [8, 32], strides = [1, 1]} : vector<8x64xf32> to vector<8x32xf32>
    %76 = tpu.concatenate %74, %75 in 1 : vector<8x32xf32>, vector<8x32xf32> -> vector<8x64xf32>
    %77 = vector.extract_strided_slice %47 {offsets = [0, 0], sizes = [8, 32], strides = [1, 1]} : vector<8x64xf32> to vector<8x32xf32>
    %78 = vector.extract_strided_slice %52 {offsets = [0, 32], sizes = [8, 32], strides = [1, 1]} : vector<8x64xf32> to vector<8x32xf32>
    %79 = tpu.concatenate %77, %78 in 1 : vector<8x32xf32>, vector<8x32xf32> -> vector<8x64xf32>
    %80 = vector.extract_strided_slice %52 {offsets = [0, 0], sizes = [8, 32], strides = [1, 1]} : vector<8x64xf32> to vector<8x32xf32>
    %81 = vector.extract_strided_slice %47 {offsets = [0, 32], sizes = [8, 32], strides = [1, 1]} : vector<8x64xf32> to vector<8x32xf32>
    %82 = tpu.concatenate %80, %81 in 1 : vector<8x32xf32>, vector<8x32xf32> -> vector<8x64xf32>
    %83 = vector.extract_strided_slice %57 {offsets = [0, 0], sizes = [8, 32], strides = [1, 1]} : vector<8x64xf32> to vector<8x32xf32>
    %84 = vector.extract_strided_slice %42 {offsets = [0, 32], sizes = [8, 32], strides = [1, 1]} : vector<8x64xf32> to vector<8x32xf32>
    %85 = tpu.concatenate %83, %84 in 1 : vector<8x32xf32>, vector<8x32xf32> -> vector<8x64xf32>
    %86 = vector.extract_strided_slice %62 {offsets = [0, 0], sizes = [8, 32], strides = [1, 1]} : vector<8x64xf32> to vector<8x32xf32>
    %87 = vector.extract_strided_slice %37 {offsets = [0, 32], sizes = [8, 32], strides = [1, 1]} : vector<8x64xf32> to vector<8x32xf32>
    %88 = tpu.concatenate %86, %87 in 1 : vector<8x32xf32>, vector<8x32xf32> -> vector<8x64xf32>
    %89 = vector.extract_strided_slice %67 {offsets = [0, 0], sizes = [8, 32], strides = [1, 1]} : vector<8x64xf32> to vector<8x32xf32>
    %90 = vector.extract_strided_slice %32 {offsets = [0, 32], sizes = [8, 32], strides = [1, 1]} : vector<8x64xf32> to vector<8x32xf32>
    %91 = tpu.concatenate %89, %90 in 1 : vector<8x32xf32>, vector<8x32xf32> -> vector<8x64xf32>
    %92 = tpu.concatenate %70, %73, %76, %79, %82, %85, %88, %91 in 0 : vector<8x64xf32>, vector<8x64xf32>, vector<8x64xf32>, vector<8x64xf32>, vector<8x64xf32>, vector<8x64xf32>, vector<8x64xf32>, vector<8x64xf32> -> vector<64x64xf32>
    %c0_22 = arith.constant 0 : index
    %c0_23 = arith.constant 0 : index
    %c0_24 = arith.constant 0 : index
    %93 = vector.load %arg7[%c0_22, %c0_23, %c0_24] : memref<4x64x64xbf16, #tpu.memory_space<vmem>>, vector<1x64x64xbf16>
    %94 = vector.shape_cast %93 : vector<1x64x64xbf16> to vector<64x64xbf16>
    %c0_25 = arith.constant 0 : index
    %c0_26 = arith.constant 0 : index
    %c0_27 = arith.constant 0 : index
    %95 = vector.load %arg8[%c0_25, %c0_26, %c0_27] : memref<4x1x64xf32, #tpu.memory_space<vmem>>, vector<1x1x64xf32>
    %96 = vector.shape_cast %95 : vector<1x1x64xf32> to vector<1x64xf32>
    %c0_28 = arith.constant 0 : index
    %c0_29 = arith.constant 0 : index
    %c0_30 = arith.constant 0 : index
    %97 = vector.load %arg9[%c0_28, %c0_29, %c0_30] : memref<4x64x64xbf16, #tpu.memory_space<vmem>>, vector<1x64x64xbf16>
    %98 = vector.shape_cast %97 : vector<1x64x64xbf16> to vector<64x64xbf16>
    %99 = arith.truncf %92 : vector<64x64xf32> to vector<64x64xbf16>
    %cst_31 = arith.constant dense<0.000000e+00> : vector<64x64xf32>
    %100 = tpu.matmul %99, %94, %cst_31 {dimension_numbers = #tpu.dot_dimension_numbers<[1], [0], [0], [1], [0, 0, 1, 1], [], []>} : vector<64x64xbf16>, vector<64x64xbf16>, vector<64x64xf32> -> vector<64x64xf32>
    %101 = vector.broadcast %96 : vector<1x64xf32> to vector<64x64xf32>
    %102 = arith.addf %100, %101 : vector<64x64xf32>
    %103 = vector.extract_strided_slice %102 {offsets = [56, 32], sizes = [8, 32], strides = [1, 1]} : vector<64x64xf32> to vector<8x32xf32>
    %104 = vector.extract_strided_slice %102 {offsets = [48, 32], sizes = [8, 32], strides = [1, 1]} : vector<64x64xf32> to vector<8x32xf32>
    %105 = vector.extract_strided_slice %102 {offsets = [40, 32], sizes = [8, 32], strides = [1, 1]} : vector<64x64xf32> to vector<8x32xf32>
    %106 = vector.extract_strided_slice %102 {offsets = [32, 32], sizes = [8, 32], strides = [1, 1]} : vector<64x64xf32> to vector<8x32xf32>
    %107 = vector.extract_strided_slice %102 {offsets = [24, 32], sizes = [8, 32], strides = [1, 1]} : vector<64x64xf32> to vector<8x32xf32>
    %108 = vector.extract_strided_slice %102 {offsets = [16, 32], sizes = [8, 32], strides = [1, 1]} : vector<64x64xf32> to vector<8x32xf32>
    %109 = vector.extract_strided_slice %102 {offsets = [8, 32], sizes = [8, 32], strides = [1, 1]} : vector<64x64xf32> to vector<8x32xf32>
    %110 = vector.extract_strided_slice %102 {offsets = [0, 32], sizes = [8, 32], strides = [1, 1]} : vector<64x64xf32> to vector<8x32xf32>
    %111 = tpu.concatenate %103, %104, %105, %106, %107, %108, %109, %110 in 0 : vector<8x32xf32>, vector<8x32xf32>, vector<8x32xf32>, vector<8x32xf32>, vector<8x32xf32>, vector<8x32xf32>, vector<8x32xf32>, vector<8x32xf32> -> vector<64x32xf32>
    %112 = vector.extract_strided_slice %102 {offsets = [0, 0], sizes = [64, 32], strides = [1, 1]} : vector<64x64xf32> to vector<64x32xf32>
    %113 = tpu.concatenate %112, %111 in 1 : vector<64x32xf32>, vector<64x32xf32> -> vector<64x64xf32>
    %cst_32 = arith.constant 0.000000e+00 : f32
    %114 = vector.broadcast %cst_32 : f32 to vector<8x64xf32>
    %115 = vector.extract_strided_slice %113 {offsets = [0, 0], sizes = [8, 64], strides = [1, 1]} : vector<64x64xf32> to vector<8x64xf32>
    %116 = arith.truncf %114 : vector<8x64xf32> to vector<8x64xbf16>
    %cst_33 = arith.constant dense<0.000000e+00> : vector<8x64xf32>
    %117 = tpu.matmul %116, %98, %cst_33 {dimension_numbers = #tpu.dot_dimension_numbers<[1], [0], [0], [1], [0, 0, 1, 1], [], []>} : vector<8x64xbf16>, vector<64x64xbf16>, vector<8x64xf32> -> vector<8x64xf32>
    %118 = arith.addf %115, %117 : vector<8x64xf32>
    %119 = math.tanh %118 : vector<8x64xf32>
    %120 = vector.extract_strided_slice %113 {offsets = [8, 0], sizes = [8, 64], strides = [1, 1]} : vector<64x64xf32> to vector<8x64xf32>
    %121 = arith.truncf %119 : vector<8x64xf32> to vector<8x64xbf16>
    %cst_34 = arith.constant dense<0.000000e+00> : vector<8x64xf32>
    %122 = tpu.matmul %121, %98, %cst_34 {dimension_numbers = #tpu.dot_dimension_numbers<[1], [0], [0], [1], [0, 0, 1, 1], [], []>} : vector<8x64xbf16>, vector<64x64xbf16>, vector<8x64xf32> -> vector<8x64xf32>
    %123 = arith.addf %120, %122 : vector<8x64xf32>
    %124 = math.tanh %123 : vector<8x64xf32>
    %125 = vector.extract_strided_slice %113 {offsets = [16, 0], sizes = [8, 64], strides = [1, 1]} : vector<64x64xf32> to vector<8x64xf32>
    %126 = arith.truncf %124 : vector<8x64xf32> to vector<8x64xbf16>
    %cst_35 = arith.constant dense<0.000000e+00> : vector<8x64xf32>
    %127 = tpu.matmul %126, %98, %cst_35 {dimension_numbers = #tpu.dot_dimension_numbers<[1], [0], [0], [1], [0, 0, 1, 1], [], []>} : vector<8x64xbf16>, vector<64x64xbf16>, vector<8x64xf32> -> vector<8x64xf32>
    %128 = arith.addf %125, %127 : vector<8x64xf32>
    %129 = math.tanh %128 : vector<8x64xf32>
    %130 = vector.extract_strided_slice %113 {offsets = [24, 0], sizes = [8, 64], strides = [1, 1]} : vector<64x64xf32> to vector<8x64xf32>
    %131 = arith.truncf %129 : vector<8x64xf32> to vector<8x64xbf16>
    %cst_36 = arith.constant dense<0.000000e+00> : vector<8x64xf32>
    %132 = tpu.matmul %131, %98, %cst_36 {dimension_numbers = #tpu.dot_dimension_numbers<[1], [0], [0], [1], [0, 0, 1, 1], [], []>} : vector<8x64xbf16>, vector<64x64xbf16>, vector<8x64xf32> -> vector<8x64xf32>
    %133 = arith.addf %130, %132 : vector<8x64xf32>
    %134 = math.tanh %133 : vector<8x64xf32>
    %135 = vector.extract_strided_slice %113 {offsets = [32, 0], sizes = [8, 64], strides = [1, 1]} : vector<64x64xf32> to vector<8x64xf32>
    %136 = arith.truncf %134 : vector<8x64xf32> to vector<8x64xbf16>
    %cst_37 = arith.constant dense<0.000000e+00> : vector<8x64xf32>
    %137 = tpu.matmul %136, %98, %cst_37 {dimension_numbers = #tpu.dot_dimension_numbers<[1], [0], [0], [1], [0, 0, 1, 1], [], []>} : vector<8x64xbf16>, vector<64x64xbf16>, vector<8x64xf32> -> vector<8x64xf32>
    %138 = arith.addf %135, %137 : vector<8x64xf32>
    %139 = math.tanh %138 : vector<8x64xf32>
    %140 = vector.extract_strided_slice %113 {offsets = [40, 0], sizes = [8, 64], strides = [1, 1]} : vector<64x64xf32> to vector<8x64xf32>
    %141 = arith.truncf %139 : vector<8x64xf32> to vector<8x64xbf16>
    %cst_38 = arith.constant dense<0.000000e+00> : vector<8x64xf32>
    %142 = tpu.matmul %141, %98, %cst_38 {dimension_numbers = #tpu.dot_dimension_numbers<[1], [0], [0], [1], [0, 0, 1, 1], [], []>} : vector<8x64xbf16>, vector<64x64xbf16>, vector<8x64xf32> -> vector<8x64xf32>
    %143 = arith.addf %140, %142 : vector<8x64xf32>
    %144 = math.tanh %143 : vector<8x64xf32>
    %145 = vector.extract_strided_slice %113 {offsets = [48, 0], sizes = [8, 64], strides = [1, 1]} : vector<64x64xf32> to vector<8x64xf32>
    %146 = arith.truncf %144 : vector<8x64xf32> to vector<8x64xbf16>
    %cst_39 = arith.constant dense<0.000000e+00> : vector<8x64xf32>
    %147 = tpu.matmul %146, %98, %cst_39 {dimension_numbers = #tpu.dot_dimension_numbers<[1], [0], [0], [1], [0, 0, 1, 1], [], []>} : vector<8x64xbf16>, vector<64x64xbf16>, vector<8x64xf32> -> vector<8x64xf32>
    %148 = arith.addf %145, %147 : vector<8x64xf32>
    %149 = math.tanh %148 : vector<8x64xf32>
    %150 = vector.extract_strided_slice %113 {offsets = [56, 0], sizes = [8, 64], strides = [1, 1]} : vector<64x64xf32> to vector<8x64xf32>
    %151 = arith.truncf %149 : vector<8x64xf32> to vector<8x64xbf16>
    %cst_40 = arith.constant dense<0.000000e+00> : vector<8x64xf32>
    %152 = tpu.matmul %151, %98, %cst_40 {dimension_numbers = #tpu.dot_dimension_numbers<[1], [0], [0], [1], [0, 0, 1, 1], [], []>} : vector<8x64xbf16>, vector<64x64xbf16>, vector<8x64xf32> -> vector<8x64xf32>
    %153 = arith.addf %150, %152 : vector<8x64xf32>
    %154 = math.tanh %153 : vector<8x64xf32>
    %155 = vector.extract_strided_slice %119 {offsets = [0, 0], sizes = [8, 32], strides = [1, 1]} : vector<8x64xf32> to vector<8x32xf32>
    %156 = vector.extract_strided_slice %154 {offsets = [0, 32], sizes = [8, 32], strides = [1, 1]} : vector<8x64xf32> to vector<8x32xf32>
    %157 = tpu.concatenate %155, %156 in 1 : vector<8x32xf32>, vector<8x32xf32> -> vector<8x64xf32>
    %158 = vector.extract_strided_slice %124 {offsets = [0, 0], sizes = [8, 32], strides = [1, 1]} : vector<8x64xf32> to vector<8x32xf32>
    %159 = vector.extract_strided_slice %149 {offsets = [0, 32], sizes = [8, 32], strides = [1, 1]} : vector<8x64xf32> to vector<8x32xf32>
    %160 = tpu.concatenate %158, %159 in 1 : vector<8x32xf32>, vector<8x32xf32> -> vector<8x64xf32>
    %161 = vector.extract_strided_slice %129 {offsets = [0, 0], sizes = [8, 32], strides = [1, 1]} : vector<8x64xf32> to vector<8x32xf32>
    %162 = vector.extract_strided_slice %144 {offsets = [0, 32], sizes = [8, 32], strides = [1, 1]} : vector<8x64xf32> to vector<8x32xf32>
    %163 = tpu.concatenate %161, %162 in 1 : vector<8x32xf32>, vector<8x32xf32> -> vector<8x64xf32>
    %164 = vector.extract_strided_slice %134 {offsets = [0, 0], sizes = [8, 32], strides = [1, 1]} : vector<8x64xf32> to vector<8x32xf32>
    %165 = vector.extract_strided_slice %139 {offsets = [0, 32], sizes = [8, 32], strides = [1, 1]} : vector<8x64xf32> to vector<8x32xf32>
    %166 = tpu.concatenate %164, %165 in 1 : vector<8x32xf32>, vector<8x32xf32> -> vector<8x64xf32>
    %167 = vector.extract_strided_slice %139 {offsets = [0, 0], sizes = [8, 32], strides = [1, 1]} : vector<8x64xf32> to vector<8x32xf32>
    %168 = vector.extract_strided_slice %134 {offsets = [0, 32], sizes = [8, 32], strides = [1, 1]} : vector<8x64xf32> to vector<8x32xf32>
    %169 = tpu.concatenate %167, %168 in 1 : vector<8x32xf32>, vector<8x32xf32> -> vector<8x64xf32>
    %170 = vector.extract_strided_slice %144 {offsets = [0, 0], sizes = [8, 32], strides = [1, 1]} : vector<8x64xf32> to vector<8x32xf32>
    %171 = vector.extract_strided_slice %129 {offsets = [0, 32], sizes = [8, 32], strides = [1, 1]} : vector<8x64xf32> to vector<8x32xf32>
    %172 = tpu.concatenate %170, %171 in 1 : vector<8x32xf32>, vector<8x32xf32> -> vector<8x64xf32>
    %173 = vector.extract_strided_slice %149 {offsets = [0, 0], sizes = [8, 32], strides = [1, 1]} : vector<8x64xf32> to vector<8x32xf32>
    %174 = vector.extract_strided_slice %124 {offsets = [0, 32], sizes = [8, 32], strides = [1, 1]} : vector<8x64xf32> to vector<8x32xf32>
    %175 = tpu.concatenate %173, %174 in 1 : vector<8x32xf32>, vector<8x32xf32> -> vector<8x64xf32>
    %176 = vector.extract_strided_slice %154 {offsets = [0, 0], sizes = [8, 32], strides = [1, 1]} : vector<8x64xf32> to vector<8x32xf32>
    %177 = vector.extract_strided_slice %119 {offsets = [0, 32], sizes = [8, 32], strides = [1, 1]} : vector<8x64xf32> to vector<8x32xf32>
    %178 = tpu.concatenate %176, %177 in 1 : vector<8x32xf32>, vector<8x32xf32> -> vector<8x64xf32>
    %179 = tpu.concatenate %157, %160, %163, %166, %169, %172, %175, %178 in 0 : vector<8x64xf32>, vector<8x64xf32>, vector<8x64xf32>, vector<8x64xf32>, vector<8x64xf32>, vector<8x64xf32>, vector<8x64xf32>, vector<8x64xf32> -> vector<64x64xf32>
    %c1 = arith.constant 1 : index
    %c0_41 = arith.constant 0 : index
    %c0_42 = arith.constant 0 : index
    %180 = vector.load %arg7[%c1, %c0_41, %c0_42] : memref<4x64x64xbf16, #tpu.memory_space<vmem>>, vector<1x64x64xbf16>
    %181 = vector.shape_cast %180 : vector<1x64x64xbf16> to vector<64x64xbf16>
    %c1_43 = arith.constant 1 : index
    %c0_44 = arith.constant 0 : index
    %c0_45 = arith.constant 0 : index
    %182 = vector.load %arg8[%c1_43, %c0_44, %c0_45] : memref<4x1x64xf32, #tpu.memory_space<vmem>>, vector<1x1x64xf32>
    %183 = vector.shape_cast %182 : vector<1x1x64xf32> to vector<1x64xf32>
    %c1_46 = arith.constant 1 : index
    %c0_47 = arith.constant 0 : index
    %c0_48 = arith.constant 0 : index
    %184 = vector.load %arg9[%c1_46, %c0_47, %c0_48] : memref<4x64x64xbf16, #tpu.memory_space<vmem>>, vector<1x64x64xbf16>
    %185 = vector.shape_cast %184 : vector<1x64x64xbf16> to vector<64x64xbf16>
    %186 = arith.truncf %179 : vector<64x64xf32> to vector<64x64xbf16>
    %cst_49 = arith.constant dense<0.000000e+00> : vector<64x64xf32>
    %187 = tpu.matmul %186, %181, %cst_49 {dimension_numbers = #tpu.dot_dimension_numbers<[1], [0], [0], [1], [0, 0, 1, 1], [], []>} : vector<64x64xbf16>, vector<64x64xbf16>, vector<64x64xf32> -> vector<64x64xf32>
    %188 = vector.broadcast %183 : vector<1x64xf32> to vector<64x64xf32>
    %189 = arith.addf %187, %188 : vector<64x64xf32>
    %190 = vector.extract_strided_slice %189 {offsets = [56, 32], sizes = [8, 32], strides = [1, 1]} : vector<64x64xf32> to vector<8x32xf32>
    %191 = vector.extract_strided_slice %189 {offsets = [48, 32], sizes = [8, 32], strides = [1, 1]} : vector<64x64xf32> to vector<8x32xf32>
    %192 = vector.extract_strided_slice %189 {offsets = [40, 32], sizes = [8, 32], strides = [1, 1]} : vector<64x64xf32> to vector<8x32xf32>
    %193 = vector.extract_strided_slice %189 {offsets = [32, 32], sizes = [8, 32], strides = [1, 1]} : vector<64x64xf32> to vector<8x32xf32>
    %194 = vector.extract_strided_slice %189 {offsets = [24, 32], sizes = [8, 32], strides = [1, 1]} : vector<64x64xf32> to vector<8x32xf32>
    %195 = vector.extract_strided_slice %189 {offsets = [16, 32], sizes = [8, 32], strides = [1, 1]} : vector<64x64xf32> to vector<8x32xf32>
    %196 = vector.extract_strided_slice %189 {offsets = [8, 32], sizes = [8, 32], strides = [1, 1]} : vector<64x64xf32> to vector<8x32xf32>
    %197 = vector.extract_strided_slice %189 {offsets = [0, 32], sizes = [8, 32], strides = [1, 1]} : vector<64x64xf32> to vector<8x32xf32>
    %198 = tpu.concatenate %190, %191, %192, %193, %194, %195, %196, %197 in 0 : vector<8x32xf32>, vector<8x32xf32>, vector<8x32xf32>, vector<8x32xf32>, vector<8x32xf32>, vector<8x32xf32>, vector<8x32xf32>, vector<8x32xf32> -> vector<64x32xf32>
    %199 = vector.extract_strided_slice %189 {offsets = [0, 0], sizes = [64, 32], strides = [1, 1]} : vector<64x64xf32> to vector<64x32xf32>
    %200 = tpu.concatenate %199, %198 in 1 : vector<64x32xf32>, vector<64x32xf32> -> vector<64x64xf32>
    %cst_50 = arith.constant 0.000000e+00 : f32
    %201 = vector.broadcast %cst_50 : f32 to vector<8x64xf32>
    %202 = vector.extract_strided_slice %200 {offsets = [0, 0], sizes = [8, 64], strides = [1, 1]} : vector<64x64xf32> to vector<8x64xf32>
    %203 = arith.truncf %201 : vector<8x64xf32> to vector<8x64xbf16>
    %cst_51 = arith.constant dense<0.000000e+00> : vector<8x64xf32>
    %204 = tpu.matmul %203, %185, %cst_51 {dimension_numbers = #tpu.dot_dimension_numbers<[1], [0], [0], [1], [0, 0, 1, 1], [], []>} : vector<8x64xbf16>, vector<64x64xbf16>, vector<8x64xf32> -> vector<8x64xf32>
    %205 = arith.addf %202, %204 : vector<8x64xf32>
    %206 = math.tanh %205 : vector<8x64xf32>
    %207 = vector.extract_strided_slice %200 {offsets = [8, 0], sizes = [8, 64], strides = [1, 1]} : vector<64x64xf32> to vector<8x64xf32>
    %208 = arith.truncf %206 : vector<8x64xf32> to vector<8x64xbf16>
    %cst_52 = arith.constant dense<0.000000e+00> : vector<8x64xf32>
    %209 = tpu.matmul %208, %185, %cst_52 {dimension_numbers = #tpu.dot_dimension_numbers<[1], [0], [0], [1], [0, 0, 1, 1], [], []>} : vector<8x64xbf16>, vector<64x64xbf16>, vector<8x64xf32> -> vector<8x64xf32>
    %210 = arith.addf %207, %209 : vector<8x64xf32>
    %211 = math.tanh %210 : vector<8x64xf32>
    %212 = vector.extract_strided_slice %200 {offsets = [16, 0], sizes = [8, 64], strides = [1, 1]} : vector<64x64xf32> to vector<8x64xf32>
    %213 = arith.truncf %211 : vector<8x64xf32> to vector<8x64xbf16>
    %cst_53 = arith.constant dense<0.000000e+00> : vector<8x64xf32>
    %214 = tpu.matmul %213, %185, %cst_53 {dimension_numbers = #tpu.dot_dimension_numbers<[1], [0], [0], [1], [0, 0, 1, 1], [], []>} : vector<8x64xbf16>, vector<64x64xbf16>, vector<8x64xf32> -> vector<8x64xf32>
    %215 = arith.addf %212, %214 : vector<8x64xf32>
    %216 = math.tanh %215 : vector<8x64xf32>
    %217 = vector.extract_strided_slice %200 {offsets = [24, 0], sizes = [8, 64], strides = [1, 1]} : vector<64x64xf32> to vector<8x64xf32>
    %218 = arith.truncf %216 : vector<8x64xf32> to vector<8x64xbf16>
    %cst_54 = arith.constant dense<0.000000e+00> : vector<8x64xf32>
    %219 = tpu.matmul %218, %185, %cst_54 {dimension_numbers = #tpu.dot_dimension_numbers<[1], [0], [0], [1], [0, 0, 1, 1], [], []>} : vector<8x64xbf16>, vector<64x64xbf16>, vector<8x64xf32> -> vector<8x64xf32>
    %220 = arith.addf %217, %219 : vector<8x64xf32>
    %221 = math.tanh %220 : vector<8x64xf32>
    %222 = vector.extract_strided_slice %200 {offsets = [32, 0], sizes = [8, 64], strides = [1, 1]} : vector<64x64xf32> to vector<8x64xf32>
    %223 = arith.truncf %221 : vector<8x64xf32> to vector<8x64xbf16>
    %cst_55 = arith.constant dense<0.000000e+00> : vector<8x64xf32>
    %224 = tpu.matmul %223, %185, %cst_55 {dimension_numbers = #tpu.dot_dimension_numbers<[1], [0], [0], [1], [0, 0, 1, 1], [], []>} : vector<8x64xbf16>, vector<64x64xbf16>, vector<8x64xf32> -> vector<8x64xf32>
    %225 = arith.addf %222, %224 : vector<8x64xf32>
    %226 = math.tanh %225 : vector<8x64xf32>
    %227 = vector.extract_strided_slice %200 {offsets = [40, 0], sizes = [8, 64], strides = [1, 1]} : vector<64x64xf32> to vector<8x64xf32>
    %228 = arith.truncf %226 : vector<8x64xf32> to vector<8x64xbf16>
    %cst_56 = arith.constant dense<0.000000e+00> : vector<8x64xf32>
    %229 = tpu.matmul %228, %185, %cst_56 {dimension_numbers = #tpu.dot_dimension_numbers<[1], [0], [0], [1], [0, 0, 1, 1], [], []>} : vector<8x64xbf16>, vector<64x64xbf16>, vector<8x64xf32> -> vector<8x64xf32>
    %230 = arith.addf %227, %229 : vector<8x64xf32>
    %231 = math.tanh %230 : vector<8x64xf32>
    %232 = vector.extract_strided_slice %200 {offsets = [48, 0], sizes = [8, 64], strides = [1, 1]} : vector<64x64xf32> to vector<8x64xf32>
    %233 = arith.truncf %231 : vector<8x64xf32> to vector<8x64xbf16>
    %cst_57 = arith.constant dense<0.000000e+00> : vector<8x64xf32>
    %234 = tpu.matmul %233, %185, %cst_57 {dimension_numbers = #tpu.dot_dimension_numbers<[1], [0], [0], [1], [0, 0, 1, 1], [], []>} : vector<8x64xbf16>, vector<64x64xbf16>, vector<8x64xf32> -> vector<8x64xf32>
    %235 = arith.addf %232, %234 : vector<8x64xf32>
    %236 = math.tanh %235 : vector<8x64xf32>
    %237 = vector.extract_strided_slice %200 {offsets = [56, 0], sizes = [8, 64], strides = [1, 1]} : vector<64x64xf32> to vector<8x64xf32>
    %238 = arith.truncf %236 : vector<8x64xf32> to vector<8x64xbf16>
    %cst_58 = arith.constant dense<0.000000e+00> : vector<8x64xf32>
    %239 = tpu.matmul %238, %185, %cst_58 {dimension_numbers = #tpu.dot_dimension_numbers<[1], [0], [0], [1], [0, 0, 1, 1], [], []>} : vector<8x64xbf16>, vector<64x64xbf16>, vector<8x64xf32> -> vector<8x64xf32>
    %240 = arith.addf %237, %239 : vector<8x64xf32>
    %241 = math.tanh %240 : vector<8x64xf32>
    %242 = vector.extract_strided_slice %206 {offsets = [0, 0], sizes = [8, 32], strides = [1, 1]} : vector<8x64xf32> to vector<8x32xf32>
    %243 = vector.extract_strided_slice %241 {offsets = [0, 32], sizes = [8, 32], strides = [1, 1]} : vector<8x64xf32> to vector<8x32xf32>
    %244 = tpu.concatenate %242, %243 in 1 : vector<8x32xf32>, vector<8x32xf32> -> vector<8x64xf32>
    %245 = vector.extract_strided_slice %211 {offsets = [0, 0], sizes = [8, 32], strides = [1, 1]} : vector<8x64xf32> to vector<8x32xf32>
    %246 = vector.extract_strided_slice %236 {offsets = [0, 32], sizes = [8, 32], strides = [1, 1]} : vector<8x64xf32> to vector<8x32xf32>
    %247 = tpu.concatenate %245, %246 in 1 : vector<8x32xf32>, vector<8x32xf32> -> vector<8x64xf32>
    %248 = vector.extract_strided_slice %216 {offsets = [0, 0], sizes = [8, 32], strides = [1, 1]} : vector<8x64xf32> to vector<8x32xf32>
    %249 = vector.extract_strided_slice %231 {offsets = [0, 32], sizes = [8, 32], strides = [1, 1]} : vector<8x64xf32> to vector<8x32xf32>
    %250 = tpu.concatenate %248, %249 in 1 : vector<8x32xf32>, vector<8x32xf32> -> vector<8x64xf32>
    %251 = vector.extract_strided_slice %221 {offsets = [0, 0], sizes = [8, 32], strides = [1, 1]} : vector<8x64xf32> to vector<8x32xf32>
    %252 = vector.extract_strided_slice %226 {offsets = [0, 32], sizes = [8, 32], strides = [1, 1]} : vector<8x64xf32> to vector<8x32xf32>
    %253 = tpu.concatenate %251, %252 in 1 : vector<8x32xf32>, vector<8x32xf32> -> vector<8x64xf32>
    %254 = vector.extract_strided_slice %226 {offsets = [0, 0], sizes = [8, 32], strides = [1, 1]} : vector<8x64xf32> to vector<8x32xf32>
    %255 = vector.extract_strided_slice %221 {offsets = [0, 32], sizes = [8, 32], strides = [1, 1]} : vector<8x64xf32> to vector<8x32xf32>
    %256 = tpu.concatenate %254, %255 in 1 : vector<8x32xf32>, vector<8x32xf32> -> vector<8x64xf32>
    %257 = vector.extract_strided_slice %231 {offsets = [0, 0], sizes = [8, 32], strides = [1, 1]} : vector<8x64xf32> to vector<8x32xf32>
    %258 = vector.extract_strided_slice %216 {offsets = [0, 32], sizes = [8, 32], strides = [1, 1]} : vector<8x64xf32> to vector<8x32xf32>
    %259 = tpu.concatenate %257, %258 in 1 : vector<8x32xf32>, vector<8x32xf32> -> vector<8x64xf32>
    %260 = vector.extract_strided_slice %236 {offsets = [0, 0], sizes = [8, 32], strides = [1, 1]} : vector<8x64xf32> to vector<8x32xf32>
    %261 = vector.extract_strided_slice %211 {offsets = [0, 32], sizes = [8, 32], strides = [1, 1]} : vector<8x64xf32> to vector<8x32xf32>
    %262 = tpu.concatenate %260, %261 in 1 : vector<8x32xf32>, vector<8x32xf32> -> vector<8x64xf32>
    %263 = vector.extract_strided_slice %241 {offsets = [0, 0], sizes = [8, 32], strides = [1, 1]} : vector<8x64xf32> to vector<8x32xf32>
    %264 = vector.extract_strided_slice %206 {offsets = [0, 32], sizes = [8, 32], strides = [1, 1]} : vector<8x64xf32> to vector<8x32xf32>
    %265 = tpu.concatenate %263, %264 in 1 : vector<8x32xf32>, vector<8x32xf32> -> vector<8x64xf32>
    %266 = tpu.concatenate %244, %247, %250, %253, %256, %259, %262, %265 in 0 : vector<8x64xf32>, vector<8x64xf32>, vector<8x64xf32>, vector<8x64xf32>, vector<8x64xf32>, vector<8x64xf32>, vector<8x64xf32>, vector<8x64xf32> -> vector<64x64xf32>
    %c2 = arith.constant 2 : index
    %c0_59 = arith.constant 0 : index
    %c0_60 = arith.constant 0 : index
    %267 = vector.load %arg7[%c2, %c0_59, %c0_60] : memref<4x64x64xbf16, #tpu.memory_space<vmem>>, vector<1x64x64xbf16>
    %268 = vector.shape_cast %267 : vector<1x64x64xbf16> to vector<64x64xbf16>
    %c2_61 = arith.constant 2 : index
    %c0_62 = arith.constant 0 : index
    %c0_63 = arith.constant 0 : index
    %269 = vector.load %arg8[%c2_61, %c0_62, %c0_63] : memref<4x1x64xf32, #tpu.memory_space<vmem>>, vector<1x1x64xf32>
    %270 = vector.shape_cast %269 : vector<1x1x64xf32> to vector<1x64xf32>
    %c2_64 = arith.constant 2 : index
    %c0_65 = arith.constant 0 : index
    %c0_66 = arith.constant 0 : index
    %271 = vector.load %arg9[%c2_64, %c0_65, %c0_66] : memref<4x64x64xbf16, #tpu.memory_space<vmem>>, vector<1x64x64xbf16>
    %272 = vector.shape_cast %271 : vector<1x64x64xbf16> to vector<64x64xbf16>
    %273 = arith.truncf %266 : vector<64x64xf32> to vector<64x64xbf16>
    %cst_67 = arith.constant dense<0.000000e+00> : vector<64x64xf32>
    %274 = tpu.matmul %273, %268, %cst_67 {dimension_numbers = #tpu.dot_dimension_numbers<[1], [0], [0], [1], [0, 0, 1, 1], [], []>} : vector<64x64xbf16>, vector<64x64xbf16>, vector<64x64xf32> -> vector<64x64xf32>
    %275 = vector.broadcast %270 : vector<1x64xf32> to vector<64x64xf32>
    %276 = arith.addf %274, %275 : vector<64x64xf32>
    %277 = vector.extract_strided_slice %276 {offsets = [56, 32], sizes = [8, 32], strides = [1, 1]} : vector<64x64xf32> to vector<8x32xf32>
    %278 = vector.extract_strided_slice %276 {offsets = [48, 32], sizes = [8, 32], strides = [1, 1]} : vector<64x64xf32> to vector<8x32xf32>
    %279 = vector.extract_strided_slice %276 {offsets = [40, 32], sizes = [8, 32], strides = [1, 1]} : vector<64x64xf32> to vector<8x32xf32>
    %280 = vector.extract_strided_slice %276 {offsets = [32, 32], sizes = [8, 32], strides = [1, 1]} : vector<64x64xf32> to vector<8x32xf32>
    %281 = vector.extract_strided_slice %276 {offsets = [24, 32], sizes = [8, 32], strides = [1, 1]} : vector<64x64xf32> to vector<8x32xf32>
    %282 = vector.extract_strided_slice %276 {offsets = [16, 32], sizes = [8, 32], strides = [1, 1]} : vector<64x64xf32> to vector<8x32xf32>
    %283 = vector.extract_strided_slice %276 {offsets = [8, 32], sizes = [8, 32], strides = [1, 1]} : vector<64x64xf32> to vector<8x32xf32>
    %284 = vector.extract_strided_slice %276 {offsets = [0, 32], sizes = [8, 32], strides = [1, 1]} : vector<64x64xf32> to vector<8x32xf32>
    %285 = tpu.concatenate %277, %278, %279, %280, %281, %282, %283, %284 in 0 : vector<8x32xf32>, vector<8x32xf32>, vector<8x32xf32>, vector<8x32xf32>, vector<8x32xf32>, vector<8x32xf32>, vector<8x32xf32>, vector<8x32xf32> -> vector<64x32xf32>
    %286 = vector.extract_strided_slice %276 {offsets = [0, 0], sizes = [64, 32], strides = [1, 1]} : vector<64x64xf32> to vector<64x32xf32>
    %287 = tpu.concatenate %286, %285 in 1 : vector<64x32xf32>, vector<64x32xf32> -> vector<64x64xf32>
    %cst_68 = arith.constant 0.000000e+00 : f32
    %288 = vector.broadcast %cst_68 : f32 to vector<8x64xf32>
    %289 = vector.extract_strided_slice %287 {offsets = [0, 0], sizes = [8, 64], strides = [1, 1]} : vector<64x64xf32> to vector<8x64xf32>
    %290 = arith.truncf %288 : vector<8x64xf32> to vector<8x64xbf16>
    %cst_69 = arith.constant dense<0.000000e+00> : vector<8x64xf32>
    %291 = tpu.matmul %290, %272, %cst_69 {dimension_numbers = #tpu.dot_dimension_numbers<[1], [0], [0], [1], [0, 0, 1, 1], [], []>} : vector<8x64xbf16>, vector<64x64xbf16>, vector<8x64xf32> -> vector<8x64xf32>
    %292 = arith.addf %289, %291 : vector<8x64xf32>
    %293 = math.tanh %292 : vector<8x64xf32>
    %294 = vector.extract_strided_slice %287 {offsets = [8, 0], sizes = [8, 64], strides = [1, 1]} : vector<64x64xf32> to vector<8x64xf32>
    %295 = arith.truncf %293 : vector<8x64xf32> to vector<8x64xbf16>
    %cst_70 = arith.constant dense<0.000000e+00> : vector<8x64xf32>
    %296 = tpu.matmul %295, %272, %cst_70 {dimension_numbers = #tpu.dot_dimension_numbers<[1], [0], [0], [1], [0, 0, 1, 1], [], []>} : vector<8x64xbf16>, vector<64x64xbf16>, vector<8x64xf32> -> vector<8x64xf32>
    %297 = arith.addf %294, %296 : vector<8x64xf32>
    %298 = math.tanh %297 : vector<8x64xf32>
    %299 = vector.extract_strided_slice %287 {offsets = [16, 0], sizes = [8, 64], strides = [1, 1]} : vector<64x64xf32> to vector<8x64xf32>
    %300 = arith.truncf %298 : vector<8x64xf32> to vector<8x64xbf16>
    %cst_71 = arith.constant dense<0.000000e+00> : vector<8x64xf32>
    %301 = tpu.matmul %300, %272, %cst_71 {dimension_numbers = #tpu.dot_dimension_numbers<[1], [0], [0], [1], [0, 0, 1, 1], [], []>} : vector<8x64xbf16>, vector<64x64xbf16>, vector<8x64xf32> -> vector<8x64xf32>
    %302 = arith.addf %299, %301 : vector<8x64xf32>
    %303 = math.tanh %302 : vector<8x64xf32>
    %304 = vector.extract_strided_slice %287 {offsets = [24, 0], sizes = [8, 64], strides = [1, 1]} : vector<64x64xf32> to vector<8x64xf32>
    %305 = arith.truncf %303 : vector<8x64xf32> to vector<8x64xbf16>
    %cst_72 = arith.constant dense<0.000000e+00> : vector<8x64xf32>
    %306 = tpu.matmul %305, %272, %cst_72 {dimension_numbers = #tpu.dot_dimension_numbers<[1], [0], [0], [1], [0, 0, 1, 1], [], []>} : vector<8x64xbf16>, vector<64x64xbf16>, vector<8x64xf32> -> vector<8x64xf32>
    %307 = arith.addf %304, %306 : vector<8x64xf32>
    %308 = math.tanh %307 : vector<8x64xf32>
    %309 = vector.extract_strided_slice %287 {offsets = [32, 0], sizes = [8, 64], strides = [1, 1]} : vector<64x64xf32> to vector<8x64xf32>
    %310 = arith.truncf %308 : vector<8x64xf32> to vector<8x64xbf16>
    %cst_73 = arith.constant dense<0.000000e+00> : vector<8x64xf32>
    %311 = tpu.matmul %310, %272, %cst_73 {dimension_numbers = #tpu.dot_dimension_numbers<[1], [0], [0], [1], [0, 0, 1, 1], [], []>} : vector<8x64xbf16>, vector<64x64xbf16>, vector<8x64xf32> -> vector<8x64xf32>
    %312 = arith.addf %309, %311 : vector<8x64xf32>
    %313 = math.tanh %312 : vector<8x64xf32>
    %314 = vector.extract_strided_slice %287 {offsets = [40, 0], sizes = [8, 64], strides = [1, 1]} : vector<64x64xf32> to vector<8x64xf32>
    %315 = arith.truncf %313 : vector<8x64xf32> to vector<8x64xbf16>
    %cst_74 = arith.constant dense<0.000000e+00> : vector<8x64xf32>
    %316 = tpu.matmul %315, %272, %cst_74 {dimension_numbers = #tpu.dot_dimension_numbers<[1], [0], [0], [1], [0, 0, 1, 1], [], []>} : vector<8x64xbf16>, vector<64x64xbf16>, vector<8x64xf32> -> vector<8x64xf32>
    %317 = arith.addf %314, %316 : vector<8x64xf32>
    %318 = math.tanh %317 : vector<8x64xf32>
    %319 = vector.extract_strided_slice %287 {offsets = [48, 0], sizes = [8, 64], strides = [1, 1]} : vector<64x64xf32> to vector<8x64xf32>
    %320 = arith.truncf %318 : vector<8x64xf32> to vector<8x64xbf16>
    %cst_75 = arith.constant dense<0.000000e+00> : vector<8x64xf32>
    %321 = tpu.matmul %320, %272, %cst_75 {dimension_numbers = #tpu.dot_dimension_numbers<[1], [0], [0], [1], [0, 0, 1, 1], [], []>} : vector<8x64xbf16>, vector<64x64xbf16>, vector<8x64xf32> -> vector<8x64xf32>
    %322 = arith.addf %319, %321 : vector<8x64xf32>
    %323 = math.tanh %322 : vector<8x64xf32>
    %324 = vector.extract_strided_slice %287 {offsets = [56, 0], sizes = [8, 64], strides = [1, 1]} : vector<64x64xf32> to vector<8x64xf32>
    %325 = arith.truncf %323 : vector<8x64xf32> to vector<8x64xbf16>
    %cst_76 = arith.constant dense<0.000000e+00> : vector<8x64xf32>
    %326 = tpu.matmul %325, %272, %cst_76 {dimension_numbers = #tpu.dot_dimension_numbers<[1], [0], [0], [1], [0, 0, 1, 1], [], []>} : vector<8x64xbf16>, vector<64x64xbf16>, vector<8x64xf32> -> vector<8x64xf32>
    %327 = arith.addf %324, %326 : vector<8x64xf32>
    %328 = math.tanh %327 : vector<8x64xf32>
    %329 = vector.extract_strided_slice %293 {offsets = [0, 0], sizes = [8, 32], strides = [1, 1]} : vector<8x64xf32> to vector<8x32xf32>
    %330 = vector.extract_strided_slice %328 {offsets = [0, 32], sizes = [8, 32], strides = [1, 1]} : vector<8x64xf32> to vector<8x32xf32>
    %331 = tpu.concatenate %329, %330 in 1 : vector<8x32xf32>, vector<8x32xf32> -> vector<8x64xf32>
    %332 = vector.extract_strided_slice %298 {offsets = [0, 0], sizes = [8, 32], strides = [1, 1]} : vector<8x64xf32> to vector<8x32xf32>
    %333 = vector.extract_strided_slice %323 {offsets = [0, 32], sizes = [8, 32], strides = [1, 1]} : vector<8x64xf32> to vector<8x32xf32>
    %334 = tpu.concatenate %332, %333 in 1 : vector<8x32xf32>, vector<8x32xf32> -> vector<8x64xf32>
    %335 = vector.extract_strided_slice %303 {offsets = [0, 0], sizes = [8, 32], strides = [1, 1]} : vector<8x64xf32> to vector<8x32xf32>
    %336 = vector.extract_strided_slice %318 {offsets = [0, 32], sizes = [8, 32], strides = [1, 1]} : vector<8x64xf32> to vector<8x32xf32>
    %337 = tpu.concatenate %335, %336 in 1 : vector<8x32xf32>, vector<8x32xf32> -> vector<8x64xf32>
    %338 = vector.extract_strided_slice %308 {offsets = [0, 0], sizes = [8, 32], strides = [1, 1]} : vector<8x64xf32> to vector<8x32xf32>
    %339 = vector.extract_strided_slice %313 {offsets = [0, 32], sizes = [8, 32], strides = [1, 1]} : vector<8x64xf32> to vector<8x32xf32>
    %340 = tpu.concatenate %338, %339 in 1 : vector<8x32xf32>, vector<8x32xf32> -> vector<8x64xf32>
    %341 = vector.extract_strided_slice %313 {offsets = [0, 0], sizes = [8, 32], strides = [1, 1]} : vector<8x64xf32> to vector<8x32xf32>
    %342 = vector.extract_strided_slice %308 {offsets = [0, 32], sizes = [8, 32], strides = [1, 1]} : vector<8x64xf32> to vector<8x32xf32>
    %343 = tpu.concatenate %341, %342 in 1 : vector<8x32xf32>, vector<8x32xf32> -> vector<8x64xf32>
    %344 = vector.extract_strided_slice %318 {offsets = [0, 0], sizes = [8, 32], strides = [1, 1]} : vector<8x64xf32> to vector<8x32xf32>
    %345 = vector.extract_strided_slice %303 {offsets = [0, 32], sizes = [8, 32], strides = [1, 1]} : vector<8x64xf32> to vector<8x32xf32>
    %346 = tpu.concatenate %344, %345 in 1 : vector<8x32xf32>, vector<8x32xf32> -> vector<8x64xf32>
    %347 = vector.extract_strided_slice %323 {offsets = [0, 0], sizes = [8, 32], strides = [1, 1]} : vector<8x64xf32> to vector<8x32xf32>
    %348 = vector.extract_strided_slice %298 {offsets = [0, 32], sizes = [8, 32], strides = [1, 1]} : vector<8x64xf32> to vector<8x32xf32>
    %349 = tpu.concatenate %347, %348 in 1 : vector<8x32xf32>, vector<8x32xf32> -> vector<8x64xf32>
    %350 = vector.extract_strided_slice %328 {offsets = [0, 0], sizes = [8, 32], strides = [1, 1]} : vector<8x64xf32> to vector<8x32xf32>
    %351 = vector.extract_strided_slice %293 {offsets = [0, 32], sizes = [8, 32], strides = [1, 1]} : vector<8x64xf32> to vector<8x32xf32>
    %352 = tpu.concatenate %350, %351 in 1 : vector<8x32xf32>, vector<8x32xf32> -> vector<8x64xf32>
    %353 = tpu.concatenate %331, %334, %337, %340, %343, %346, %349, %352 in 0 : vector<8x64xf32>, vector<8x64xf32>, vector<8x64xf32>, vector<8x64xf32>, vector<8x64xf32>, vector<8x64xf32>, vector<8x64xf32>, vector<8x64xf32> -> vector<64x64xf32>
    %c3 = arith.constant 3 : index
    %c0_77 = arith.constant 0 : index
    %c0_78 = arith.constant 0 : index
    %354 = vector.load %arg7[%c3, %c0_77, %c0_78] : memref<4x64x64xbf16, #tpu.memory_space<vmem>>, vector<1x64x64xbf16>
    %355 = vector.shape_cast %354 : vector<1x64x64xbf16> to vector<64x64xbf16>
    %c3_79 = arith.constant 3 : index
    %c0_80 = arith.constant 0 : index
    %c0_81 = arith.constant 0 : index
    %356 = vector.load %arg8[%c3_79, %c0_80, %c0_81] : memref<4x1x64xf32, #tpu.memory_space<vmem>>, vector<1x1x64xf32>
    %357 = vector.shape_cast %356 : vector<1x1x64xf32> to vector<1x64xf32>
    %c3_82 = arith.constant 3 : index
    %c0_83 = arith.constant 0 : index
    %c0_84 = arith.constant 0 : index
    %358 = vector.load %arg9[%c3_82, %c0_83, %c0_84] : memref<4x64x64xbf16, #tpu.memory_space<vmem>>, vector<1x64x64xbf16>
    %359 = vector.shape_cast %358 : vector<1x64x64xbf16> to vector<64x64xbf16>
    %360 = arith.truncf %353 : vector<64x64xf32> to vector<64x64xbf16>
    %cst_85 = arith.constant dense<0.000000e+00> : vector<64x64xf32>
    %361 = tpu.matmul %360, %355, %cst_85 {dimension_numbers = #tpu.dot_dimension_numbers<[1], [0], [0], [1], [0, 0, 1, 1], [], []>} : vector<64x64xbf16>, vector<64x64xbf16>, vector<64x64xf32> -> vector<64x64xf32>
    %362 = vector.broadcast %357 : vector<1x64xf32> to vector<64x64xf32>
    %363 = arith.addf %361, %362 : vector<64x64xf32>
    %364 = vector.extract_strided_slice %363 {offsets = [56, 32], sizes = [8, 32], strides = [1, 1]} : vector<64x64xf32> to vector<8x32xf32>
    %365 = vector.extract_strided_slice %363 {offsets = [48, 32], sizes = [8, 32], strides = [1, 1]} : vector<64x64xf32> to vector<8x32xf32>
    %366 = vector.extract_strided_slice %363 {offsets = [40, 32], sizes = [8, 32], strides = [1, 1]} : vector<64x64xf32> to vector<8x32xf32>
    %367 = vector.extract_strided_slice %363 {offsets = [32, 32], sizes = [8, 32], strides = [1, 1]} : vector<64x64xf32> to vector<8x32xf32>
    %368 = vector.extract_strided_slice %363 {offsets = [24, 32], sizes = [8, 32], strides = [1, 1]} : vector<64x64xf32> to vector<8x32xf32>
    %369 = vector.extract_strided_slice %363 {offsets = [16, 32], sizes = [8, 32], strides = [1, 1]} : vector<64x64xf32> to vector<8x32xf32>
    %370 = vector.extract_strided_slice %363 {offsets = [8, 32], sizes = [8, 32], strides = [1, 1]} : vector<64x64xf32> to vector<8x32xf32>
    %371 = vector.extract_strided_slice %363 {offsets = [0, 32], sizes = [8, 32], strides = [1, 1]} : vector<64x64xf32> to vector<8x32xf32>
    %372 = tpu.concatenate %364, %365, %366, %367, %368, %369, %370, %371 in 0 : vector<8x32xf32>, vector<8x32xf32>, vector<8x32xf32>, vector<8x32xf32>, vector<8x32xf32>, vector<8x32xf32>, vector<8x32xf32>, vector<8x32xf32> -> vector<64x32xf32>
    %373 = vector.extract_strided_slice %363 {offsets = [0, 0], sizes = [64, 32], strides = [1, 1]} : vector<64x64xf32> to vector<64x32xf32>
    %374 = tpu.concatenate %373, %372 in 1 : vector<64x32xf32>, vector<64x32xf32> -> vector<64x64xf32>
    %cst_86 = arith.constant 0.000000e+00 : f32
    %375 = vector.broadcast %cst_86 : f32 to vector<8x64xf32>
    %376 = vector.extract_strided_slice %374 {offsets = [0, 0], sizes = [8, 64], strides = [1, 1]} : vector<64x64xf32> to vector<8x64xf32>
    %377 = arith.truncf %375 : vector<8x64xf32> to vector<8x64xbf16>
    %cst_87 = arith.constant dense<0.000000e+00> : vector<8x64xf32>
    %378 = tpu.matmul %377, %359, %cst_87 {dimension_numbers = #tpu.dot_dimension_numbers<[1], [0], [0], [1], [0, 0, 1, 1], [], []>} : vector<8x64xbf16>, vector<64x64xbf16>, vector<8x64xf32> -> vector<8x64xf32>
    %379 = arith.addf %376, %378 : vector<8x64xf32>
    %380 = math.tanh %379 : vector<8x64xf32>
    %381 = vector.extract_strided_slice %374 {offsets = [8, 0], sizes = [8, 64], strides = [1, 1]} : vector<64x64xf32> to vector<8x64xf32>
    %382 = arith.truncf %380 : vector<8x64xf32> to vector<8x64xbf16>
    %cst_88 = arith.constant dense<0.000000e+00> : vector<8x64xf32>
    %383 = tpu.matmul %382, %359, %cst_88 {dimension_numbers = #tpu.dot_dimension_numbers<[1], [0], [0], [1], [0, 0, 1, 1], [], []>} : vector<8x64xbf16>, vector<64x64xbf16>, vector<8x64xf32> -> vector<8x64xf32>
    %384 = arith.addf %381, %383 : vector<8x64xf32>
    %385 = math.tanh %384 : vector<8x64xf32>
    %386 = vector.extract_strided_slice %374 {offsets = [16, 0], sizes = [8, 64], strides = [1, 1]} : vector<64x64xf32> to vector<8x64xf32>
    %387 = arith.truncf %385 : vector<8x64xf32> to vector<8x64xbf16>
    %cst_89 = arith.constant dense<0.000000e+00> : vector<8x64xf32>
    %388 = tpu.matmul %387, %359, %cst_89 {dimension_numbers = #tpu.dot_dimension_numbers<[1], [0], [0], [1], [0, 0, 1, 1], [], []>} : vector<8x64xbf16>, vector<64x64xbf16>, vector<8x64xf32> -> vector<8x64xf32>
    %389 = arith.addf %386, %388 : vector<8x64xf32>
    %390 = math.tanh %389 : vector<8x64xf32>
    %391 = vector.extract_strided_slice %374 {offsets = [24, 0], sizes = [8, 64], strides = [1, 1]} : vector<64x64xf32> to vector<8x64xf32>
    %392 = arith.truncf %390 : vector<8x64xf32> to vector<8x64xbf16>
    %cst_90 = arith.constant dense<0.000000e+00> : vector<8x64xf32>
    %393 = tpu.matmul %392, %359, %cst_90 {dimension_numbers = #tpu.dot_dimension_numbers<[1], [0], [0], [1], [0, 0, 1, 1], [], []>} : vector<8x64xbf16>, vector<64x64xbf16>, vector<8x64xf32> -> vector<8x64xf32>
    %394 = arith.addf %391, %393 : vector<8x64xf32>
    %395 = math.tanh %394 : vector<8x64xf32>
    %396 = vector.extract_strided_slice %374 {offsets = [32, 0], sizes = [8, 64], strides = [1, 1]} : vector<64x64xf32> to vector<8x64xf32>
    %397 = arith.truncf %395 : vector<8x64xf32> to vector<8x64xbf16>
    %cst_91 = arith.constant dense<0.000000e+00> : vector<8x64xf32>
    %398 = tpu.matmul %397, %359, %cst_91 {dimension_numbers = #tpu.dot_dimension_numbers<[1], [0], [0], [1], [0, 0, 1, 1], [], []>} : vector<8x64xbf16>, vector<64x64xbf16>, vector<8x64xf32> -> vector<8x64xf32>
    %399 = arith.addf %396, %398 : vector<8x64xf32>
    %400 = math.tanh %399 : vector<8x64xf32>
    %401 = vector.extract_strided_slice %374 {offsets = [40, 0], sizes = [8, 64], strides = [1, 1]} : vector<64x64xf32> to vector<8x64xf32>
    %402 = arith.truncf %400 : vector<8x64xf32> to vector<8x64xbf16>
    %cst_92 = arith.constant dense<0.000000e+00> : vector<8x64xf32>
    %403 = tpu.matmul %402, %359, %cst_92 {dimension_numbers = #tpu.dot_dimension_numbers<[1], [0], [0], [1], [0, 0, 1, 1], [], []>} : vector<8x64xbf16>, vector<64x64xbf16>, vector<8x64xf32> -> vector<8x64xf32>
    %404 = arith.addf %401, %403 : vector<8x64xf32>
    %405 = math.tanh %404 : vector<8x64xf32>
    %406 = vector.extract_strided_slice %374 {offsets = [48, 0], sizes = [8, 64], strides = [1, 1]} : vector<64x64xf32> to vector<8x64xf32>
    %407 = arith.truncf %405 : vector<8x64xf32> to vector<8x64xbf16>
    %cst_93 = arith.constant dense<0.000000e+00> : vector<8x64xf32>
    %408 = tpu.matmul %407, %359, %cst_93 {dimension_numbers = #tpu.dot_dimension_numbers<[1], [0], [0], [1], [0, 0, 1, 1], [], []>} : vector<8x64xbf16>, vector<64x64xbf16>, vector<8x64xf32> -> vector<8x64xf32>
    %409 = arith.addf %406, %408 : vector<8x64xf32>
    %410 = math.tanh %409 : vector<8x64xf32>
    %411 = vector.extract_strided_slice %374 {offsets = [56, 0], sizes = [8, 64], strides = [1, 1]} : vector<64x64xf32> to vector<8x64xf32>
    %412 = arith.truncf %410 : vector<8x64xf32> to vector<8x64xbf16>
    %cst_94 = arith.constant dense<0.000000e+00> : vector<8x64xf32>
    %413 = tpu.matmul %412, %359, %cst_94 {dimension_numbers = #tpu.dot_dimension_numbers<[1], [0], [0], [1], [0, 0, 1, 1], [], []>} : vector<8x64xbf16>, vector<64x64xbf16>, vector<8x64xf32> -> vector<8x64xf32>
    %414 = arith.addf %411, %413 : vector<8x64xf32>
    %415 = math.tanh %414 : vector<8x64xf32>
    %416 = vector.extract_strided_slice %380 {offsets = [0, 0], sizes = [8, 32], strides = [1, 1]} : vector<8x64xf32> to vector<8x32xf32>
    %417 = vector.extract_strided_slice %415 {offsets = [0, 32], sizes = [8, 32], strides = [1, 1]} : vector<8x64xf32> to vector<8x32xf32>
    %418 = tpu.concatenate %416, %417 in 1 : vector<8x32xf32>, vector<8x32xf32> -> vector<8x64xf32>
    %419 = vector.extract_strided_slice %385 {offsets = [0, 0], sizes = [8, 32], strides = [1, 1]} : vector<8x64xf32> to vector<8x32xf32>
    %420 = vector.extract_strided_slice %410 {offsets = [0, 32], sizes = [8, 32], strides = [1, 1]} : vector<8x64xf32> to vector<8x32xf32>
    %421 = tpu.concatenate %419, %420 in 1 : vector<8x32xf32>, vector<8x32xf32> -> vector<8x64xf32>
    %422 = vector.extract_strided_slice %390 {offsets = [0, 0], sizes = [8, 32], strides = [1, 1]} : vector<8x64xf32> to vector<8x32xf32>
    %423 = vector.extract_strided_slice %405 {offsets = [0, 32], sizes = [8, 32], strides = [1, 1]} : vector<8x64xf32> to vector<8x32xf32>
    %424 = tpu.concatenate %422, %423 in 1 : vector<8x32xf32>, vector<8x32xf32> -> vector<8x64xf32>
    %425 = vector.extract_strided_slice %395 {offsets = [0, 0], sizes = [8, 32], strides = [1, 1]} : vector<8x64xf32> to vector<8x32xf32>
    %426 = vector.extract_strided_slice %400 {offsets = [0, 32], sizes = [8, 32], strides = [1, 1]} : vector<8x64xf32> to vector<8x32xf32>
    %427 = tpu.concatenate %425, %426 in 1 : vector<8x32xf32>, vector<8x32xf32> -> vector<8x64xf32>
    %428 = vector.extract_strided_slice %400 {offsets = [0, 0], sizes = [8, 32], strides = [1, 1]} : vector<8x64xf32> to vector<8x32xf32>
    %429 = vector.extract_strided_slice %395 {offsets = [0, 32], sizes = [8, 32], strides = [1, 1]} : vector<8x64xf32> to vector<8x32xf32>
    %430 = tpu.concatenate %428, %429 in 1 : vector<8x32xf32>, vector<8x32xf32> -> vector<8x64xf32>
    %431 = vector.extract_strided_slice %405 {offsets = [0, 0], sizes = [8, 32], strides = [1, 1]} : vector<8x64xf32> to vector<8x32xf32>
    %432 = vector.extract_strided_slice %390 {offsets = [0, 32], sizes = [8, 32], strides = [1, 1]} : vector<8x64xf32> to vector<8x32xf32>
    %433 = tpu.concatenate %431, %432 in 1 : vector<8x32xf32>, vector<8x32xf32> -> vector<8x64xf32>
    %434 = vector.extract_strided_slice %410 {offsets = [0, 0], sizes = [8, 32], strides = [1, 1]} : vector<8x64xf32> to vector<8x32xf32>
    %435 = vector.extract_strided_slice %385 {offsets = [0, 32], sizes = [8, 32], strides = [1, 1]} : vector<8x64xf32> to vector<8x32xf32>
    %436 = tpu.concatenate %434, %435 in 1 : vector<8x32xf32>, vector<8x32xf32> -> vector<8x64xf32>
    %437 = vector.extract_strided_slice %415 {offsets = [0, 0], sizes = [8, 32], strides = [1, 1]} : vector<8x64xf32> to vector<8x32xf32>
    %438 = vector.extract_strided_slice %380 {offsets = [0, 32], sizes = [8, 32], strides = [1, 1]} : vector<8x64xf32> to vector<8x32xf32>
    %439 = tpu.concatenate %437, %438 in 1 : vector<8x32xf32>, vector<8x32xf32> -> vector<8x64xf32>
    %440 = tpu.concatenate %418, %421, %424, %427, %430, %433, %436, %439 in 0 : vector<8x64xf32>, vector<8x64xf32>, vector<8x64xf32>, vector<8x64xf32>, vector<8x64xf32>, vector<8x64xf32>, vector<8x64xf32>, vector<8x64xf32> -> vector<64x64xf32>
    %c0_95 = arith.constant 0 : index
    %c0_96 = arith.constant 0 : index
    %441 = vector.load %arg10[%c0_95, %c0_96] : memref<64x128xbf16, #tpu.memory_space<vmem>>, vector<64x128xbf16>
    %442 = arith.truncf %440 : vector<64x64xf32> to vector<64x64xbf16>
    %cst_97 = arith.constant dense<0.000000e+00> : vector<64x128xf32>
    %443 = tpu.matmul %442, %441, %cst_97 {dimension_numbers = #tpu.dot_dimension_numbers<[1], [0], [0], [1], [0, 0, 1, 1], [], []>} : vector<64x64xbf16>, vector<64x128xbf16>, vector<64x128xf32> -> vector<64x128xf32>
    %c0_98 = arith.constant 0 : index
    %c0_99 = arith.constant 0 : index
    %444 = vector.load %arg11[%c0_98, %c0_99] : memref<1x128xf32, #tpu.memory_space<vmem>>, vector<1x128xf32>
    %445 = vector.broadcast %444 : vector<1x128xf32> to vector<64x128xf32>
    %446 = arith.addf %443, %445 : vector<64x128xf32>
    %447 = tpu.iota {dimensions = array<i32: 1>} : vector<64x128xi32>
    %c2_i32 = arith.constant 2 : i32
    %448 = vector.broadcast %c2_i32 : i32 to vector<64x128xi32>
    %449 = arith.cmpi slt, %447, %448 : vector<64x128xi32>
    %450 = arith.negf %446 : vector<64x128xf32>
    %451 = math.exp %450 : vector<64x128xf32>
    %cst_100 = arith.constant 1.000000e+00 : f32
    %452 = vector.broadcast %cst_100 : f32 to vector<64x128xf32>
    %453 = arith.addf %452, %451 : vector<64x128xf32>
    %454 = arith.divf %452, %453 : vector<64x128xf32>
    %455 = arith.select %449, %454, %446 : vector<64x128xi1>, vector<64x128xf32>
    %c0_101 = arith.constant 0 : index
    %c0_102 = arith.constant 0 : index
    %456 = vector.load %arg12[%c0_101, %c0_102] : memref<64x128xf32, #tpu.memory_space<vmem>>, vector<64x128xf32>
    tpu.vector_store %arg12[%c0_101, %c0_102], %455 {strides = array<i32>} : memref<64x128xf32, #tpu.memory_space<vmem>>, vector<64x128xf32>,
    return
  }
  func.func @transform_0(%arg0: i32) -> (i32, i32) {
    %c0_i32 = arith.constant 0 : i32
    %c0_i32_0 = arith.constant 0 : i32
    %c0_i32_1 = arith.constant 0 : i32
    return %c0_i32, %c0_i32_0 : i32, i32
  }
  func.func @transform_1(%arg0: i32) -> (i32, i32) {
    %c0_i32 = arith.constant 0 : i32
    %c0_i32_0 = arith.constant 0 : i32
    %c0_i32_1 = arith.constant 0 : i32
    return %c0_i32, %c0_i32_0 : i32, i32
  }
  func.func @transform_2(%arg0: i32) -> (i32, i32) {
    %c0_i32 = arith.constant 0 : i32
    %c0_i32_0 = arith.constant 0 : i32
    %c0_i32_1 = arith.constant 0 : i32
    return %c0_i32, %c0_i32_0 : i32, i32
  }
  func.func @transform_3(%arg0: i32) -> (i32, i32) {
    %c0_i32 = arith.constant 0 : i32
    %c0_i32_0 = arith.constant 0 : i32
    %c0_i32_1 = arith.constant 0 : i32
    return %c0_i32, %c0_i32_0 : i32, i32
  }
  func.func @transform_4(%arg0: i32) -> (i32, i32) {
    %c0_i32 = arith.constant 0 : i32
    %c0_i32_0 = arith.constant 0 : i32
    %c0_i32_1 = arith.constant 0 : i32
    return %c0_i32, %c0_i32_0 : i32, i32
  }
  func.func @transform_5(%arg0: i32) -> (i32, i32) {
    %c0_i32 = arith.constant 0 : i32
    %c0_i32_0 = arith.constant 0 : i32
    %c0_i32_1 = arith.constant 0 : i32
    return %c0_i32, %c0_i32_0 : i32, i32
  }
  func.func @transform_6(%arg0: i32) -> (i32, i32, i32) {
    %c0_i32 = arith.constant 0 : i32
    %c0_i32_0 = arith.constant 0 : i32
    %c0_i32_1 = arith.constant 0 : i32
    %c0_i32_2 = arith.constant 0 : i32
    return %c0_i32, %c0_i32_0, %c0_i32_1 : i32, i32, i32
  }
  func.func @transform_7(%arg0: i32) -> (i32, i32, i32) {
    %c0_i32 = arith.constant 0 : i32
    %c0_i32_0 = arith.constant 0 : i32
    %c0_i32_1 = arith.constant 0 : i32
    %c0_i32_2 = arith.constant 0 : i32
    return %c0_i32, %c0_i32_0, %c0_i32_1 : i32, i32, i32
  }
  func.func @transform_8(%arg0: i32) -> (i32, i32, i32) {
    %c0_i32 = arith.constant 0 : i32
    %c0_i32_0 = arith.constant 0 : i32
    %c0_i32_1 = arith.constant 0 : i32
    %c0_i32_2 = arith.constant 0 : i32
    return %c0_i32, %c0_i32_0, %c0_i32_1 : i32, i32, i32
  }
  func.func @transform_9(%arg0: i32) -> (i32, i32) {
    %c0_i32 = arith.constant 0 : i32
    %c0_i32_0 = arith.constant 0 : i32
    %c0_i32_1 = arith.constant 0 : i32
    return %c0_i32, %c0_i32_0 : i32, i32
  }
  func.func @transform_10(%arg0: i32) -> (i32, i32) {
    %c0_i32 = arith.constant 0 : i32
    %c0_i32_0 = arith.constant 0 : i32
    %c0_i32_1 = arith.constant 0 : i32
    return %c0_i32, %c0_i32_0 : i32, i32
  }
  func.func @transform_11(%arg0: i32) -> (i32, i32) {
    %c0_i32 = arith.constant 0 : i32
    %c0_i32_0 = arith.constant 0 : i32
    %c0_i32_1 = arith.constant 0 : i32
    return %c0_i32, %c0_i32_0 : i32, i32
  }
}

</mosaic_0001>

<bundles_post_ra>
// kernel: myrnn_forward.1
= control target key start
LH: loop header
LB: loop body
LE: loop exit
PB: predicated region body
PF: predicated region fallthrough
CT: control target
= control target key end

     0   :  { %16 = vsyncpa [#allocation3], 0  ;;  %s5473_s0 = inlined_call_operand.vmem [shape: f32[64,16], index: 0, kind: input, shape index: {}]   ;;  %s5474_s1 = inlined_call_operand.hbm [shape: bf16[16,32], index: 1, kind: input, shape index: {}]   ;;  %s5475_s2 = inlined_call_operand.vmem [shape: f32[1,32], index: 2, kind: input, shape index: {}]   ;;  %s5476_s3 = inlined_call_operand.hbm [shape: bf16[32,64], index: 3, kind: input, shape index: {}]   ;;  %s5477_s4 = inlined_call_operand.hbm [shape: f32[1,64], index: 4, kind: input, shape index: {}]   ;;  %s5478_s5 = inlined_call_operand.hbm [shape: bf16[64,64], index: 5, kind: input, shape index: {}]   ;;  %s5479_s6 = inlined_call_operand.vmem [shape: bf16[4,64,64], index: 6, kind: input, shape index: {}]   ;;  %s5480_s7 = inlined_call_operand.vmem [shape: f32[4,1,64], index: 7, kind: input, shape index: {}]   ;;  %s5481_s8 = inlined_call_operand.hbm [shape: bf16[4,64,64], index: 8, kind: input, shape index: {}]   ;;  %s5482_s9 = inlined_call_operand.hbm [shape: bf16[64,128], index: 9, kind: input, shape index: {}]   ;;  %s5483_s10 = inlined_call_operand.hbm [shape: f32[1,128], index: 10, kind: input, shape index: {}]   ;;  %s5484_s11 = inlined_call_operand.vmem [shape: f32[64,128], index: 11, kind: output, shape index: {}]  }
   0x1   :  { %17 = vsyncpa [#allocation5], 0 }
   0x2   :  { %18 = vsyncpa [#allocation8], 0 }
   0x3   :  { %19 = vsyncpa [#allocation11], 0  ;;  %s4406_s17 = smov [#allocation4]   ;;  %s4407_s19 = smov [#allocation7]  }
   0x4   :  { %s41_s18 = sshll.u32 %s4406_s17, 4  ;;  %s63_s20 = sshll.u32 %s4407_s19, 4  ;;  %s42_s18 = int_to_ptr.vmem [resolvable:$true] %s41_s18  ;;  %s4478_s20 = int_to_ptr.vmem [resolvable:$true] %s63_s20 }
   0x5   :  { %s4244_s23 = scalar_lea.hbm %s5476_s3, 256 }
   0x6   :  { %p4245_p0 = scmp.ne.s32.totalorder %s5476_s3, %s4244_s23  ;;  %p4248_p1 = scmp.lt.u32.totalorder %s4244_s23, %s5476_s3 }
   0x8   :  { %p4250_p2 = pnand %p4248_p1, %p4245_p0 }
   0xa   :  { %4253 = shalt.err (!%p4250_p2)
}
   0xb   :  { %s4254_s28 = scalar_lea.vmem %s42_s18, 256  ;;  %p4259_p4 = scmp.lt.s32.totalorder %s42_s18, %s42_s18 }
   0xc   :  { %p4255_p3 = scmp.ne.s32.totalorder %s42_s18, %s4254_s28  ;;  %p4260_p5 = scmp.lt.s32.totalorder %s4254_s28, %s4254_s28 }
   0xe   :  { %p4261_p6 = por %p4260_p5, %p4259_p4 }
  0x10   :  { %p4262_p7 = pnand %p4261_p6, %p4255_p3 }
  0x12   :  { %4265 = shalt.err (!%p4262_p7)
}
  0x13   :  { %s4408_s29 = smov 64   ;;  %s4409_s30 = smov 4  }
  0x14   :  { %47 = dma.hbm_to_vmem [thread:$0]  %s5476_s3, 256, %s42_s18, [#allocation5], %s4408_s29, %s4408_s29, %s4409_s30  }
  0x15   :  { %s4266_s16 = scalar_lea.hbm %s5478_s5, 512 }
  0x16   :  { %p4267_p8 = scmp.ne.s32.totalorder %s5478_s5, %s4266_s16  ;;  %p4270_p9 = scmp.lt.u32.totalorder %s4266_s16, %s5478_s5 }
  0x18   :  { %p4272_p10 = pnand %p4270_p9, %p4267_p8 }
  0x1a   :  { %4275 = shalt.err (!%p4272_p10)
}
  0x1b   :  { %s4276_s23 = scalar_lea.vmem %s4478_s20, 512  ;;  %p4281_p12 = scmp.lt.s32.totalorder %s4478_s20, %s4478_s20 }
  0x1c   :  { %p4277_p11 = scmp.ne.s32.totalorder %s4478_s20, %s4276_s23  ;;  %p4282_p13 = scmp.lt.s32.totalorder %s4276_s23, %s4276_s23 }
  0x1e   :  { %p4283_p0 = por %p4282_p13, %p4281_p12 }
  0x20   :  { %p4284_p1 = pnand %p4283_p0, %p4277_p11 }
  0x22   :  { %4287 = shalt.err (!%p4284_p1)
}
  0x23   :  { %69 = dma.hbm_to_vmem [thread:$0]  %s5478_s5, 512, %s4478_s20, [#allocation8], %s4408_s29, %s4408_s29, %s4409_s30  }
  0x24   :  { %s4410_s24 = smov [#allocation10]   ;;  %s4411_s26 = smov [#allocation2]  }
  0x25   :  { %s91_s25 = sshll.u32 %s4410_s24, 4  ;;  %s27_s27 = sshll.u32 %s4411_s26, 4  ;;  %s92_s25 = int_to_ptr.vmem [resolvable:$true] %s91_s25  ;;  %s4515_s27 = int_to_ptr.vmem [resolvable:$true] %s27_s27 }
  0x26   :  { %s4288_s13 = scalar_lea.hbm %s5482_s9, 512 }
  0x27   :  { %p4289_p2 = scmp.ne.s32.totalorder %s5482_s9, %s4288_s13  ;;  %p4292_p3 = scmp.lt.u32.totalorder %s4288_s13, %s5482_s9 }
  0x29   :  { %p4294_p4 = pnand %p4292_p3, %p4289_p2 }
  0x2b   :  { %4297 = shalt.err (!%p4294_p4)
}
  0x2c   :  { %s4298_s5 = scalar_lea.vmem %s92_s25, 512  ;;  %p4303_p6 = scmp.lt.s32.totalorder %s92_s25, %s92_s25 }
  0x2d   :  { %p4299_p5 = scmp.ne.s32.totalorder %s92_s25, %s4298_s5  ;;  %p4304_p7 = scmp.lt.s32.totalorder %s4298_s5, %s4298_s5 }
  0x2f   :  { %p4305_p8 = por %p4304_p7, %p4303_p6 }
  0x31   :  { %p4306_p9 = pnand %p4305_p8, %p4299_p5 }
  0x33   :  { %4309 = shalt.err (!%p4306_p9)
}
  0x34   :  { %97 = dma.hbm_to_vmem [thread:$0]  %s5482_s9, 512, %s92_s25, [#allocation11], %s4408_s29, %s4408_s29, %s4409_s30  }
  0x35   :  { %s4310_s23 = scalar_lea.hbm %s5474_s1, 128 }
  0x36   :  { %p4311_p10 = scmp.ne.s32.totalorder %s5474_s1, %s4310_s23  ;;  %p4314_p11 = scmp.lt.u32.totalorder %s4310_s23, %s5474_s1 }
  0x38   :  { %p4316_p12 = pnand %p4314_p11, %p4311_p10 }
  0x3a   :  { %4319 = shalt.err (!%p4316_p12)
}
  0x3b   :  { %s4320_s28 = scalar_lea.vmem %s4515_s27, 128  ;;  %p4325_p0 = scmp.lt.s32.totalorder %s4515_s27, %s4515_s27 }
  0x3c   :  { %p4321_p13 = scmp.ne.s32.totalorder %s4515_s27, %s4320_s28  ;;  %p4326_p1 = scmp.lt.s32.totalorder %s4320_s28, %s4320_s28 }
  0x3e   :  { %p4327_p2 = por %p4326_p1, %p4325_p0 }
  0x40   :  { %p4328_p3 = pnand %p4327_p2, %p4321_p13 }
  0x42   :  { %4331 = shalt.err (!%p4328_p3)
}
  0x43   :  { %33 = dma.hbm_to_vmem [thread:$0]  %s5474_s1, 128, %s4515_s27, [#allocation3], %s4408_s29, %s4408_s29, %s4409_s30  }
  0x44   :  { %s4412_s12 = smov [#allocation6]   ;;  %s4413_s14 = smov [#allocation9]  }
  0x45   :  { %s54_s13 = sshll.u32 %s4412_s12, 4  ;;  %s79_s15 = sshll.u32 %s4413_s14, 4  ;;  %s55_s13 = int_to_ptr.vmem [resolvable:$true] %s54_s13  ;;  %s4552_s15 = int_to_ptr.vmem [resolvable:$true] %s79_s15 }
  0x46   :  { %s4332_s5 = scalar_lea.hbm %s5477_s4, 16 }
  0x47   :  { %p4333_p4 = scmp.ne.s32.totalorder %s5477_s4, %s4332_s5  ;;  %p4336_p5 = scmp.lt.u32.totalorder %s4332_s5, %s5477_s4 }
  0x49   :  { %p4338_p6 = pnand %p4336_p5, %p4333_p4 }
  0x4b   :  { %4341 = shalt.err (!%p4338_p6)
}
  0x4c   :  { %s4342_s1 = scalar_lea.vmem %s55_s13, 16  ;;  %s4346_s27 = scalar_lea.vmem %s55_s13, 32 }
  0x4d   :  { %p4343_p7 = scmp.ne.s32.totalorder %s55_s13, %s4342_s1  ;;  %p4347_p8 = scmp.lt.s32.totalorder %s55_s13, %s55_s13 }
  0x4e   :  { %p4348_p9 = scmp.lt.s32.totalorder %s4346_s27, %s4342_s1 }
  0x50   :  { %p4349_p10 = por %p4348_p9, %p4347_p8 }
  0x52   :  { %p4350_p11 = pnand %p4349_p10, %p4343_p7 }
  0x54   :  { %4353 = shalt.err (!%p4350_p11)
}
  0x55   :  { %57 = dma.hbm_to_vmem [thread:$0]  %s5477_s4, 16, %s55_s13, [#allocation5]  }
  0x56   :  { %s4354_s26 = scalar_lea.hbm %s5481_s8, 2048 }
  0x57   :  { %p4355_p12 = scmp.ne.s32.totalorder %s5481_s8, %s4354_s26  ;;  %p4358_p13 = scmp.lt.u32.totalorder %s4354_s26, %s5481_s8 }
  0x59   :  { %p4360_p0 = pnand %p4358_p13, %p4355_p12 }
  0x5b   :  { %4363 = shalt.err (!%p4360_p0)
}
  0x5c   :  { %s4364_s14 = scalar_lea.vmem %s4552_s15, 2048  ;;  %p4369_p2 = scmp.lt.s32.totalorder %s4552_s15, %s4552_s15 }
  0x5d   :  { %p4365_p1 = scmp.ne.s32.totalorder %s4552_s15, %s4364_s14  ;;  %p4370_p3 = scmp.lt.s32.totalorder %s4364_s14, %s4364_s14 }
  0x5f   :  { %p4371_p4 = por %p4370_p3, %p4369_p2 }
  0x61   :  { %p4372_p5 = pnand %p4371_p4, %p4365_p1 }
  0x63   :  { %4375 = shalt.err (!%p4372_p5)
}
  0x64   :  { %85 = dma.hbm_to_vmem [thread:$0]  %s5481_s8, 2048, %s4552_s15, [#allocation8], %s4408_s29, %s4408_s29, %s4409_s30  }
  0x65   :  { %s4414_s16 = smov [#allocation12]   ;;  %s4376_s19 = scalar_lea.hbm %s5483_s10, 16 }
  0x66   :  { %s104_s17 = sshll.u32 %s4414_s16, 4  ;;  %p4377_p6 = scmp.ne.s32.totalorder %s5483_s10, %s4376_s19  ;;  %s105_s17 = int_to_ptr.vmem [resolvable:$true] %s104_s17 }
  0x67   :  { %p4380_p7 = scmp.lt.u32.totalorder %s4376_s19, %s5483_s10 }
  0x69   :  { %p4382_p8 = pnand %p4380_p7, %p4377_p6 }
  0x6b   :  { %4385 = shalt.err (!%p4382_p8)
}
  0x6c   :  { %s4386_s23 = scalar_lea.vmem %s105_s17, 16  ;;  %s4390_s8 = scalar_lea.vmem %s105_s17, 32 }
  0x6d   :  { %p4387_p9 = scmp.ne.s32.totalorder %s105_s17, %s4386_s23  ;;  %p4391_p10 = scmp.lt.s32.totalorder %s105_s17, %s105_s17 }
  0x6e   :  { %p4392_p11 = scmp.lt.s32.totalorder %s4390_s8, %s4386_s23 }
  0x70   :  { %p4393_p12 = por %p4392_p11, %p4391_p10 }
  0x72   :  { %p4394_p13 = pnand %p4393_p12, %p4387_p9 }
  0x74   :  { %4397 = shalt.err (!%p4394_p13)
}
  0x75   :  { %107 = dma.hbm_to_vmem [thread:$0]  %s5483_s10, 16, %s105_s17, [#allocation11]  }
  0x76   :  { %4398 = dma.done.wait [#allocation3], 128  }
  0x77   :  { %4399 = vsyncadd [#allocation3], 4294967168 }
  0x78   :  { %4400 = dma.done.wait [#allocation5], 272  }
  0x79   :  { %4401 = vsyncadd [#allocation5], 4294967024 }
  0x7a   :  { %4402 = dma.done.wait [#allocation8], 2560  }
  0x7b   :  { %4403 = vsyncadd [#allocation8], 4294964736 }
  0x7c   :  { %4404 = dma.done.wait [#allocation11], 528  }
  0x7d   :  { %4405 = vsyncadd [#allocation11], 4294966768  ;;  %v4089_v0 = vld [vmem:[#allocation2] sm:$0xff]   ;;  %v131_v2 = vld [vmem:[%s5473_s0 + $0x8] sm:$0xff]  ;;  %vm157_vm0 = vcmask 130048   ;;  %v4415_v16 = vmov 0.0  }
  0x7e   :  { %v130_v1 = vld [vmem:[%s5473_s0] sm:$0xff]  ;;  %v132_v3 = vld [vmem:[%s5473_s0 + $0x10] sm:$0xff]  ;;  %3495 = vmatprep.subr.bf16.mxu1 %v4089_v0  ;;  %v133_v5 = vld [vmem:[%s5473_s0 + $0x18] sm:$0xff]  ;;  %3517 = vmatprep.subr.bf16.mxu0 %v4415_v16  ;;  %vm4416_vm1 = vmmov 0   ;;  %v4417_v20 = vmov 0   ;;  %vm278_vm2 = vcmask 261120  }
  0x7f   :  { %v140_v4 = vpack.c.bf16 %v131_v2, %v130_v1  ;;  %v134_v6 = vld [vmem:[%s5473_s0 + $0x20] sm:$0xff]  ;;  %v135_v7 = vld [vmem:[%s5473_s0 + $0x28] sm:$0xff]  ;;  %3496 = vmatpush3.bf16.msra.mxu1 %v4089_v0  ;;  %v141_v8 = vpack.c.bf16 %v133_v5, %v132_v3  ;;  %v136_v11 = vld [vmem:[%s5473_s0 + $0x30] sm:$0xff]  ;;  %3525 = vmatprep.mubr.msk.bf16.mxu0 %vm4416_vm1, %v4415_v16  ;;  %vm388_vm3 = vcmask 523264  }
  0x80   :  { %v142_v9 = vpack.c.bf16 %v135_v7, %v134_v6  ;;  %v4090_v10 = vld [vmem:[#allocation4] sm:$0xff]   ;;  %v137_v12 = vld [vmem:[%s5473_s0 + $0x38] sm:$0xff]  ;;  %v4091_v15 = vld [vmem:[#allocation4 + $0x8] sm:$0xff]  }
  0x81   :  { %3497 = vmatprep.mubr.msk.bf16.mxu1 %vm157_vm0, %v140_v4  ;;  %3505 = vmatprep.subr.bf16.mxu1 %v4090_v10  ;;  %v143_v13 = vpack.c.bf16 %v137_v12, %v136_v11  ;;  %v4626_v14 = vld [vmem:[#allocation7] sm:$0xff]   ;;  %v4631_v17 = vld [vmem:[#allocation7 + $0x8] sm:$0xff]   ;;  %v4636_v18 = vld [vmem:[#allocation7 + $0x10] sm:$0xff]  }
  0x82   :  { %3498 = vmatmul.mubr.msk.bf16.vlgmr.msra.gmra.mrb[0].mxu1 %vm157_vm0, %v141_v8  ;;  %3518 = vmatpush3.bf16.msra.mxu0 %v4626_v14  ;;  %v4640_v19 = vld [vmem:[#allocation7 + $0x18] sm:$0xff]   ;;  %v3096_v21 = vld [vmem:[%s5475_s2] ss:$0 sm:$0xff] }
  0x83   :  { %3501 = vmatprep.mubr.msk.bf16.mxu1 %vm157_vm0, %v142_v9  ;;  %3506 = vmatpush3.bf16.msra.mxu1 %v4090_v10  ;;  %v3102_v54 = vld [vmem:[#allocation6] ss:$0 sm:$0xff] }
  0x84   :  { %3507 = vmatprep.subr.bf16.mxu1 %v4091_v15  ;;  %3519 = vmatprep.subr.bf16.mxu0 %v4415_v16 }
  0x86   :  { %3520 = vmatpush3.bf16.msra.mxu0 %v4631_v17 }
  0x87   :  { %3508 = vmatpush3.bf16.msra.mxu1 %v4091_v15  ;;  %3521 = vmatprep.subr.bf16.mxu0 %v4415_v16 }
  0x88   :  { %3529 = vmatprep.subr.bf16.mxu1 %v4415_v16 }
  0x8a   :  { %3502 = vmatmul.mubr.msk.bf16.gmra.mrb[4].mxu1 %vm157_vm0, %v143_v13  ;;  %3522 = vmatpush3.bf16.msra.mxu0 %v4636_v18 }
  0x8b   :  { %3523 = vmatprep.subr.bf16.mxu0 %v4415_v16 }
  0x8e   :  { %3524 = vmatpush3.bf16.msra.mxu0 %v4640_v19 }
  0x8f   :  { %3541 = vmatprep.subr.bf16.mxu0 %v4415_v16 }
  0x91   :  { %3526 = vmatmul.mubr.bf16.vlgmr.msra.gmra.mrb[0].mxu0 %v4417_v20 }
  0x92   :  { %3542 = vmatpush3.bf16.msra.mxu0 %v4626_v14  ;;  %3549 = vmatprep.mubr.msk.bf16.mxu0 %vm4416_vm1, %v4415_v16 }
  0x93   :  { %3543 = vmatprep.subr.bf16.mxu0 %v4415_v16 }
  0x96   :  { %3544 = vmatpush3.bf16.msra.mxu0 %v4631_v17 }
  0x97   :  { %3545 = vmatprep.subr.bf16.mxu0 %v4415_v16 }
  0x9a   :  { %3546 = vmatpush3.bf16.msra.mxu0 %v4636_v18 }
  0x9b   :  { %3547 = vmatprep.subr.bf16.mxu0 %v4415_v16 }
  0x9e   :  { %3548 = vmatpush3.bf16.msra.mxu0 %v4640_v19 }
  0x9f   :  { %3565 = vmatprep.subr.bf16.mxu0 %v4415_v16 }
 0x155   :  { %v3499_v22 = vpop.f32.mrb[0].mxu1 }
 0x156   :  { %v213_v23 = vadd.f32 %v3499_v22, %v3096_v21  ;;  %v204_v24 = vpop.f32.mrb[1].mxu1 }
 0x157   :  { %v205_v25 = vadd.f32 %v3096_v21, %v204_v24  ;;  %v3500_v26 = vpop.f32.mrb[2].mxu1 }
 0x158   :  { %v216_v27 = vadd.f32 %v3500_v26, %v3096_v21  ;;  %v207_v28 = vpop.f32.mrb[3].mxu1  ;;  %v237_v30 = vmax.f32 %v213_v23, 0.0 }
 0x159   :  { %v208_v29 = vadd.f32 %v3096_v21, %v207_v28  ;;  %v235_v32 = vmax.f32 %v205_v25, 0.0 }
 0x15a   :  { %v238_v31 = vmax.f32 %v216_v27, 0.0 }
 0x15b   :  { %v236_v33 = vmax.f32 %v208_v29, 0.0 }
 0x15c   :  { %v257_v34 = vpack.c.bf16 %v238_v31, %v237_v30 }
 0x15d   :  { %v256_v35 = vpack.c.bf16 %v236_v33, %v235_v32  ;;  %v3503_v36 = vpop.f32.mrb[4].mxu1 }
 0x15e   :  { %v229_v37 = vadd.f32 %v3503_v36, %v3096_v21  ;;  %v220_v38 = vpop.f32.mrb[5].mxu1 }
 0x15f   :  { %v221_v39 = vadd.f32 %v3096_v21, %v220_v38  ;;  %v3504_v40 = vpop.f32.mrb[6].mxu1  ;;  %3509 = vmatprep.mubr.msk.bf16.mxu1 %vm278_vm2, %v256_v35 }
 0x160   :  { %v232_v41 = vadd.f32 %v3504_v40, %v3096_v21  ;;  %v223_v42 = vpop.f32.mrb[7].mxu1  ;;  %3510 = vmatmul.mubr.msk.bf16.vlgmr.msra.gmra.mrb[8].mxu1 %vm278_vm2, %v257_v34  ;;  %v241_v44 = vmax.f32 %v229_v37, 0.0 }
 0x161   :  { %v224_v43 = vadd.f32 %v3096_v21, %v223_v42  ;;  %3530 = vmatpush3.bf16.msra.mxu1 %v4626_v14  ;;  %v239_v46 = vmax.f32 %v221_v39, 0.0 }
 0x162   :  { %v242_v45 = vmax.f32 %v232_v41, 0.0  ;;  %3531 = vmatprep.subr.bf16.mxu1 %v4415_v16 }
 0x163   :  { %v240_v47 = vmax.f32 %v224_v43, 0.0 }
 0x164   :  { %v259_v48 = vpack.c.bf16 %v242_v45, %v241_v44  ;;  %v426_v50 = vpop.f32.mrb[0].mxu0 }
 0x165   :  { %v258_v49 = vpack.c.bf16 %v240_v47, %v239_v46  ;;  %3532 = vmatpush3.bf16.msra.mxu1 %v4631_v17  ;;  %v3527_v51 = vpop.f32.mrb[1].mxu0 }
 0x166   :  { %3533 = vmatprep.subr.bf16.mxu1 %v4415_v16  ;;  %v429_v52 = vpop.f32.mrb[2].mxu0 }
 0x167   :  { %3513 = vmatprep.mubr.msk.bf16.mxu1 %vm278_vm2, %v258_v49  ;;  %v3528_v53 = vpop.f32.mrb[3].mxu0 }
 0x168   :  { %3514 = vmatmul.mubr.msk.bf16.gmra.mrb[12].mxu1 %vm278_vm2, %v259_v48 }
 0x169   :  { %3534 = vmatpush3.bf16.msra.mxu1 %v4636_v18  ;;  %3537 = vmatprep.mubr.msk.bf16.mxu1 %vm4416_vm1, %v4415_v16 }
 0x16a   :  { %3535 = vmatprep.subr.bf16.mxu1 %v4415_v16 }
 0x16d   :  { %3536 = vmatpush3.bf16.msra.mxu1 %v4640_v19 }
 0x16e   :  { %3553 = vmatprep.subr.bf16.mxu1 %v4415_v16 }
 0x233   :  { %v3511_v55 = vpop.f32.mrb[8].mxu1 }
 0x234   :  { %v334_v56 = vadd.f32 %v3511_v55, %v3102_v54  ;;  %v325_v57 = vpop.f32.mrb[9].mxu1 }
 0x235   :  { %v3512_v58 = vpop.f32.mrb[10].mxu1  ;;  %v326_v3 = vadd.f32 %v3102_v54, %v325_v57 }
 0x236   :  { %v337_v59 = vadd.f32 %v3512_v58, %v3102_v54  ;;  %v328_v60 = vpop.f32.mrb[11].mxu1 }
 0x237   :  { %v329_v61 = vadd.f32 %v3102_v54, %v328_v60 }
 0x23b   :  { %v3515_v62 = vpop.f32.mrb[12].mxu1 }
 0x23c   :  { %v350_v63 = vadd.f32 %v3515_v62, %v3102_v54  ;;  %v341_v0 = vpop.f32.mrb[13].mxu1 }
 0x23d   :  { %v342_v1 = vadd.f32 %v3102_v54, %v341_v0  ;;  %v3516_v2 = vpop.f32.mrb[14].mxu1 }
 0x23e   :  { %v353_v4 = vadd.f32 %v3516_v2, %v3102_v54  ;;  %v344_v5 = vpop.f32.mrb[15].mxu1  ;;  %v357_v6 = vsel %vm278_vm2, %v329_v61, %v350_v63  ;;  %v4676_v7 = vsel %vm278_vm2, %v350_v63, %v329_v61 }
 0x23f   :  { %v345_v8 = vadd.f32 %v3102_v54, %v344_v5  ;;  %v359_v9 = vsel %vm278_vm2, %v337_v59, %v342_v1  ;;  %v4680_v10 = vsel %vm278_vm2, %v342_v1, %v337_v59  ;;  %v4097_v5 = vld [vmem:[%s5479_s6 + $0x8] sm:$0xff]  }
 0x240   :  { %v356_v11 = vsel %vm278_vm2, %v326_v3, %v353_v4  ;;  %v4684_v12 = vsel %vm278_vm2, %v353_v4, %v326_v3  ;;  %v4096_v4 = vld [vmem:[%s5479_s6] sm:$0xff]  }
 0x241   :  { %v432_v13 = vadd.f32 %v426_v50, %v356_v11  ;;  %v358_v15 = vsel %vm278_vm2, %v334_v56, %v345_v8  ;;  %v4688_v21 = vsel %vm278_vm2, %v345_v8, %v334_v56  ;;  %v4100_v8 = vld [vmem:[%s5479_s6 + $0x18] sm:$0xff]  }
 0x242   :  { %v4799_v11 = vld [vmem:[#allocation9 + $0x18] sm:$0xff]  }
 0x243   :  { %4132 = vtanh.f32 %v432_v13 }
 0x24d   :  { %v4690_v22 = vpop.eup %4132 }
 0x24e   :  { %v434_v23 = vpack.c.bf16 %v4690_v22, %v4690_v22 }
 0x250   :  { %3538 = vmatmul.mubr.msk.bf16.vlgmr.msra.gmra.mrb[16].mxu1 %vm388_vm3, %v434_v23 }
 0x251   :  { %3554 = vmatpush3.bf16.msra.mxu1 %v4626_v14  ;;  %3561 = vmatprep.mubr.msk.bf16.mxu1 %vm4416_vm1, %v4415_v16 }
 0x252   :  { %3555 = vmatprep.subr.bf16.mxu1 %v4415_v16 }
 0x255   :  { %3556 = vmatpush3.bf16.msra.mxu1 %v4631_v17 }
 0x256   :  { %3557 = vmatprep.subr.bf16.mxu1 %v4415_v16 }
 0x259   :  { %3558 = vmatpush3.bf16.msra.mxu1 %v4636_v18 }
 0x25a   :  { %3559 = vmatprep.subr.bf16.mxu1 %v4415_v16 }
 0x25d   :  { %3560 = vmatpush3.bf16.msra.mxu1 %v4640_v19 }
 0x25e   :  { %3577 = vmatprep.subr.bf16.mxu1 %v4415_v16 }
 0x323   :  { %v472_v24 = vpop.f32.mrb[16].mxu1 }
 0x324   :  { %v478_v25 = vadd.f32 %v472_v24, %v357_v6  ;;  %v3539_v26 = vpop.f32.mrb[17].mxu1  ;;  %v4781_v6 = vld [vmem:[#allocation9] sm:$0xff]  }
 0x325   :  { %v475_v27 = vpop.f32.mrb[18].mxu1 }
 0x326   :  { %4134 = vtanh.f32 %v478_v25  ;;  %v3540_v28 = vpop.f32.mrb[19].mxu1 }
 0x330   :  { %v4705_v29 = vpop.eup %4134 }
 0x331   :  { %v480_v30 = vpack.c.bf16 %v4705_v29, %v4705_v29 }
 0x333   :  { %3550 = vmatmul.mubr.msk.bf16.vlgmr.msra.gmra.mrb[4].mxu0 %vm388_vm3, %v480_v30 }
 0x334   :  { %3566 = vmatpush3.bf16.msra.mxu0 %v4626_v14  ;;  %3573 = vmatprep.mubr.msk.bf16.mxu0 %vm4416_vm1, %v4415_v16 }
 0x335   :  { %3567 = vmatprep.subr.bf16.mxu0 %v4415_v16 }
 0x338   :  { %3568 = vmatpush3.bf16.msra.mxu0 %v4631_v17 }
 0x339   :  { %3569 = vmatprep.subr.bf16.mxu0 %v4415_v16 }
 0x33c   :  { %3570 = vmatpush3.bf16.msra.mxu0 %v4636_v18 }
 0x33d   :  { %3571 = vmatprep.subr.bf16.mxu0 %v4415_v16 }
 0x340   :  { %3572 = vmatpush3.bf16.msra.mxu0 %v4640_v19 }
 0x341   :  { %3589 = vmatprep.subr.bf16.mxu0 %v4415_v16 }
 0x406   :  { %v518_v31 = vpop.f32.mrb[4].mxu0 }
 0x407   :  { %v524_v32 = vadd.f32 %v518_v31, %v358_v15  ;;  %v3551_v33 = vpop.f32.mrb[5].mxu0 }
 0x408   :  { %v521_v34 = vpop.f32.mrb[6].mxu0 }
 0x409   :  { %4136 = vtanh.f32 %v524_v32  ;;  %v3552_v35 = vpop.f32.mrb[7].mxu0  ;;  %v3120_v34 = vld [vmem:[%s5480_s7] ss:$0 sm:$0xff] }
 0x413   :  { %v4137_v36 = vpop.eup %4136 }
 0x414   :  { %v526_v37 = vpack.c.bf16 %v4137_v36, %v4137_v36 }
 0x416   :  { %3562 = vmatmul.mubr.msk.bf16.vlgmr.msra.gmra.mrb[20].mxu1 %vm388_vm3, %v526_v37 }
 0x417   :  { %3578 = vmatpush3.bf16.msra.mxu1 %v4626_v14  ;;  %3585 = vmatprep.mubr.msk.bf16.mxu1 %vm4416_vm1, %v4415_v16 }
 0x418   :  { %3579 = vmatprep.subr.bf16.mxu1 %v4415_v16 }
 0x41b   :  { %3580 = vmatpush3.bf16.msra.mxu1 %v4631_v17 }
 0x41c   :  { %3581 = vmatprep.subr.bf16.mxu1 %v4415_v16 }
 0x41f   :  { %3582 = vmatpush3.bf16.msra.mxu1 %v4636_v18 }
 0x420   :  { %3583 = vmatprep.subr.bf16.mxu1 %v4415_v16 }
 0x423   :  { %3584 = vmatpush3.bf16.msra.mxu1 %v4640_v19 }
 0x424   :  { %3601 = vmatprep.subr.bf16.mxu1 %v4415_v16 }
 0x4e9   :  { %v564_v38 = vpop.f32.mrb[20].mxu1 }
 0x4ea   :  { %v570_v39 = vadd.f32 %v564_v38, %v359_v9  ;;  %v3563_v40 = vpop.f32.mrb[21].mxu1  ;;  %v4791_v9 = vld [vmem:[#allocation9 + $0x8] sm:$0xff]  }
 0x4eb   :  { %v567_v41 = vpop.f32.mrb[22].mxu1 }
 0x4ec   :  { %4138 = vtanh.f32 %v570_v39  ;;  %v3564_v42 = vpop.f32.mrb[23].mxu1 }
 0x4f6   :  { %v4139_v43 = vpop.eup %4138 }
 0x4f7   :  { %v572_v44 = vpack.c.bf16 %v4139_v43, %v4139_v43 }
 0x4f9   :  { %3574 = vmatmul.mubr.msk.bf16.vlgmr.msra.gmra.mrb[8].mxu0 %vm388_vm3, %v572_v44 }
 0x4fa   :  { %3590 = vmatpush3.bf16.msra.mxu0 %v4626_v14  ;;  %3597 = vmatprep.mubr.msk.bf16.mxu0 %vm4416_vm1, %v4415_v16 }
 0x4fb   :  { %3591 = vmatprep.subr.bf16.mxu0 %v4415_v16 }
 0x4fe   :  { %3592 = vmatpush3.bf16.msra.mxu0 %v4631_v17 }
 0x4ff   :  { %3593 = vmatprep.subr.bf16.mxu0 %v4415_v16 }
 0x502   :  { %3594 = vmatpush3.bf16.msra.mxu0 %v4636_v18 }
 0x503   :  { %3595 = vmatprep.subr.bf16.mxu0 %v4415_v16 }
 0x506   :  { %3596 = vmatpush3.bf16.msra.mxu0 %v4640_v19 }
 0x507   :  { %3613 = vmatprep.subr.bf16.mxu0 %v4096_v4 }
 0x5cc   :  { %v610_v45 = vpop.f32.mrb[8].mxu0 }
 0x5cd   :  { %v616_v46 = vadd.f32 %v610_v45, %v4680_v10  ;;  %v3575_v47 = vpop.f32.mrb[9].mxu0  ;;  %v4796_v10 = vld [vmem:[#allocation9 + $0x10] sm:$0xff]  }
 0x5ce   :  { %v613_v48 = vpop.f32.mrb[10].mxu0 }
 0x5cf   :  { %4140 = vtanh.f32 %v616_v46  ;;  %v3576_v49 = vpop.f32.mrb[11].mxu0 }
 0x5d9   :  { %v4141_v50 = vpop.eup %4140 }
 0x5da   :  { %v618_v51 = vpack.c.bf16 %v4141_v50, %v4141_v50  ;;  %v4761_v58 = vsel %vm278_vm2, %v4141_v50, %v4139_v43 }
 0x5dc   :  { %3586 = vmatmul.mubr.msk.bf16.vlgmr.msra.gmra.mrb[24].mxu1 %vm388_vm3, %v618_v51 }
 0x5dd   :  { %3602 = vmatpush3.bf16.msra.mxu1 %v4626_v14  ;;  %3609 = vmatprep.mubr.msk.bf16.mxu1 %vm4416_vm1, %v4415_v16 }
 0x5de   :  { %3603 = vmatprep.subr.bf16.mxu1 %v4415_v16 }
 0x5e1   :  { %3604 = vmatpush3.bf16.msra.mxu1 %v4631_v17  ;;  %v4755_v17 = vsel %vm278_vm2, %v4139_v43, %v4141_v50 }
 0x5e2   :  { %3605 = vmatprep.subr.bf16.mxu1 %v4415_v16 }
 0x5e5   :  { %3606 = vmatpush3.bf16.msra.mxu1 %v4636_v18 }
 0x5e6   :  { %3607 = vmatprep.subr.bf16.mxu1 %v4415_v16 }
 0x5e9   :  { %3608 = vmatpush3.bf16.msra.mxu1 %v4640_v19 }
 0x5ea   :  { %3629 = vmatprep.subr.bf16.mxu1 %v4415_v16 }
 0x6af   :  { %v656_v52 = vpop.f32.mrb[24].mxu1 }
 0x6b0   :  { %v662_v14 = vadd.f32 %v656_v52, %v4688_v21  ;;  %v3587_v53 = vpop.f32.mrb[25].mxu1 }
 0x6b1   :  { %v659_v54 = vpop.f32.mrb[26].mxu1 }
 0x6b2   :  { %4142 = vtanh.f32 %v662_v14  ;;  %v3588_v55 = vpop.f32.mrb[27].mxu1 }
 0x6bc   :  { %v4143_v56 = vpop.eup %4142 }
 0x6bd   :  { %v664_v57 = vpack.c.bf16 %v4143_v56, %v4143_v56  ;;  %v4758_v18 = vsel %vm278_vm2, %v4137_v36, %v4143_v56  ;;  %v4764_v19 = vsel %vm278_vm2, %v4143_v56, %v4137_v36 }
 0x6be   :  { %v782_v59 = vpack.c.bf16 %v4755_v17, %v4758_v18  ;;  %v783_v60 = vpack.c.bf16 %v4764_v19, %v4761_v58 }
 0x6bf   :  { %3598 = vmatmul.mubr.msk.bf16.vlgmr.msra.gmra.mrb[12].mxu0 %vm388_vm3, %v664_v57 }
 0x6c0   :  { %3614 = vmatpush3.bf16.msra.mxu0 %v4096_v4 }
 0x6c1   :  { %3615 = vmatprep.subr.bf16.mxu0 %v4097_v5 }
 0x6c4   :  { %3616 = vmatpush3.bf16.msra.mxu0 %v4097_v5 }
 0x792   :  { %v702_v61 = vpop.f32.mrb[12].mxu0 }
 0x793   :  { %v708_v62 = vadd.f32 %v702_v61, %v4676_v7  ;;  %v3599_v63 = vpop.f32.mrb[13].mxu0  ;;  %v4098_v7 = vld [vmem:[%s5479_s6 + $0x10] sm:$0xff]  }
 0x794   :  { %v705_v0 = vpop.f32.mrb[14].mxu0  ;;  %3617 = vmatprep.subr.bf16.mxu0 %v4098_v7 }
 0x795   :  { %4144 = vtanh.f32 %v708_v62  ;;  %v3600_v1 = vpop.f32.mrb[15].mxu0  ;;  %3618 = vmatpush3.bf16.msra.mxu0 %v4098_v7 }
 0x796   :  { %3619 = vmatprep.subr.bf16.mxu0 %v4100_v8 }
 0x799   :  { %3620 = vmatpush3.bf16.msra.mxu0 %v4100_v8 }
 0x79a   :  { %3641 = vmatprep.subr.bf16.mxu0 %v4415_v16 }
 0x79f   :  { %v4145_v2 = vpop.eup %4144 }
 0x7a0   :  { %v710_v3 = vpack.c.bf16 %v4145_v2, %v4145_v2  ;;  %v757_v27 = vsel %vm278_vm2, %v4705_v29, %v4145_v2  ;;  %v762_v28 = vsel %vm278_vm2, %v4145_v2, %v4705_v29 }
 0x7a2   :  { %3610 = vmatmul.mubr.msk.bf16.vlgmr.msra.gmra.mrb[28].mxu1 %vm388_vm3, %v710_v3 }
 0x7a3   :  { %3637 = vmatprep.mubr.msk.bf16.mxu1 %vm4416_vm1, %v4415_v16  ;;  %3630 = vmatpush3.bf16.msra.mxu1 %v4781_v6 }
 0x7a4   :  { %3631 = vmatprep.subr.bf16.mxu1 %v4415_v16 }
 0x7a7   :  { %3632 = vmatpush3.bf16.msra.mxu1 %v4791_v9 }
 0x7a8   :  { %3633 = vmatprep.subr.bf16.mxu1 %v4415_v16 }
 0x7ab   :  { %3634 = vmatpush3.bf16.msra.mxu1 %v4796_v10 }
 0x7ac   :  { %3635 = vmatprep.subr.bf16.mxu1 %v4415_v16 }
 0x7af   :  { %3636 = vmatpush3.bf16.msra.mxu1 %v4799_v11 }
 0x7b0   :  { %3653 = vmatprep.subr.bf16.mxu1 %v4415_v16 }
 0x7b2   :  { %3638 = vmatmul.mubr.bf16.vlgmr.msra.gmra.mrb[32].mxu1 %v4417_v20 }
 0x7b3   :  { %3654 = vmatpush3.bf16.msra.mxu1 %v4781_v6  ;;  %3661 = vmatprep.mubr.msk.bf16.mxu1 %vm4416_vm1, %v4415_v16 }
 0x7b4   :  { %3655 = vmatprep.subr.bf16.mxu1 %v4415_v16 }
 0x7b7   :  { %3656 = vmatpush3.bf16.msra.mxu1 %v4791_v9 }
 0x7b8   :  { %3657 = vmatprep.subr.bf16.mxu1 %v4415_v16 }
 0x7bb   :  { %3658 = vmatpush3.bf16.msra.mxu1 %v4796_v10 }
 0x7bc   :  { %3659 = vmatprep.subr.bf16.mxu1 %v4415_v16 }
 0x7bf   :  { %3660 = vmatpush3.bf16.msra.mxu1 %v4799_v11 }
 0x7c0   :  { %3677 = vmatprep.subr.bf16.mxu1 %v4415_v16 }
 0x875   :  { %v748_v13 = vpop.f32.mrb[28].mxu1 }
 0x876   :  { %v754_v15 = vadd.f32 %v748_v13, %v4684_v12  ;;  %v3611_v21 = vpop.f32.mrb[29].mxu1 }
 0x877   :  { %v751_v23 = vpop.f32.mrb[30].mxu1 }
 0x878   :  { %4146 = vtanh.f32 %v754_v15  ;;  %v3612_v24 = vpop.f32.mrb[31].mxu1 }
 0x882   :  { %v4147_v25 = vpop.eup %4146 }
 0x883   :  { %v756_v26 = vsel %vm278_vm2, %v4690_v22, %v4147_v25  ;;  %v763_v30 = vsel %vm278_vm2, %v4147_v25, %v4690_v22 }
 0x884   :  { %v781_v31 = vpack.c.bf16 %v757_v27, %v756_v26  ;;  %v784_v32 = vpack.c.bf16 %v763_v30, %v762_v28 }
 0x885   :  { %v958_v12 = vpop.f32.mrb[32].mxu1 }
 0x886   :  { %3621 = vmatprep.mubr.msk.bf16.mxu0 %vm388_vm3, %v781_v31  ;;  %v3639_v22 = vpop.f32.mrb[33].mxu1 }
 0x887   :  { %3622 = vmatmul.mubr.msk.bf16.vlgmr.msra.gmra.mrb[16].mxu0 %vm388_vm3, %v782_v59  ;;  %v961_v29 = vpop.f32.mrb[34].mxu1 }
 0x888   :  { %3625 = vmatprep.mubr.msk.bf16.mxu0 %vm388_vm3, %v783_v60  ;;  %3642 = vmatpush3.bf16.msra.mxu0 %v4781_v6  ;;  %v3640_v33 = vpop.f32.mrb[35].mxu1 }
 0x889   :  { %3643 = vmatprep.subr.bf16.mxu0 %v4415_v16 }
 0x88c   :  { %3644 = vmatpush3.bf16.msra.mxu0 %v4791_v9 }
 0x88d   :  { %3645 = vmatprep.subr.bf16.mxu0 %v4415_v16 }
 0x88f   :  { %3626 = vmatmul.mubr.msk.bf16.gmra.mrb[20].mxu0 %vm388_vm3, %v784_v32 }
 0x890   :  { %3646 = vmatpush3.bf16.msra.mxu0 %v4796_v10  ;;  %3649 = vmatprep.mubr.msk.bf16.mxu0 %vm4416_vm1, %v4415_v16 }
 0x891   :  { %3647 = vmatprep.subr.bf16.mxu0 %v4415_v16 }
 0x894   :  { %3648 = vmatpush3.bf16.msra.mxu0 %v4799_v11 }
 0x895   :  { %3665 = vmatprep.subr.bf16.mxu0 %v4415_v16 }
 0x95a   :  { %v3623_v35 = vpop.f32.mrb[16].mxu0 }
 0x95b   :  { %v870_v36 = vadd.f32 %v3623_v35, %v3120_v34  ;;  %v861_v37 = vpop.f32.mrb[17].mxu0 }
 0x95c   :  { %v3624_v38 = vpop.f32.mrb[18].mxu0  ;;  %v862_v47 = vadd.f32 %v3120_v34, %v861_v37 }
 0x95d   :  { %v873_v39 = vadd.f32 %v3624_v38, %v3120_v34  ;;  %v864_v40 = vpop.f32.mrb[19].mxu0 }
 0x95e   :  { %v865_v41 = vadd.f32 %v3120_v34, %v864_v40 }
 0x962   :  { %v3627_v42 = vpop.f32.mrb[20].mxu0 }
 0x963   :  { %v886_v43 = vadd.f32 %v3627_v42, %v3120_v34  ;;  %v877_v44 = vpop.f32.mrb[21].mxu0 }
 0x964   :  { %v878_v45 = vadd.f32 %v3120_v34, %v877_v44  ;;  %v3628_v46 = vpop.f32.mrb[22].mxu0 }
 0x965   :  { %v889_v48 = vadd.f32 %v3628_v46, %v3120_v34  ;;  %v880_v49 = vpop.f32.mrb[23].mxu0  ;;  %v893_v50 = vsel %vm278_vm2, %v865_v41, %v886_v43  ;;  %v4843_v51 = vsel %vm278_vm2, %v886_v43, %v865_v41 }
 0x966   :  { %v881_v52 = vadd.f32 %v3120_v34, %v880_v49  ;;  %v895_v14 = vsel %vm278_vm2, %v873_v39, %v878_v45  ;;  %v4847_v53 = vsel %vm278_vm2, %v878_v45, %v873_v39  ;;  %v4105_v49 = vld [vmem:[%s5479_s6 + $0x28] sm:$0xff]  }
 0x967   :  { %v892_v54 = vsel %vm278_vm2, %v862_v47, %v889_v48  ;;  %v4851_v55 = vsel %vm278_vm2, %v889_v48, %v862_v47  ;;  %v4104_v48 = vld [vmem:[%s5479_s6 + $0x20] sm:$0xff]  }
 0x968   :  { %v964_v56 = vadd.f32 %v958_v12, %v892_v54  ;;  %v894_v17 = vsel %vm278_vm2, %v870_v36, %v881_v52  ;;  %v4855_v57 = vsel %vm278_vm2, %v881_v52, %v870_v36  ;;  %v4108_v52 = vld [vmem:[%s5479_s6 + $0x38] sm:$0xff]  }
 0x969   :  { %v4966_v54 = vld [vmem:[#allocation9 + $0x38] sm:$0xff]  }
 0x96a   :  { %4148 = vtanh.f32 %v964_v56 }
 0x974   :  { %v4857_v18 = vpop.eup %4148 }
 0x975   :  { %v966_v58 = vpack.c.bf16 %v4857_v18, %v4857_v18 }
 0x977   :  { %3650 = vmatmul.mubr.msk.bf16.vlgmr.msra.gmra.mrb[24].mxu0 %vm388_vm3, %v966_v58 }
 0x978   :  { %3666 = vmatpush3.bf16.msra.mxu0 %v4781_v6  ;;  %3673 = vmatprep.mubr.msk.bf16.mxu0 %vm4416_vm1, %v4415_v16 }
 0x979   :  { %3667 = vmatprep.subr.bf16.mxu0 %v4415_v16 }
 0x97c   :  { %3668 = vmatpush3.bf16.msra.mxu0 %v4791_v9 }
 0x97d   :  { %3669 = vmatprep.subr.bf16.mxu0 %v4415_v16 }
 0x980   :  { %3670 = vmatpush3.bf16.msra.mxu0 %v4796_v10 }
 0x981   :  { %3671 = vmatprep.subr.bf16.mxu0 %v4415_v16 }
 0x984   :  { %3672 = vmatpush3.bf16.msra.mxu0 %v4799_v11 }
 0x985   :  { %3689 = vmatprep.subr.bf16.mxu0 %v4415_v16 }
 0xa4a   :  { %v1004_v19 = vpop.f32.mrb[24].mxu0 }
 0xa4b   :  { %v1010_v59 = vadd.f32 %v1004_v19, %v893_v50  ;;  %v3651_v60 = vpop.f32.mrb[25].mxu0  ;;  %v4948_v50 = vld [vmem:[#allocation9 + $0x20] sm:$0xff]  }
 0xa4c   :  { %v1007_v61 = vpop.f32.mrb[26].mxu0 }
 0xa4d   :  { %4150 = vtanh.f32 %v1010_v59  ;;  %v3652_v62 = vpop.f32.mrb[27].mxu0 }
 0xa57   :  { %v4872_v63 = vpop.eup %4150 }
 0xa58   :  { %v1012_v0 = vpack.c.bf16 %v4872_v63, %v4872_v63 }
 0xa5a   :  { %3662 = vmatmul.mubr.msk.bf16.vlgmr.msra.gmra.mrb[36].mxu1 %vm388_vm3, %v1012_v0 }
 0xa5b   :  { %3678 = vmatpush3.bf16.msra.mxu1 %v4781_v6  ;;  %3685 = vmatprep.mubr.msk.bf16.mxu1 %vm4416_vm1, %v4415_v16 }
 0xa5c   :  { %3679 = vmatprep.subr.bf16.mxu1 %v4415_v16 }
 0xa5f   :  { %3680 = vmatpush3.bf16.msra.mxu1 %v4791_v9 }
 0xa60   :  { %3681 = vmatprep.subr.bf16.mxu1 %v4415_v16 }
 0xa63   :  { %3682 = vmatpush3.bf16.msra.mxu1 %v4796_v10 }
 0xa64   :  { %3683 = vmatprep.subr.bf16.mxu1 %v4415_v16 }
 0xa67   :  { %3684 = vmatpush3.bf16.msra.mxu1 %v4799_v11 }
 0xa68   :  { %3701 = vmatprep.subr.bf16.mxu1 %v4415_v16 }
 0xb2d   :  { %v1050_v1 = vpop.f32.mrb[36].mxu1 }
 0xb2e   :  { %v1056_v2 = vadd.f32 %v1050_v1, %v894_v17  ;;  %v3663_v3 = vpop.f32.mrb[37].mxu1 }
 0xb2f   :  { %v1053_v4 = vpop.f32.mrb[38].mxu1 }
 0xb30   :  { %4152 = vtanh.f32 %v1056_v2  ;;  %v3664_v5 = vpop.f32.mrb[39].mxu1  ;;  %v3149_v4 = vld [vmem:[%s5480_s7 + $0x1] ss:$0 sm:$0xff] }
 0xb3a   :  { %v4153_v7 = vpop.eup %4152 }
 0xb3b   :  { %v1058_v8 = vpack.c.bf16 %v4153_v7, %v4153_v7 }
 0xb3d   :  { %3674 = vmatmul.mubr.msk.bf16.vlgmr.msra.gmra.mrb[28].mxu0 %vm388_vm3, %v1058_v8 }
 0xb3e   :  { %3690 = vmatpush3.bf16.msra.mxu0 %v4781_v6  ;;  %3697 = vmatprep.mubr.msk.bf16.mxu0 %vm4416_vm1, %v4415_v16 }
 0xb3f   :  { %3691 = vmatprep.subr.bf16.mxu0 %v4415_v16 }
 0xb42   :  { %3692 = vmatpush3.bf16.msra.mxu0 %v4791_v9 }
 0xb43   :  { %3693 = vmatprep.subr.bf16.mxu0 %v4415_v16 }
 0xb46   :  { %3694 = vmatpush3.bf16.msra.mxu0 %v4796_v10 }
 0xb47   :  { %3695 = vmatprep.subr.bf16.mxu0 %v4415_v16 }
 0xb4a   :  { %3696 = vmatpush3.bf16.msra.mxu0 %v4799_v11 }
 0xb4b   :  { %3713 = vmatprep.subr.bf16.mxu0 %v4415_v16 }
 0xc10   :  { %v1096_v13 = vpop.f32.mrb[28].mxu0 }
 0xc11   :  { %v1102_v15 = vadd.f32 %v1096_v13, %v895_v14  ;;  %v3675_v21 = vpop.f32.mrb[29].mxu0  ;;  %v4958_v14 = vld [vmem:[#allocation9 + $0x28] sm:$0xff]  }
 0xc12   :  { %v1099_v23 = vpop.f32.mrb[30].mxu0 }
 0xc13   :  { %4154 = vtanh.f32 %v1102_v15  ;;  %v3676_v24 = vpop.f32.mrb[31].mxu0 }
 0xc1d   :  { %v4155_v25 = vpop.eup %4154 }
 0xc1e   :  { %v1104_v26 = vpack.c.bf16 %v4155_v25, %v4155_v25 }
 0xc20   :  { %3686 = vmatmul.mubr.msk.bf16.vlgmr.msra.gmra.mrb[40].mxu1 %vm388_vm3, %v1104_v26 }
 0xc21   :  { %3702 = vmatpush3.bf16.msra.mxu1 %v4781_v6  ;;  %3709 = vmatprep.mubr.msk.bf16.mxu1 %vm4416_vm1, %v4415_v16 }
 0xc22   :  { %3703 = vmatprep.subr.bf16.mxu1 %v4415_v16 }
 0xc25   :  { %3704 = vmatpush3.bf16.msra.mxu1 %v4791_v9 }
 0xc26   :  { %3705 = vmatprep.subr.bf16.mxu1 %v4415_v16 }
 0xc29   :  { %3706 = vmatpush3.bf16.msra.mxu1 %v4796_v10 }
 0xc2a   :  { %3707 = vmatprep.subr.bf16.mxu1 %v4415_v16 }
 0xc2d   :  { %3708 = vmatpush3.bf16.msra.mxu1 %v4799_v11 }
 0xc2e   :  { %3725 = vmatprep.subr.bf16.mxu1 %v4104_v48 }
 0xcf3   :  { %v1142_v27 = vpop.f32.mrb[40].mxu1 }
 0xcf4   :  { %v1148_v28 = vadd.f32 %v1142_v27, %v4847_v53  ;;  %v3687_v30 = vpop.f32.mrb[41].mxu1  ;;  %v4963_v53 = vld [vmem:[#allocation9 + $0x30] sm:$0xff]  }
 0xcf5   :  { %v1145_v31 = vpop.f32.mrb[42].mxu1 }
 0xcf6   :  { %4156 = vtanh.f32 %v1148_v28  ;;  %v3688_v32 = vpop.f32.mrb[43].mxu1 }
 0xd00   :  { %v4157_v12 = vpop.eup %4156 }
 0xd01   :  { %v1150_v22 = vpack.c.bf16 %v4157_v12, %v4157_v12  ;;  %v4928_v38 = vsel %vm278_vm2, %v4157_v12, %v4155_v25 }
 0xd03   :  { %3698 = vmatmul.mubr.msk.bf16.vlgmr.msra.gmra.mrb[32].mxu0 %vm388_vm3, %v1150_v22 }
 0xd04   :  { %3714 = vmatpush3.bf16.msra.mxu0 %v4781_v6  ;;  %3721 = vmatprep.mubr.msk.bf16.mxu0 %vm4416_vm1, %v4415_v16 }
 0xd05   :  { %3715 = vmatprep.subr.bf16.mxu0 %v4415_v16 }
 0xd08   :  { %3716 = vmatpush3.bf16.msra.mxu0 %v4791_v9  ;;  %v4922_v9 = vsel %vm278_vm2, %v4155_v25, %v4157_v12 }
 0xd09   :  { %3717 = vmatprep.subr.bf16.mxu0 %v4415_v16 }
 0xd0c   :  { %3718 = vmatpush3.bf16.msra.mxu0 %v4796_v10 }
 0xd0d   :  { %3719 = vmatprep.subr.bf16.mxu0 %v4415_v16 }
 0xd10   :  { %3720 = vmatpush3.bf16.msra.mxu0 %v4799_v11 }
 0xd11   :  { %3741 = vmatprep.subr.bf16.mxu0 %v4415_v16 }
 0xdd6   :  { %v1188_v29 = vpop.f32.mrb[32].mxu0 }
 0xdd7   :  { %v1194_v6 = vadd.f32 %v1188_v29, %v4855_v57  ;;  %v3699_v33 = vpop.f32.mrb[33].mxu0 }
 0xdd8   :  { %v1191_v34 = vpop.f32.mrb[34].mxu0 }
 0xdd9   :  { %4158 = vtanh.f32 %v1194_v6  ;;  %v3700_v35 = vpop.f32.mrb[35].mxu0 }
 0xde3   :  { %v4159_v36 = vpop.eup %4158 }
 0xde4   :  { %v1196_v37 = vpack.c.bf16 %v4159_v36, %v4159_v36  ;;  %v4925_v10 = vsel %vm278_vm2, %v4153_v7, %v4159_v36  ;;  %v4931_v11 = vsel %vm278_vm2, %v4159_v36, %v4153_v7 }
 0xde5   :  { %v1317_v39 = vpack.c.bf16 %v4922_v9, %v4925_v10  ;;  %v1318_v40 = vpack.c.bf16 %v4931_v11, %v4928_v38 }
 0xde6   :  { %3710 = vmatmul.mubr.msk.bf16.vlgmr.msra.gmra.mrb[44].mxu1 %vm388_vm3, %v1196_v37 }
 0xde7   :  { %3726 = vmatpush3.bf16.msra.mxu1 %v4104_v48 }
 0xde8   :  { %3727 = vmatprep.subr.bf16.mxu1 %v4105_v49 }
 0xdeb   :  { %3728 = vmatpush3.bf16.msra.mxu1 %v4105_v49 }
 0xeb9   :  { %v1234_v41 = vpop.f32.mrb[44].mxu1 }
 0xeba   :  { %v1240_v42 = vadd.f32 %v1234_v41, %v4843_v51  ;;  %v3711_v43 = vpop.f32.mrb[45].mxu1  ;;  %v4106_v51 = vld [vmem:[%s5479_s6 + $0x30] sm:$0xff]  }
 0xebb   :  { %v1237_v44 = vpop.f32.mrb[46].mxu1  ;;  %3729 = vmatprep.subr.bf16.mxu1 %v4106_v51 }
 0xebc   :  { %4160 = vtanh.f32 %v1240_v42  ;;  %v3712_v45 = vpop.f32.mrb[47].mxu1  ;;  %3730 = vmatpush3.bf16.msra.mxu1 %v4106_v51 }
 0xebd   :  { %3731 = vmatprep.subr.bf16.mxu1 %v4108_v52 }
 0xec0   :  { %3732 = vmatpush3.bf16.msra.mxu1 %v4108_v52 }
 0xec1   :  { %3753 = vmatprep.subr.bf16.mxu1 %v4415_v16 }
 0xec6   :  { %v4161_v46 = vpop.eup %4160 }
 0xec7   :  { %v1242_v47 = vpack.c.bf16 %v4161_v46, %v4161_v46  ;;  %v1289_v61 = vsel %vm278_vm2, %v4872_v63, %v4161_v46  ;;  %v1294_v62 = vsel %vm278_vm2, %v4161_v46, %v4872_v63 }
 0xec9   :  { %3722 = vmatmul.mubr.msk.bf16.vlgmr.msra.gmra.mrb[36].mxu0 %vm388_vm3, %v1242_v47 }
 0xeca   :  { %3749 = vmatprep.mubr.msk.bf16.mxu0 %vm4416_vm1, %v4415_v16  ;;  %3742 = vmatpush3.bf16.msra.mxu0 %v4948_v50 }
 0xecb   :  { %3743 = vmatprep.subr.bf16.mxu0 %v4415_v16 }
 0xece   :  { %3744 = vmatpush3.bf16.msra.mxu0 %v4958_v14 }
 0xecf   :  { %3745 = vmatprep.subr.bf16.mxu0 %v4415_v16 }
 0xed2   :  { %3746 = vmatpush3.bf16.msra.mxu0 %v4963_v53 }
 0xed3   :  { %3747 = vmatprep.subr.bf16.mxu0 %v4415_v16 }
 0xed6   :  { %3748 = vmatpush3.bf16.msra.mxu0 %v4966_v54 }
 0xed7   :  { %3765 = vmatprep.subr.bf16.mxu0 %v4415_v16 }
 0xed9   :  { %3750 = vmatmul.mubr.bf16.vlgmr.msra.gmra.mrb[40].mxu0 %v4417_v20 }
 0xeda   :  { %3766 = vmatpush3.bf16.msra.mxu0 %v4948_v50  ;;  %3773 = vmatprep.mubr.msk.bf16.mxu0 %vm4416_vm1, %v4415_v16 }
 0xedb   :  { %3767 = vmatprep.subr.bf16.mxu0 %v4415_v16 }
 0xede   :  { %3768 = vmatpush3.bf16.msra.mxu0 %v4958_v14 }
 0xedf   :  { %3769 = vmatprep.subr.bf16.mxu0 %v4415_v16 }
 0xee2   :  { %3770 = vmatpush3.bf16.msra.mxu0 %v4963_v53 }
 0xee3   :  { %3771 = vmatprep.subr.bf16.mxu0 %v4415_v16 }
 0xee6   :  { %3772 = vmatpush3.bf16.msra.mxu0 %v4966_v54 }
 0xee7   :  { %3789 = vmatprep.subr.bf16.mxu0 %v4415_v16 }
 0xf9c   :  { %v1280_v56 = vpop.f32.mrb[36].mxu0 }
 0xf9d   :  { %v1286_v17 = vadd.f32 %v1280_v56, %v4851_v55  ;;  %v3723_v57 = vpop.f32.mrb[37].mxu0 }
 0xf9e   :  { %v1283_v58 = vpop.f32.mrb[38].mxu0 }
 0xf9f   :  { %4162 = vtanh.f32 %v1286_v17  ;;  %v3724_v19 = vpop.f32.mrb[39].mxu0 }
 0xfa9   :  { %v4163_v59 = vpop.eup %4162 }
 0xfaa   :  { %v1288_v60 = vsel %vm278_vm2, %v4857_v18, %v4163_v59  ;;  %v1295_v0 = vsel %vm278_vm2, %v4163_v59, %v4857_v18 }
 0xfab   :  { %v1316_v1 = vpack.c.bf16 %v1289_v61, %v1288_v60  ;;  %v1319_v2 = vpack.c.bf16 %v1295_v0, %v1294_v62 }
 0xfac   :  { %v1493_v55 = vpop.f32.mrb[40].mxu0 }
 0xfad   :  { %3733 = vmatprep.mubr.msk.bf16.mxu1 %vm388_vm3, %v1316_v1  ;;  %v3751_v18 = vpop.f32.mrb[41].mxu0 }
 0xfae   :  { %3734 = vmatmul.mubr.msk.bf16.vlgmr.msra.gmra.mrb[48].mxu1 %vm388_vm3, %v1317_v39  ;;  %v1496_v63 = vpop.f32.mrb[42].mxu0 }
 0xfaf   :  { %3737 = vmatprep.mubr.msk.bf16.mxu1 %vm388_vm3, %v1318_v40  ;;  %3754 = vmatpush3.bf16.msra.mxu1 %v4948_v50  ;;  %v3752_v3 = vpop.f32.mrb[43].mxu0 }
 0xfb0   :  { %3755 = vmatprep.subr.bf16.mxu1 %v4415_v16 }
 0xfb3   :  { %3756 = vmatpush3.bf16.msra.mxu1 %v4958_v14 }
 0xfb4   :  { %3757 = vmatprep.subr.bf16.mxu1 %v4415_v16 }
 0xfb6   :  { %3738 = vmatmul.mubr.msk.bf16.gmra.mrb[52].mxu1 %vm388_vm3, %v1319_v2 }
 0xfb7   :  { %3758 = vmatpush3.bf16.msra.mxu1 %v4963_v53  ;;  %3761 = vmatprep.mubr.msk.bf16.mxu1 %vm4416_vm1, %v4415_v16 }
 0xfb8   :  { %3759 = vmatprep.subr.bf16.mxu1 %v4415_v16 }
 0xfbb   :  { %3760 = vmatpush3.bf16.msra.mxu1 %v4966_v54 }
 0xfbc   :  { %3777 = vmatprep.subr.bf16.mxu1 %v4415_v16 }
0x1081   :  { %v3735_v5 = vpop.f32.mrb[48].mxu1 }
0x1082   :  { %v1405_v7 = vadd.f32 %v3735_v5, %v3149_v4  ;;  %v1396_v8 = vpop.f32.mrb[49].mxu1 }
0x1083   :  { %v3736_v13 = vpop.f32.mrb[50].mxu1  ;;  %v1397_v30 = vadd.f32 %v3149_v4, %v1396_v8 }
0x1084   :  { %v1408_v15 = vadd.f32 %v3736_v13, %v3149_v4  ;;  %v1399_v21 = vpop.f32.mrb[51].mxu1 }
0x1085   :  { %v1400_v23 = vadd.f32 %v3149_v4, %v1399_v21 }
0x1089   :  { %v3739_v24 = vpop.f32.mrb[52].mxu1 }
0x108a   :  { %v1421_v25 = vadd.f32 %v3739_v24, %v3149_v4  ;;  %v1412_v26 = vpop.f32.mrb[53].mxu1 }
0x108b   :  { %v1413_v27 = vadd.f32 %v3149_v4, %v1412_v26  ;;  %v3740_v28 = vpop.f32.mrb[54].mxu1 }
0x108c   :  { %v1424_v31 = vadd.f32 %v3740_v28, %v3149_v4  ;;  %v1415_v32 = vpop.f32.mrb[55].mxu1  ;;  %v1428_v12 = vsel %vm278_vm2, %v1400_v23, %v1421_v25  ;;  %v5010_v22 = vsel %vm278_vm2, %v1421_v25, %v1400_v23 }
0x108d   :  { %v1416_v29 = vadd.f32 %v3149_v4, %v1415_v32  ;;  %v1430_v6 = vsel %vm278_vm2, %v1408_v15, %v1413_v27  ;;  %v5014_v33 = vsel %vm278_vm2, %v1413_v27, %v1408_v15  ;;  %v4113_v32 = vld [vmem:[%s5479_s6 + $0x48] sm:$0xff]  }
0x108e   :  { %v1427_v34 = vsel %vm278_vm2, %v1397_v30, %v1424_v31  ;;  %v5018_v35 = vsel %vm278_vm2, %v1424_v31, %v1397_v30  ;;  %v4112_v31 = vld [vmem:[%s5479_s6 + $0x40] sm:$0xff]  }
0x108f   :  { %v1499_v36 = vadd.f32 %v1493_v55, %v1427_v34  ;;  %v1429_v9 = vsel %vm278_vm2, %v1405_v7, %v1416_v29  ;;  %v5022_v37 = vsel %vm278_vm2, %v1416_v29, %v1405_v7  ;;  %v4116_v29 = vld [vmem:[%s5479_s6 + $0x58] sm:$0xff]  }
0x1090   :  { %v5133_v34 = vld [vmem:[#allocation9 + $0x58] sm:$0xff]  }
0x1091   :  { %4164 = vtanh.f32 %v1499_v36 }
0x109b   :  { %v5024_v10 = vpop.eup %4164 }
0x109c   :  { %v1501_v38 = vpack.c.bf16 %v5024_v10, %v5024_v10 }
0x109e   :  { %3762 = vmatmul.mubr.msk.bf16.vlgmr.msra.gmra.mrb[56].mxu1 %vm388_vm3, %v1501_v38 }
0x109f   :  { %3778 = vmatpush3.bf16.msra.mxu1 %v4948_v50  ;;  %3785 = vmatprep.mubr.msk.bf16.mxu1 %vm4416_vm1, %v4415_v16 }
0x10a0   :  { %3779 = vmatprep.subr.bf16.mxu1 %v4415_v16 }
0x10a3   :  { %3780 = vmatpush3.bf16.msra.mxu1 %v4958_v14 }
0x10a4   :  { %3781 = vmatprep.subr.bf16.mxu1 %v4415_v16 }
0x10a7   :  { %3782 = vmatpush3.bf16.msra.mxu1 %v4963_v53 }
0x10a8   :  { %3783 = vmatprep.subr.bf16.mxu1 %v4415_v16 }
0x10ab   :  { %3784 = vmatpush3.bf16.msra.mxu1 %v4966_v54 }
0x10ac   :  { %3801 = vmatprep.subr.bf16.mxu1 %v4415_v16 }
0x1171   :  { %v1539_v11 = vpop.f32.mrb[56].mxu1 }
0x1172   :  { %v1545_v39 = vadd.f32 %v1539_v11, %v1428_v12  ;;  %v3763_v40 = vpop.f32.mrb[57].mxu1  ;;  %v5115_v12 = vld [vmem:[#allocation9 + $0x40] sm:$0xff]  }
0x1173   :  { %v1542_v41 = vpop.f32.mrb[58].mxu1 }
0x1174   :  { %4166 = vtanh.f32 %v1545_v39  ;;  %v3764_v42 = vpop.f32.mrb[59].mxu1 }
0x117e   :  { %v5039_v43 = vpop.eup %4166 }
0x117f   :  { %v1547_v44 = vpack.c.bf16 %v5039_v43, %v5039_v43 }
0x1181   :  { %3774 = vmatmul.mubr.msk.bf16.vlgmr.msra.gmra.mrb[44].mxu0 %vm388_vm3, %v1547_v44 }
0x1182   :  { %3790 = vmatpush3.bf16.msra.mxu0 %v4948_v50  ;;  %3797 = vmatprep.mubr.msk.bf16.mxu0 %vm4416_vm1, %v4415_v16 }
0x1183   :  { %3791 = vmatprep.subr.bf16.mxu0 %v4415_v16 }
0x1186   :  { %3792 = vmatpush3.bf16.msra.mxu0 %v4958_v14 }
0x1187   :  { %3793 = vmatprep.subr.bf16.mxu0 %v4415_v16 }
0x118a   :  { %3794 = vmatpush3.bf16.msra.mxu0 %v4963_v53 }
0x118b   :  { %3795 = vmatprep.subr.bf16.mxu0 %v4415_v16 }
0x118e   :  { %3796 = vmatpush3.bf16.msra.mxu0 %v4966_v54 }
0x118f   :  { %3813 = vmatprep.subr.bf16.mxu0 %v4415_v16 }
0x1254   :  { %v1585_v45 = vpop.f32.mrb[44].mxu0 }
0x1255   :  { %v1591_v46 = vadd.f32 %v1585_v45, %v1429_v9  ;;  %v3775_v47 = vpop.f32.mrb[45].mxu0 }
0x1256   :  { %v1588_v48 = vpop.f32.mrb[46].mxu0 }
0x1257   :  { %4168 = vtanh.f32 %v1591_v46  ;;  %v3776_v49 = vpop.f32.mrb[47].mxu0  ;;  %v3178_v48 = vld [vmem:[%s5480_s7 + $0x2] ss:$0 sm:$0xff] }
0x1261   :  { %v4169_v51 = vpop.eup %4168 }
0x1262   :  { %v1593_v52 = vpack.c.bf16 %v4169_v51, %v4169_v51 }
0x1264   :  { %3786 = vmatmul.mubr.msk.bf16.vlgmr.msra.gmra.mrb[60].mxu1 %vm388_vm3, %v1593_v52 }
0x1265   :  { %3802 = vmatpush3.bf16.msra.mxu1 %v4948_v50  ;;  %3809 = vmatprep.mubr.msk.bf16.mxu1 %vm4416_vm1, %v4415_v16 }
0x1266   :  { %3803 = vmatprep.subr.bf16.mxu1 %v4415_v16 }
0x1269   :  { %3804 = vmatpush3.bf16.msra.mxu1 %v4958_v14 }
0x126a   :  { %3805 = vmatprep.subr.bf16.mxu1 %v4415_v16 }
0x126d   :  { %3806 = vmatpush3.bf16.msra.mxu1 %v4963_v53 }
0x126e   :  { %3807 = vmatprep.subr.bf16.mxu1 %v4415_v16 }
0x1271   :  { %3808 = vmatpush3.bf16.msra.mxu1 %v4966_v54 }
0x1272   :  { %3825 = vmatprep.subr.bf16.mxu1 %v4415_v16 }
0x1337   :  { %v1631_v56 = vpop.f32.mrb[60].mxu1 }
0x1338   :  { %v1637_v17 = vadd.f32 %v1631_v56, %v1430_v6  ;;  %v3787_v57 = vpop.f32.mrb[61].mxu1  ;;  %v5125_v6 = vld [vmem:[#allocation9 + $0x48] sm:$0xff]  }
0x1339   :  { %v1634_v58 = vpop.f32.mrb[62].mxu1 }
0x133a   :  { %4170 = vtanh.f32 %v1637_v17  ;;  %v3788_v19 = vpop.f32.mrb[63].mxu1 }
0x1344   :  { %v4171_v59 = vpop.eup %4170 }
0x1345   :  { %v1639_v60 = vpack.c.bf16 %v4171_v59, %v4171_v59 }
0x1347   :  { %3798 = vmatmul.mubr.msk.bf16.vlgmr.msra.gmra.mrb[48].mxu0 %vm388_vm3, %v1639_v60 }
0x1348   :  { %3814 = vmatpush3.bf16.msra.mxu0 %v4948_v50  ;;  %3821 = vmatprep.mubr.msk.bf16.mxu0 %vm4416_vm1, %v4415_v16 }
0x1349   :  { %3815 = vmatprep.subr.bf16.mxu0 %v4415_v16 }
0x134c   :  { %3816 = vmatpush3.bf16.msra.mxu0 %v4958_v14 }
0x134d   :  { %3817 = vmatprep.subr.bf16.mxu0 %v4415_v16 }
0x1350   :  { %3818 = vmatpush3.bf16.msra.mxu0 %v4963_v53 }
0x1351   :  { %3819 = vmatprep.subr.bf16.mxu0 %v4415_v16 }
0x1354   :  { %3820 = vmatpush3.bf16.msra.mxu0 %v4966_v54 }
0x1355   :  { %3837 = vmatprep.subr.bf16.mxu0 %v4112_v31 }
0x141a   :  { %v1677_v61 = vpop.f32.mrb[48].mxu0 }
0x141b   :  { %v1683_v62 = vadd.f32 %v1677_v61, %v5014_v33  ;;  %v3799_v0 = vpop.f32.mrb[49].mxu0  ;;  %v5130_v33 = vld [vmem:[#allocation9 + $0x50] sm:$0xff]  }
0x141c   :  { %v1680_v1 = vpop.f32.mrb[50].mxu0 }
0x141d   :  { %4172 = vtanh.f32 %v1683_v62  ;;  %v3800_v2 = vpop.f32.mrb[51].mxu0 }
0x1427   :  { %v4173_v55 = vpop.eup %4172 }
0x1428   :  { %v1685_v18 = vpack.c.bf16 %v4173_v55, %v4173_v55  ;;  %v5095_v13 = vsel %vm278_vm2, %v4173_v55, %v4171_v59 }
0x142a   :  { %3810 = vmatmul.mubr.msk.bf16.vlgmr.msra.gmra.mrb[64].mxu1 %vm388_vm3, %v1685_v18 }
0x142b   :  { %3826 = vmatpush3.bf16.msra.mxu1 %v4948_v50  ;;  %3833 = vmatprep.mubr.msk.bf16.mxu1 %vm4416_vm1, %v4415_v16 }
0x142c   :  { %3827 = vmatprep.subr.bf16.mxu1 %v4415_v16 }
0x142f   :  { %3828 = vmatpush3.bf16.msra.mxu1 %v4958_v14  ;;  %v5089_v14 = vsel %vm278_vm2, %v4171_v59, %v4173_v55 }
0x1430   :  { %3829 = vmatprep.subr.bf16.mxu1 %v4415_v16 }
0x1433   :  { %3830 = vmatpush3.bf16.msra.mxu1 %v4963_v53 }
0x1434   :  { %3831 = vmatprep.subr.bf16.mxu1 %v4415_v16 }
0x1437   :  { %3832 = vmatpush3.bf16.msra.mxu1 %v4966_v54 }
0x1438   :  { %3853 = vmatprep.subr.bf16.mxu1 %v4415_v16 }
0x14fd   :  { %v1723_v63 = vpop.f32.mrb[64].mxu1 }
0x14fe   :  { %v1729_v50 = vadd.f32 %v1723_v63, %v5022_v37  ;;  %v3811_v3 = vpop.f32.mrb[65].mxu1 }
0x14ff   :  { %v1726_v4 = vpop.f32.mrb[66].mxu1 }
0x1500   :  { %4174 = vtanh.f32 %v1729_v50  ;;  %v3812_v5 = vpop.f32.mrb[67].mxu1 }
0x150a   :  { %v4175_v7 = vpop.eup %4174 }
0x150b   :  { %v1731_v8 = vpack.c.bf16 %v4175_v7, %v4175_v7  ;;  %v5092_v53 = vsel %vm278_vm2, %v4169_v51, %v4175_v7  ;;  %v5098_v54 = vsel %vm278_vm2, %v4175_v7, %v4169_v51 }
0x150c   :  { %v1852_v15 = vpack.c.bf16 %v5089_v14, %v5092_v53  ;;  %v1853_v21 = vpack.c.bf16 %v5098_v54, %v5095_v13 }
0x150d   :  { %3822 = vmatmul.mubr.msk.bf16.vlgmr.msra.gmra.mrb[52].mxu0 %vm388_vm3, %v1731_v8 }
0x150e   :  { %3838 = vmatpush3.bf16.msra.mxu0 %v4112_v31 }
0x150f   :  { %3839 = vmatprep.subr.bf16.mxu0 %v4113_v32 }
0x1512   :  { %3840 = vmatpush3.bf16.msra.mxu0 %v4113_v32 }
0x15e0   :  { %v1769_v23 = vpop.f32.mrb[52].mxu0 }
0x15e1   :  { %v1775_v24 = vadd.f32 %v1769_v23, %v5010_v22  ;;  %v3823_v25 = vpop.f32.mrb[53].mxu0  ;;  %v4114_v22 = vld [vmem:[%s5479_s6 + $0x50] sm:$0xff]  }
0x15e2   :  { %v1772_v26 = vpop.f32.mrb[54].mxu0  ;;  %3841 = vmatprep.subr.bf16.mxu0 %v4114_v22 }
0x15e3   :  { %4176 = vtanh.f32 %v1775_v24  ;;  %v3824_v27 = vpop.f32.mrb[55].mxu0  ;;  %3842 = vmatpush3.bf16.msra.mxu0 %v4114_v22 }
0x15e4   :  { %3843 = vmatprep.subr.bf16.mxu0 %v4116_v29 }
0x15e7   :  { %3844 = vmatpush3.bf16.msra.mxu0 %v4116_v29 }
0x15e8   :  { %3865 = vmatprep.subr.bf16.mxu0 %v4415_v16 }
0x15ed   :  { %v4177_v28 = vpop.eup %4176 }
0x15ee   :  { %v1777_v30 = vpack.c.bf16 %v4177_v28, %v4177_v28  ;;  %v1824_v41 = vsel %vm278_vm2, %v5039_v43, %v4177_v28  ;;  %v1829_v42 = vsel %vm278_vm2, %v4177_v28, %v5039_v43 }
0x15f0   :  { %3834 = vmatmul.mubr.msk.bf16.vlgmr.msra.gmra.mrb[68].mxu1 %vm388_vm3, %v1777_v30 }
0x15f1   :  { %3861 = vmatprep.mubr.msk.bf16.mxu1 %vm4416_vm1, %v4415_v16  ;;  %3854 = vmatpush3.bf16.msra.mxu1 %v5115_v12 }
0x15f2   :  { %3855 = vmatprep.subr.bf16.mxu1 %v4415_v16 }
0x15f5   :  { %3856 = vmatpush3.bf16.msra.mxu1 %v5125_v6 }
0x15f6   :  { %3857 = vmatprep.subr.bf16.mxu1 %v4415_v16 }
0x15f9   :  { %3858 = vmatpush3.bf16.msra.mxu1 %v5130_v33 }
0x15fa   :  { %3859 = vmatprep.subr.bf16.mxu1 %v4415_v16 }
0x15fd   :  { %3860 = vmatpush3.bf16.msra.mxu1 %v5133_v34 }
0x15fe   :  { %3877 = vmatprep.subr.bf16.mxu1 %v4415_v16 }
0x1600   :  { %3862 = vmatmul.mubr.bf16.vlgmr.msra.gmra.mrb[72].mxu1 %v4417_v20 }
0x1601   :  { %3878 = vmatpush3.bf16.msra.mxu1 %v5115_v12  ;;  %3885 = vmatprep.mubr.msk.bf16.mxu1 %vm4416_vm1, %v4415_v16 }
0x1602   :  { %3879 = vmatprep.subr.bf16.mxu1 %v4415_v16 }
0x1605   :  { %3880 = vmatpush3.bf16.msra.mxu1 %v5125_v6 }
0x1606   :  { %3881 = vmatprep.subr.bf16.mxu1 %v4415_v16 }
0x1609   :  { %3882 = vmatpush3.bf16.msra.mxu1 %v5130_v33 }
0x160a   :  { %3883 = vmatprep.subr.bf16.mxu1 %v4415_v16 }
0x160d   :  { %3884 = vmatpush3.bf16.msra.mxu1 %v5133_v34 }
0x160e   :  { %3901 = vmatprep.subr.bf16.mxu1 %v4415_v16 }
0x16c3   :  { %v1815_v36 = vpop.f32.mrb[68].mxu1 }
0x16c4   :  { %v1821_v9 = vadd.f32 %v1815_v36, %v5018_v35  ;;  %v3835_v37 = vpop.f32.mrb[69].mxu1 }
0x16c5   :  { %v1818_v38 = vpop.f32.mrb[70].mxu1 }
0x16c6   :  { %4178 = vtanh.f32 %v1821_v9  ;;  %v3836_v11 = vpop.f32.mrb[71].mxu1 }
0x16d0   :  { %v4179_v39 = vpop.eup %4178 }
0x16d1   :  { %v1823_v40 = vsel %vm278_vm2, %v5024_v10, %v4179_v39  ;;  %v1830_v44 = vsel %vm278_vm2, %v4179_v39, %v5024_v10 }
0x16d2   :  { %v1851_v45 = vpack.c.bf16 %v1824_v41, %v1823_v40  ;;  %v1854_v46 = vpack.c.bf16 %v1830_v44, %v1829_v42 }
0x16d3   :  { %v2028_v35 = vpop.f32.mrb[72].mxu1 }
0x16d4   :  { %3845 = vmatprep.mubr.msk.bf16.mxu0 %vm388_vm3, %v1851_v45  ;;  %v3863_v10 = vpop.f32.mrb[73].mxu1 }
0x16d5   :  { %3846 = vmatmul.mubr.msk.bf16.vlgmr.msra.gmra.mrb[56].mxu0 %vm388_vm3, %v1852_v15  ;;  %v2031_v43 = vpop.f32.mrb[74].mxu1 }
0x16d6   :  { %3849 = vmatprep.mubr.msk.bf16.mxu0 %vm388_vm3, %v1853_v21  ;;  %3866 = vmatpush3.bf16.msra.mxu0 %v5115_v12  ;;  %v3864_v47 = vpop.f32.mrb[75].mxu1 }
0x16d7   :  { %3867 = vmatprep.subr.bf16.mxu0 %v4415_v16 }
0x16da   :  { %3868 = vmatpush3.bf16.msra.mxu0 %v5125_v6 }
0x16db   :  { %3869 = vmatprep.subr.bf16.mxu0 %v4415_v16 }
0x16dd   :  { %3850 = vmatmul.mubr.msk.bf16.gmra.mrb[60].mxu0 %vm388_vm3, %v1854_v46 }
0x16de   :  { %3870 = vmatpush3.bf16.msra.mxu0 %v5130_v33  ;;  %3873 = vmatprep.mubr.msk.bf16.mxu0 %vm4416_vm1, %v4415_v16 }
0x16df   :  { %3871 = vmatprep.subr.bf16.mxu0 %v4415_v16 }
0x16e2   :  { %3872 = vmatpush3.bf16.msra.mxu0 %v5133_v34 }
0x16e3   :  { %3889 = vmatprep.subr.bf16.mxu0 %v4415_v16 }
0x17a8   :  { %v3847_v49 = vpop.f32.mrb[56].mxu0 }
0x17a9   :  { %v1940_v51 = vadd.f32 %v3847_v49, %v3178_v48  ;;  %v1931_v52 = vpop.f32.mrb[57].mxu0 }
0x17aa   :  { %v3848_v56 = vpop.f32.mrb[58].mxu0  ;;  %v1932_v0 = vadd.f32 %v3178_v48, %v1931_v52 }
0x17ab   :  { %v1943_v17 = vadd.f32 %v3848_v56, %v3178_v48  ;;  %v1934_v57 = vpop.f32.mrb[59].mxu0 }
0x17ac   :  { %v1935_v58 = vadd.f32 %v3178_v48, %v1934_v57 }
0x17b0   :  { %v3851_v19 = vpop.f32.mrb[60].mxu0 }
0x17b1   :  { %v1956_v59 = vadd.f32 %v3851_v19, %v3178_v48  ;;  %v1947_v60 = vpop.f32.mrb[61].mxu0 }
0x17b2   :  { %v1948_v61 = vadd.f32 %v3178_v48, %v1947_v60  ;;  %v3852_v62 = vpop.f32.mrb[62].mxu0 }
0x17b3   :  { %v1959_v1 = vadd.f32 %v3852_v62, %v3178_v48  ;;  %v1950_v2 = vpop.f32.mrb[63].mxu0  ;;  %v1963_v55 = vsel %vm278_vm2, %v1935_v58, %v1956_v59  ;;  %v5177_v18 = vsel %vm278_vm2, %v1956_v59, %v1935_v58 }
0x17b4   :  { %v1951_v63 = vadd.f32 %v3178_v48, %v1950_v2  ;;  %v1965_v50 = vsel %vm278_vm2, %v1943_v17, %v1948_v61  ;;  %v5181_v3 = vsel %vm278_vm2, %v1948_v61, %v1943_v17  ;;  %v4121_v2 = vld [vmem:[%s5479_s6 + $0x68] sm:$0xff]  }
0x17b5   :  { %v1962_v4 = vsel %vm278_vm2, %v1932_v0, %v1959_v1  ;;  %v5185_v5 = vsel %vm278_vm2, %v1959_v1, %v1932_v0  ;;  %v4120_v1 = vld [vmem:[%s5479_s6 + $0x60] sm:$0xff]  }
0x17b6   :  { %v2034_v7 = vadd.f32 %v2028_v35, %v1962_v4  ;;  %v1964_v14 = vsel %vm278_vm2, %v1940_v51, %v1951_v63  ;;  %v5189_v8 = vsel %vm278_vm2, %v1951_v63, %v1940_v51  ;;  %v4124_v63 = vld [vmem:[%s5479_s6 + $0x78] sm:$0xff]  }
0x17b7   :  { %v5300_v4 = vld [vmem:[#allocation9 + $0x78] sm:$0xff]  }
0x17b8   :  { %4180 = vtanh.f32 %v2034_v7 }
0x17c2   :  { %v5191_v53 = vpop.eup %4180 }
0x17c3   :  { %v2036_v13 = vpack.c.bf16 %v5191_v53, %v5191_v53 }
0x17c5   :  { %3874 = vmatmul.mubr.msk.bf16.vlgmr.msra.gmra.mrb[64].mxu0 %vm388_vm3, %v2036_v13 }
0x17c6   :  { %3890 = vmatpush3.bf16.msra.mxu0 %v5115_v12  ;;  %3897 = vmatprep.mubr.msk.bf16.mxu0 %vm4416_vm1, %v4415_v16 }
0x17c7   :  { %3891 = vmatprep.subr.bf16.mxu0 %v4415_v16 }
0x17ca   :  { %3892 = vmatpush3.bf16.msra.mxu0 %v5125_v6 }
0x17cb   :  { %3893 = vmatprep.subr.bf16.mxu0 %v4415_v16 }
0x17ce   :  { %3894 = vmatpush3.bf16.msra.mxu0 %v5130_v33 }
0x17cf   :  { %3895 = vmatprep.subr.bf16.mxu0 %v4415_v16 }
0x17d2   :  { %3896 = vmatpush3.bf16.msra.mxu0 %v5133_v34 }
0x17d3   :  { %3913 = vmatprep.subr.bf16.mxu0 %v4415_v16 }
0x1898   :  { %v2074_v54 = vpop.f32.mrb[64].mxu0 }
0x1899   :  { %v2080_v15 = vadd.f32 %v2074_v54, %v1963_v55  ;;  %v3875_v21 = vpop.f32.mrb[65].mxu0  ;;  %v5282_v55 = vld [vmem:[#allocation9 + $0x60] sm:$0xff]  }
0x189a   :  { %v2077_v23 = vpop.f32.mrb[66].mxu0 }
0x189b   :  { %4182 = vtanh.f32 %v2080_v15  ;;  %v3876_v24 = vpop.f32.mrb[67].mxu0 }
0x18a5   :  { %v5206_v25 = vpop.eup %4182 }
0x18a6   :  { %v2082_v26 = vpack.c.bf16 %v5206_v25, %v5206_v25 }
0x18a8   :  { %3886 = vmatmul.mubr.msk.bf16.vlgmr.msra.gmra.mrb[76].mxu1 %vm388_vm3, %v2082_v26 }
0x18a9   :  { %3902 = vmatpush3.bf16.msra.mxu1 %v5115_v12  ;;  %3909 = vmatprep.mubr.msk.bf16.mxu1 %vm4416_vm1, %v4415_v16 }
0x18aa   :  { %3903 = vmatprep.subr.bf16.mxu1 %v4415_v16 }
0x18ad   :  { %3904 = vmatpush3.bf16.msra.mxu1 %v5125_v6 }
0x18ae   :  { %3905 = vmatprep.subr.bf16.mxu1 %v4415_v16 }
0x18b1   :  { %3906 = vmatpush3.bf16.msra.mxu1 %v5130_v33 }
0x18b2   :  { %3907 = vmatprep.subr.bf16.mxu1 %v4415_v16 }
0x18b5   :  { %3908 = vmatpush3.bf16.msra.mxu1 %v5133_v34 }
0x18b6   :  { %3925 = vmatprep.subr.bf16.mxu1 %v4415_v16 }
0x197b   :  { %v2120_v27 = vpop.f32.mrb[76].mxu1 }
0x197c   :  { %v2126_v28 = vadd.f32 %v2120_v27, %v1964_v14  ;;  %v3887_v30 = vpop.f32.mrb[77].mxu1 }
0x197d   :  { %v2123_v31 = vpop.f32.mrb[78].mxu1  ;;  %v3207_v30 = vld [vmem:[%s5480_s7 + $0x3] ss:$0 sm:$0xff] }
0x197e   :  { %4184 = vtanh.f32 %v2126_v28  ;;  %v3888_v32 = vpop.f32.mrb[79].mxu1 }
0x1988   :  { %v4185_v22 = vpop.eup %4184 }
0x1989   :  { %v2128_v29 = vpack.c.bf16 %v4185_v22, %v4185_v22 }
0x198b   :  { %3898 = vmatmul.mubr.msk.bf16.vlgmr.msra.gmra.mrb[68].mxu0 %vm388_vm3, %v2128_v29 }
0x198c   :  { %3914 = vmatpush3.bf16.msra.mxu0 %v5115_v12  ;;  %3921 = vmatprep.mubr.msk.bf16.mxu0 %vm4416_vm1, %v4415_v16 }
0x198d   :  { %3915 = vmatprep.subr.bf16.mxu0 %v4415_v16 }
0x1990   :  { %3916 = vmatpush3.bf16.msra.mxu0 %v5125_v6 }
0x1991   :  { %3917 = vmatprep.subr.bf16.mxu0 %v4415_v16 }
0x1994   :  { %3918 = vmatpush3.bf16.msra.mxu0 %v5130_v33 }
0x1995   :  { %3919 = vmatprep.subr.bf16.mxu0 %v4415_v16 }
0x1998   :  { %3920 = vmatpush3.bf16.msra.mxu0 %v5133_v34 }
0x1999   :  { %3937 = vmatprep.subr.bf16.mxu0 %v4415_v16 }
0x1a5e   :  { %v2166_v36 = vpop.f32.mrb[68].mxu0 }
0x1a5f   :  { %v2172_v9 = vadd.f32 %v2166_v36, %v1965_v50  ;;  %v3899_v37 = vpop.f32.mrb[69].mxu0  ;;  %v5292_v50 = vld [vmem:[#allocation9 + $0x68] sm:$0xff]  }
0x1a60   :  { %v2169_v38 = vpop.f32.mrb[70].mxu0 }
0x1a61   :  { %4186 = vtanh.f32 %v2172_v9  ;;  %v3900_v11 = vpop.f32.mrb[71].mxu0 }
0x1a6b   :  { %v4187_v39 = vpop.eup %4186 }
0x1a6c   :  { %v2174_v40 = vpack.c.bf16 %v4187_v39, %v4187_v39 }
0x1a6e   :  { %3910 = vmatmul.mubr.msk.bf16.vlgmr.msra.gmra.mrb[80].mxu1 %vm388_vm3, %v2174_v40 }
0x1a6f   :  { %3926 = vmatpush3.bf16.msra.mxu1 %v5115_v12  ;;  %3933 = vmatprep.mubr.msk.bf16.mxu1 %vm4416_vm1, %v4415_v16 }
0x1a70   :  { %3927 = vmatprep.subr.bf16.mxu1 %v4415_v16 }
0x1a73   :  { %3928 = vmatpush3.bf16.msra.mxu1 %v5125_v6 }
0x1a74   :  { %3929 = vmatprep.subr.bf16.mxu1 %v4415_v16 }
0x1a77   :  { %3930 = vmatpush3.bf16.msra.mxu1 %v5130_v33 }
0x1a78   :  { %3931 = vmatprep.subr.bf16.mxu1 %v4415_v16 }
0x1a7b   :  { %3932 = vmatpush3.bf16.msra.mxu1 %v5133_v34 }
0x1a7c   :  { %3949 = vmatprep.subr.bf16.mxu1 %v4120_v1 }
0x1b41   :  { %v2212_v41 = vpop.f32.mrb[80].mxu1 }
0x1b42   :  { %v2218_v42 = vadd.f32 %v2212_v41, %v5181_v3  ;;  %v3911_v44 = vpop.f32.mrb[81].mxu1  ;;  %v5297_v3 = vld [vmem:[#allocation9 + $0x70] sm:$0xff]  }
0x1b43   :  { %v2215_v45 = vpop.f32.mrb[82].mxu1 }
0x1b44   :  { %4188 = vtanh.f32 %v2218_v42  ;;  %v3912_v46 = vpop.f32.mrb[83].mxu1 }
0x1b4e   :  { %v4189_v35 = vpop.eup %4188 }
0x1b4f   :  { %v2220_v10 = vpack.c.bf16 %v4189_v35, %v4189_v35  ;;  %v5262_v56 = vsel %vm278_vm2, %v4189_v35, %v4187_v39 }
0x1b51   :  { %3922 = vmatmul.mubr.msk.bf16.vlgmr.msra.gmra.mrb[72].mxu0 %vm388_vm3, %v2220_v10 }
0x1b52   :  { %3938 = vmatpush3.bf16.msra.mxu0 %v5115_v12  ;;  %3945 = vmatprep.mubr.msk.bf16.mxu0 %vm4416_vm1, %v4415_v16 }
0x1b53   :  { %3939 = vmatprep.subr.bf16.mxu0 %v4415_v16 }
0x1b56   :  { %3940 = vmatpush3.bf16.msra.mxu0 %v5125_v6  ;;  %v5256_v6 = vsel %vm278_vm2, %v4187_v39, %v4189_v35 }
0x1b57   :  { %3941 = vmatprep.subr.bf16.mxu0 %v4415_v16 }
0x1b5a   :  { %3942 = vmatpush3.bf16.msra.mxu0 %v5130_v33 }
0x1b5b   :  { %3943 = vmatprep.subr.bf16.mxu0 %v4415_v16 }
0x1b5e   :  { %3944 = vmatpush3.bf16.msra.mxu0 %v5133_v34 }
0x1b5f   :  { %3965 = vmatprep.subr.bf16.mxu0 %v4415_v16 }
0x1c24   :  { %v2258_v43 = vpop.f32.mrb[72].mxu0 }
0x1c25   :  { %v2264_v12 = vadd.f32 %v2258_v43, %v5189_v8  ;;  %v3923_v47 = vpop.f32.mrb[73].mxu0 }
0x1c26   :  { %v2261_v48 = vpop.f32.mrb[74].mxu0 }
0x1c27   :  { %4190 = vtanh.f32 %v2264_v12  ;;  %v3924_v49 = vpop.f32.mrb[75].mxu0 }
0x1c31   :  { %v4191_v51 = vpop.eup %4190 }
0x1c32   :  { %v2266_v52 = vpack.c.bf16 %v4191_v51, %v4191_v51  ;;  %v5259_v33 = vsel %vm278_vm2, %v4185_v22, %v4191_v51  ;;  %v5265_v34 = vsel %vm278_vm2, %v4191_v51, %v4185_v22 }
0x1c33   :  { %v2387_v17 = vpack.c.bf16 %v5256_v6, %v5259_v33  ;;  %v2388_v57 = vpack.c.bf16 %v5265_v34, %v5262_v56 }
0x1c34   :  { %3934 = vmatmul.mubr.msk.bf16.vlgmr.msra.gmra.mrb[84].mxu1 %vm388_vm3, %v2266_v52 }
0x1c35   :  { %3950 = vmatpush3.bf16.msra.mxu1 %v4120_v1 }
0x1c36   :  { %3951 = vmatprep.subr.bf16.mxu1 %v4121_v2 }
0x1c39   :  { %3952 = vmatpush3.bf16.msra.mxu1 %v4121_v2 }
0x1d07   :  { %v2304_v58 = vpop.f32.mrb[84].mxu1 }
0x1d08   :  { %v2310_v19 = vadd.f32 %v2304_v58, %v5177_v18  ;;  %v3935_v59 = vpop.f32.mrb[85].mxu1  ;;  %v4122_v18 = vld [vmem:[%s5479_s6 + $0x70] sm:$0xff]  }
0x1d09   :  { %v2307_v60 = vpop.f32.mrb[86].mxu1  ;;  %3953 = vmatprep.subr.bf16.mxu1 %v4122_v18 }
0x1d0a   :  { %4192 = vtanh.f32 %v2310_v19  ;;  %v3936_v61 = vpop.f32.mrb[87].mxu1  ;;  %3954 = vmatpush3.bf16.msra.mxu1 %v4122_v18 }
0x1d0b   :  { %3955 = vmatprep.subr.bf16.mxu1 %v4124_v63 }
0x1d0e   :  { %3956 = vmatpush3.bf16.msra.mxu1 %v4124_v63 }
0x1d0f   :  { %3977 = vmatprep.subr.bf16.mxu1 %v4415_v16 }
0x1d14   :  { %v4193_v62 = vpop.eup %4192 }
0x1d15   :  { %v2312_v0 = vpack.c.bf16 %v4193_v62, %v4193_v62  ;;  %v2359_v21 = vsel %vm278_vm2, %v5206_v25, %v4193_v62  ;;  %v2364_v23 = vsel %vm278_vm2, %v4193_v62, %v5206_v25 }
0x1d17   :  { %3946 = vmatmul.mubr.msk.bf16.vlgmr.msra.gmra.mrb[76].mxu0 %vm388_vm3, %v2312_v0 }
0x1d18   :  { %3973 = vmatprep.mubr.msk.bf16.mxu0 %vm4416_vm1, %v4415_v16  ;;  %3966 = vmatpush3.bf16.msra.mxu0 %v5282_v55 }
0x1d19   :  { %3967 = vmatprep.subr.bf16.mxu0 %v4415_v16 }
0x1d1c   :  { %3968 = vmatpush3.bf16.msra.mxu0 %v5292_v50 }
0x1d1d   :  { %3969 = vmatprep.subr.bf16.mxu0 %v4415_v16 }
0x1d20   :  { %3970 = vmatpush3.bf16.msra.mxu0 %v5297_v3 }
0x1d21   :  { %3971 = vmatprep.subr.bf16.mxu0 %v4415_v16 }
0x1d24   :  { %3972 = vmatpush3.bf16.msra.mxu0 %v5300_v4 }
0x1d25   :  { %3989 = vmatprep.subr.bf16.mxu0 %v4415_v16 }
0x1d27   :  { %3974 = vmatmul.mubr.bf16.vlgmr.msra.gmra.mrb[80].mxu0 %v4417_v20 }
0x1d28   :  { %3990 = vmatpush3.bf16.msra.mxu0 %v5282_v55  ;;  %3997 = vmatprep.mubr.msk.bf16.mxu0 %vm4416_vm1, %v4415_v16 }
0x1d29   :  { %3991 = vmatprep.subr.bf16.mxu0 %v4415_v16 }
0x1d2c   :  { %3992 = vmatpush3.bf16.msra.mxu0 %v5292_v50 }
0x1d2d   :  { %3993 = vmatprep.subr.bf16.mxu0 %v4415_v16 }
0x1d30   :  { %3994 = vmatpush3.bf16.msra.mxu0 %v5297_v3 }
0x1d31   :  { %3995 = vmatprep.subr.bf16.mxu0 %v4415_v16 }
0x1d34   :  { %3996 = vmatpush3.bf16.msra.mxu0 %v5300_v4 }
0x1d35   :  { %4013 = vmatprep.subr.bf16.mxu0 %v4415_v16 }
0x1dea   :  { %v2350_v20 = vpop.f32.mrb[76].mxu0 }
0x1deb   :  { %v2356_v7 = vadd.f32 %v2350_v20, %v5185_v5  ;;  %v3947_v14 = vpop.f32.mrb[77].mxu0 }
0x1dec   :  { %v2353_v8 = vpop.f32.mrb[78].mxu0 }
0x1ded   :  { %4194 = vtanh.f32 %v2356_v7  ;;  %v3948_v13 = vpop.f32.mrb[79].mxu0 }
0x1df7   :  { %v4195_v54 = vpop.eup %4194 }
0x1df8   :  { %v2358_v15 = vsel %vm278_vm2, %v5191_v53, %v4195_v54  ;;  %v2365_v24 = vsel %vm278_vm2, %v4195_v54, %v5191_v53 }
0x1df9   :  { %v2386_v26 = vpack.c.bf16 %v2359_v21, %v2358_v15  ;;  %v2389_v27 = vpack.c.bf16 %v2365_v24, %v2364_v23 }
0x1dfa   :  { %v2563_v5 = vpop.f32.mrb[80].mxu0 }
0x1dfb   :  { %3957 = vmatprep.mubr.msk.bf16.mxu1 %vm388_vm3, %v2386_v26  ;;  %v3975_v53 = vpop.f32.mrb[81].mxu0 }
0x1dfc   :  { %3958 = vmatmul.mubr.msk.bf16.vlgmr.msra.gmra.mrb[88].mxu1 %vm388_vm3, %v2387_v17  ;;  %v2566_v25 = vpop.f32.mrb[82].mxu0 }
0x1dfd   :  { %3961 = vmatprep.mubr.msk.bf16.mxu1 %vm388_vm3, %v2388_v57  ;;  %3978 = vmatpush3.bf16.msra.mxu1 %v5282_v55  ;;  %v3976_v28 = vpop.f32.mrb[83].mxu0 }
0x1dfe   :  { %3979 = vmatprep.subr.bf16.mxu1 %v4415_v16 }
0x1e01   :  { %3980 = vmatpush3.bf16.msra.mxu1 %v5292_v50 }
0x1e02   :  { %3981 = vmatprep.subr.bf16.mxu1 %v4415_v16 }
0x1e04   :  { %3962 = vmatmul.mubr.msk.bf16.gmra.mrb[92].mxu1 %vm388_vm3, %v2389_v27 }
0x1e05   :  { %3982 = vmatpush3.bf16.msra.mxu1 %v5297_v3  ;;  %3985 = vmatprep.mubr.msk.bf16.mxu1 %vm4416_vm1, %v4415_v16 }
0x1e06   :  { %3983 = vmatprep.subr.bf16.mxu1 %v4415_v16 }
0x1e09   :  { %3984 = vmatpush3.bf16.msra.mxu1 %v5300_v4 }
0x1e0a   :  { %4001 = vmatprep.subr.bf16.mxu1 %v4415_v16 }
0x1ecf   :  { %v3959_v31 = vpop.f32.mrb[88].mxu1 }
0x1ed0   :  { %v2475_v32 = vadd.f32 %v3959_v31, %v3207_v30  ;;  %v2466_v22 = vpop.f32.mrb[89].mxu1 }
0x1ed1   :  { %v3960_v29 = vpop.f32.mrb[90].mxu1  ;;  %v2467_v42 = vadd.f32 %v3207_v30, %v2466_v22 }
0x1ed2   :  { %v2478_v36 = vadd.f32 %v3960_v29, %v3207_v30  ;;  %v2469_v9 = vpop.f32.mrb[91].mxu1 }
0x1ed3   :  { %v2470_v37 = vadd.f32 %v3207_v30, %v2469_v9 }
0x1ed7   :  { %v3963_v38 = vpop.f32.mrb[92].mxu1 }
0x1ed8   :  { %v2491_v11 = vadd.f32 %v3963_v38, %v3207_v30  ;;  %v2482_v39 = vpop.f32.mrb[93].mxu1 }
0x1ed9   :  { %v2483_v40 = vadd.f32 %v3207_v30, %v2482_v39  ;;  %v3964_v41 = vpop.f32.mrb[94].mxu1 }
0x1eda   :  { %v2494_v44 = vadd.f32 %v3964_v41, %v3207_v30  ;;  %v2485_v45 = vpop.f32.mrb[95].mxu1  ;;  %v2498_v46 = vsel %vm278_vm2, %v2470_v37, %v2491_v11  ;;  %v5344_v35 = vsel %vm278_vm2, %v2491_v11, %v2470_v37  ;;  %v4128_v41 = vld [vmem:[#allocation10] sm:$0xff]  }
0x1edb   :  { %v2486_v10 = vadd.f32 %v3207_v30, %v2485_v45  ;;  %v2500_v43 = vsel %vm278_vm2, %v2478_v36, %v2483_v40  ;;  %v5348_v12 = vsel %vm278_vm2, %v2483_v40, %v2478_v36  ;;  %v4131_v45 = vld [vmem:[#allocation10 + $0x18] sm:$0xff]  }
0x1edc   :  { %v2497_v47 = vsel %vm278_vm2, %v2467_v42, %v2494_v44  ;;  %v5352_v48 = vsel %vm278_vm2, %v2494_v44, %v2467_v42  ;;  %v4129_v42 = vld [vmem:[#allocation10 + $0x8] sm:$0xff]   ;;  %v4130_v44 = vld [vmem:[#allocation10 + $0x10] sm:$0xff]  }
0x1edd   :  { %v2569_v49 = vadd.f32 %v2563_v5, %v2497_v47  ;;  %v2499_v51 = vsel %vm278_vm2, %v2475_v32, %v2486_v10  ;;  %v5356_v6 = vsel %vm278_vm2, %v2486_v10, %v2475_v32 }
0x1edf   :  { %4196 = vtanh.f32 %v2569_v49 }
0x1ee9   :  { %v5358_v52 = vpop.eup %4196 }
0x1eea   :  { %v2571_v33 = vpack.c.bf16 %v5358_v52, %v5358_v52 }
0x1eec   :  { %3986 = vmatmul.mubr.msk.bf16.vlgmr.msra.gmra.mrb[96].mxu1 %vm388_vm3, %v2571_v33 }
0x1eed   :  { %4002 = vmatpush3.bf16.msra.mxu1 %v5282_v55  ;;  %4009 = vmatprep.mubr.msk.bf16.mxu1 %vm4416_vm1, %v4415_v16 }
0x1eee   :  { %4003 = vmatprep.subr.bf16.mxu1 %v4415_v16 }
0x1ef1   :  { %4004 = vmatpush3.bf16.msra.mxu1 %v5292_v50 }
0x1ef2   :  { %4005 = vmatprep.subr.bf16.mxu1 %v4415_v16 }
0x1ef5   :  { %4006 = vmatpush3.bf16.msra.mxu1 %v5297_v3 }
0x1ef6   :  { %4007 = vmatprep.subr.bf16.mxu1 %v4415_v16 }
0x1ef9   :  { %4008 = vmatpush3.bf16.msra.mxu1 %v5300_v4 }
0x1efa   :  { %4025 = vmatprep.subr.bf16.mxu1 %v4415_v16 }
0x1fbf   :  { %v2609_v56 = vpop.f32.mrb[96].mxu1 }
0x1fc0   :  { %v2615_v34 = vadd.f32 %v2609_v56, %v2498_v46  ;;  %v3987_v17 = vpop.f32.mrb[97].mxu1 }
0x1fc1   :  { %v2612_v57 = vpop.f32.mrb[98].mxu1 }
0x1fc2   :  { %4198 = vtanh.f32 %v2615_v34  ;;  %v3988_v58 = vpop.f32.mrb[99].mxu1 }
0x1fcc   :  { %v5373_v19 = vpop.eup %4198 }
0x1fcd   :  { %v2617_v59 = vpack.c.bf16 %v5373_v19, %v5373_v19 }
0x1fcf   :  { %3998 = vmatmul.mubr.msk.bf16.vlgmr.msra.gmra.mrb[84].mxu0 %vm388_vm3, %v2617_v59 }
0x1fd0   :  { %4014 = vmatpush3.bf16.msra.mxu0 %v5282_v55  ;;  %4021 = vmatprep.mubr.msk.bf16.mxu0 %vm4416_vm1, %v4415_v16 }
0x1fd1   :  { %4015 = vmatprep.subr.bf16.mxu0 %v4415_v16 }
0x1fd4   :  { %4016 = vmatpush3.bf16.msra.mxu0 %v5292_v50 }
0x1fd5   :  { %4017 = vmatprep.subr.bf16.mxu0 %v4415_v16 }
0x1fd8   :  { %4018 = vmatpush3.bf16.msra.mxu0 %v5297_v3 }
0x1fd9   :  { %4019 = vmatprep.subr.bf16.mxu0 %v4415_v16 }
0x1fdc   :  { %4020 = vmatpush3.bf16.msra.mxu0 %v5300_v4 }
0x1fdd   :  { %4037 = vmatprep.subr.bf16.mxu0 %v4415_v16 }
0x20a2   :  { %v2655_v60 = vpop.f32.mrb[84].mxu0 }
0x20a3   :  { %v2661_v61 = vadd.f32 %v2655_v60, %v2499_v51  ;;  %v3999_v62 = vpop.f32.mrb[85].mxu0 }
0x20a4   :  { %v2658_v0 = vpop.f32.mrb[86].mxu0 }
0x20a5   :  { %4200 = vtanh.f32 %v2661_v61  ;;  %v4000_v1 = vpop.f32.mrb[87].mxu0 }
0x20af   :  { %v4201_v2 = vpop.eup %4200 }
0x20b0   :  { %v2663_v18 = vpack.c.bf16 %v4201_v2, %v4201_v2 }
0x20b2   :  { %4010 = vmatmul.mubr.msk.bf16.vlgmr.msra.gmra.mrb[100].mxu1 %vm388_vm3, %v2663_v18 }
0x20b3   :  { %4026 = vmatpush3.bf16.msra.mxu1 %v5282_v55  ;;  %4033 = vmatprep.mubr.msk.bf16.mxu1 %vm4416_vm1, %v4415_v16 }
0x20b4   :  { %4027 = vmatprep.subr.bf16.mxu1 %v4415_v16 }
0x20b7   :  { %4028 = vmatpush3.bf16.msra.mxu1 %v5292_v50 }
0x20b8   :  { %4029 = vmatprep.subr.bf16.mxu1 %v4415_v16 }
0x20bb   :  { %4030 = vmatpush3.bf16.msra.mxu1 %v5297_v3 }
0x20bc   :  { %4031 = vmatprep.subr.bf16.mxu1 %v4415_v16 }
0x20bf   :  { %4032 = vmatpush3.bf16.msra.mxu1 %v5300_v4 }
0x20c0   :  { %4049 = vmatprep.subr.bf16.mxu1 %v4415_v16 }
0x2185   :  { %v2701_v63 = vpop.f32.mrb[100].mxu1 }
0x2186   :  { %v2707_v20 = vadd.f32 %v2701_v63, %v2500_v43  ;;  %v4011_v7 = vpop.f32.mrb[101].mxu1 }
0x2187   :  { %v2704_v14 = vpop.f32.mrb[102].mxu1 }
0x2188   :  { %4202 = vtanh.f32 %v2707_v20  ;;  %v4012_v8 = vpop.f32.mrb[103].mxu1 }
0x2192   :  { %v4203_v13 = vpop.eup %4202 }
0x2193   :  { %v2709_v54 = vpack.c.bf16 %v4203_v13, %v4203_v13 }
0x2195   :  { %4022 = vmatmul.mubr.msk.bf16.vlgmr.msra.gmra.mrb[88].mxu0 %vm388_vm3, %v2709_v54 }
0x2196   :  { %4038 = vmatpush3.bf16.msra.mxu0 %v5282_v55  ;;  %4045 = vmatprep.mubr.msk.bf16.mxu0 %vm4416_vm1, %v4415_v16 }
0x2197   :  { %4039 = vmatprep.subr.bf16.mxu0 %v4415_v16 }
0x219a   :  { %4040 = vmatpush3.bf16.msra.mxu0 %v5292_v50 }
0x219b   :  { %4041 = vmatprep.subr.bf16.mxu0 %v4415_v16 }
0x219e   :  { %4042 = vmatpush3.bf16.msra.mxu0 %v5297_v3 }
0x219f   :  { %4043 = vmatprep.subr.bf16.mxu0 %v4415_v16 }
0x21a2   :  { %4044 = vmatpush3.bf16.msra.mxu0 %v5300_v4 }
0x21a3   :  { %4061 = vmatprep.subr.bf16.mxu0 %v4128_v41 }
0x2268   :  { %v2747_v15 = vpop.f32.mrb[88].mxu0 }
0x2269   :  { %v2753_v21 = vadd.f32 %v2747_v15, %v5348_v12  ;;  %v4023_v23 = vpop.f32.mrb[89].mxu0 }
0x226a   :  { %v2750_v24 = vpop.f32.mrb[90].mxu0 }
0x226b   :  { %4204 = vtanh.f32 %v2753_v21  ;;  %v4024_v26 = vpop.f32.mrb[91].mxu0 }
0x2275   :  { %v4205_v27 = vpop.eup %4204 }
0x2276   :  { %v2755_v5 = vpack.c.bf16 %v4205_v27, %v4205_v27  ;;  %v2896_v32 = vsel %vm278_vm2, %v4203_v13, %v4205_v27  ;;  %v2897_v29 = vsel %vm278_vm2, %v4205_v27, %v4203_v13 }
0x2278   :  { %4034 = vmatmul.mubr.msk.bf16.vlgmr.msra.gmra.mrb[104].mxu1 %vm388_vm3, %v2755_v5 }
0x2279   :  { %4050 = vmatpush3.bf16.msra.mxu1 %v5282_v55  ;;  %4057 = vmatprep.mubr.msk.bf16.mxu1 %vm4416_vm1, %v4415_v16 }
0x227a   :  { %4051 = vmatprep.subr.bf16.mxu1 %v4415_v16 }
0x227d   :  { %4052 = vmatpush3.bf16.msra.mxu1 %v5292_v50 }
0x227e   :  { %4053 = vmatprep.subr.bf16.mxu1 %v4415_v16 }
0x2281   :  { %4054 = vmatpush3.bf16.msra.mxu1 %v5297_v3 }
0x2282   :  { %4055 = vmatprep.subr.bf16.mxu1 %v4415_v16 }
0x2285   :  { %4056 = vmatpush3.bf16.msra.mxu1 %v5300_v4 }
0x234b   :  { %v2793_v53 = vpop.f32.mrb[104].mxu1 }
0x234c   :  { %v2799_v25 = vadd.f32 %v2793_v53, %v5356_v6  ;;  %v4035_v28 = vpop.f32.mrb[105].mxu1 }
0x234d   :  { %v2796_v55 = vpop.f32.mrb[106].mxu1 }
0x234e   :  { %4206 = vtanh.f32 %v2799_v25  ;;  %v4036_v30 = vpop.f32.mrb[107].mxu1  ;;  %v3021_v55 = vlaneseq }
0x2358   :  { %v4207_v31 = vpop.eup %4206 }
0x2359   :  { %v2801_v22 = vpack.c.bf16 %v4207_v31, %v4207_v31  ;;  %v2895_v50 = vsel %vm278_vm2, %v4201_v2, %v4207_v31  ;;  %v2898_v3 = vsel %vm278_vm2, %v4207_v31, %v4201_v2 }
0x235a   :  { %v2910_v16 = vpack.c.bf16 %v2896_v32, %v2895_v50  ;;  %v2911_v36 = vpack.c.bf16 %v2898_v3, %v2897_v29  ;;  %v3022_v32 = vand.u32 127, %v3021_v55 }
0x235b   :  { %4046 = vmatmul.mubr.msk.bf16.vlgmr.msra.gmra.mrb[92].mxu0 %vm388_vm3, %v2801_v22 }
0x235c   :  { %4062 = vmatpush3.bf16.msra.mxu0 %v4128_v41  ;;  %vm3023_vm4 = vcmp.lt.s32.totalorder %v3022_v32, 2 }
0x235d   :  { %4063 = vmatprep.subr.bf16.mxu0 %v4129_v42 }
0x2360   :  { %4064 = vmatpush3.bf16.msra.mxu0 %v4129_v42 }
0x2361   :  { %4065 = vmatprep.subr.bf16.mxu0 %v4130_v44 }
0x2364   :  { %4066 = vmatpush3.bf16.msra.mxu0 %v4130_v44 }
0x2365   :  { %4067 = vmatprep.subr.bf16.mxu0 %v4131_v45 }
0x2368   :  { %4068 = vmatpush3.bf16.msra.mxu0 %v4131_v45 }
0x242e   :  { %v2839_v4 = vpop.f32.mrb[92].mxu0 }
0x242f   :  { %v2845_v9 = vadd.f32 %v2839_v4, %v5344_v35  ;;  %v4047_v37 = vpop.f32.mrb[93].mxu0 }
0x2430   :  { %v2842_v38 = vpop.f32.mrb[94].mxu0 }
0x2431   :  { %4208 = vtanh.f32 %v2845_v9  ;;  %v4048_v11 = vpop.f32.mrb[95].mxu0 }
0x243b   :  { %v4209_v39 = vpop.eup %4208 }
0x243c   :  { %v2847_v40 = vpack.c.bf16 %v4209_v39, %v4209_v39  ;;  %v2894_v51 = vsel %vm278_vm2, %v5373_v19, %v4209_v39  ;;  %v2899_v6 = vsel %vm278_vm2, %v4209_v39, %v5373_v19 }
0x243e   :  { %4058 = vmatmul.mubr.msk.bf16.vlgmr.msra.gmra.mrb[108].mxu1 %vm388_vm3, %v2847_v40 }
0x2511   :  { %v2885_v46 = vpop.f32.mrb[108].mxu1 }
0x2512   :  { %v2891_v35 = vadd.f32 %v2885_v46, %v5352_v48  ;;  %v4059_v10 = vpop.f32.mrb[109].mxu1  ;;  %v3227_v48 = vld [vmem:[#allocation12] ss:$0 sm:$0xff] }
0x2513   :  { %v2888_v43 = vpop.f32.mrb[110].mxu1 }
0x2514   :  { %4210 = vtanh.f32 %v2891_v35  ;;  %v4060_v12 = vpop.f32.mrb[111].mxu1 }
0x251e   :  { %v4211_v47 = vpop.eup %4210 }
0x251f   :  { %v2893_v49 = vsel %vm278_vm2, %v5358_v52, %v4211_v47  ;;  %v2900_v33 = vsel %vm278_vm2, %v4211_v47, %v5358_v52 }
0x2520   :  { %v2909_v56 = vpack.c.bf16 %v2894_v51, %v2893_v49  ;;  %v2912_v34 = vpack.c.bf16 %v2900_v33, %v2899_v6 }
0x2522   :  { %4069 = vmatprep.mubr.msk.bf16.mxu0 %vm388_vm3, %v2909_v56 }
0x2523   :  { %4070 = vmatmul.mubr.msk.bf16.vlgmr.msra.gmra.mrb[96].mxu0 %vm388_vm3, %v2910_v16 }
0x2524   :  { %4073 = vmatprep.mubr.msk.bf16.mxu0 %vm388_vm3, %v2911_v36 }
0x252b   :  { %4074 = vmatmul.mubr.msk.bf16.gmra.mrb[100].mxu0 %vm388_vm3, %v2912_v34 }
0x25f6   :  { %v4071_v17 = vpop.f32.mrb[96].mxu0 }
0x25f7   :  { %v2999_v57 = vadd.f32 %v4071_v17, %v3227_v48  ;;  %v2990_v58 = vpop.f32.mrb[97].mxu0 }
0x25f8   :  { %v2991_v59 = vadd.f32 %v3227_v48, %v2990_v58  ;;  %v4072_v60 = vpop.f32.mrb[98].mxu0 }
0x25f9   :  { %v3238_v19 = vmul.f32 -1.442695, %v2999_v57  ;;  %v3002_v61 = vadd.f32 %v4072_v60, %v3227_v48  ;;  %v2993_v62 = vpop.f32.mrb[99].mxu0 }
0x25fa   :  { %v3236_v52 = vmul.f32 -1.442695, %v2991_v59  ;;  %v2994_v0 = vadd.f32 %v3227_v48, %v2993_v62 }
0x25fb   :  { %4212 = vpow2.f32 %v3238_v19  ;;  %v3239_v1 = vmul.f32 -1.442695, %v3002_v61 }
0x25fc   :  { %4214 = vpow2.f32 %v3236_v52  ;;  %v3237_v2 = vmul.f32 -1.442695, %v2994_v0 }
0x25fd   :  { %4216 = vpow2.f32 %v3239_v1 }
0x25fe   :  { %4218 = vpow2.f32 %v3237_v2  ;;  %v4075_v18 = vpop.f32.mrb[100].mxu0 }
0x25ff   :  { %v3015_v63 = vadd.f32 %v4075_v18, %v3227_v48  ;;  %v3006_v20 = vpop.f32.mrb[101].mxu0 }
0x2600   :  { %v3007_v7 = vadd.f32 %v3227_v48, %v3006_v20  ;;  %v4076_v14 = vpop.f32.mrb[102].mxu0 }
0x2601   :  { %v3242_v8 = vmul.f32 -1.442695, %v3015_v63  ;;  %v3018_v13 = vadd.f32 %v4076_v14, %v3227_v48  ;;  %v3009_v54 = vpop.f32.mrb[103].mxu0 }
0x2602   :  { %v3240_v15 = vmul.f32 -1.442695, %v3007_v7  ;;  %v3010_v21 = vadd.f32 %v3227_v48, %v3009_v54 }
0x2603   :  { %4220 = vpow2.f32 %v3242_v8  ;;  %v3243_v23 = vmul.f32 -1.442695, %v3018_v13 }
0x2604   :  { %4222 = vpow2.f32 %v3240_v15  ;;  %v3241_v24 = vmul.f32 -1.442695, %v3010_v21 }
0x2605   :  { %v4213_v26 = vpop.eup %4212  ;;  %4224 = vpow2.f32 %v3243_v23 }
0x2606   :  { %v4215_v27 = vpop.eup %4214  ;;  %v3050_v5 = vadd.f32 1.0, %v4213_v26  ;;  %4226 = vpow2.f32 %v3241_v24 }
0x2607   :  { %v4217_v53 = vpop.eup %4216  ;;  %v3048_v25 = vadd.f32 1.0, %v4215_v27 }
0x2608   :  { %v4219_v28 = vpop.eup %4218  ;;  %4228 = vrcp.f32 %v3050_v5  ;;  %v3051_v30 = vadd.f32 1.0, %v4217_v53 }
0x2609   :  { %4230 = vrcp.f32 %v3048_v25  ;;  %v3049_v31 = vadd.f32 1.0, %v4219_v28 }
0x260a   :  { %4232 = vrcp.f32 %v3051_v30 }
0x260b   :  { %4234 = vrcp.f32 %v3049_v31 }
0x260d   :  { %v4221_v22 = vpop.eup %4220 }
0x260e   :  { %v4223_v50 = vpop.eup %4222  ;;  %v3054_v29 = vadd.f32 1.0, %v4221_v22 }
0x260f   :  { %v4225_v3 = vpop.eup %4224  ;;  %v3052_v16 = vadd.f32 1.0, %v4223_v50 }
0x2610   :  { %v4227_v36 = vpop.eup %4226  ;;  %4236 = vrcp.f32 %v3054_v29  ;;  %v3055_v4 = vadd.f32 1.0, %v4225_v3 }
0x2611   :  { %4238 = vrcp.f32 %v3052_v16  ;;  %v3053_v9 = vadd.f32 1.0, %v4227_v36 }
0x2612   :  { %v4229_v37 = vpop.eup %4228  ;;  %4240 = vrcp.f32 %v3055_v4 }
0x2613   :  { %v4231_v38 = vpop.eup %4230  ;;  %v3074_v11 = vsel %vm3023_vm4, %v4229_v37, %v2999_v57  ;;  %4242 = vrcp.f32 %v3053_v9 }
0x2614   :  { %v4233_v39 = vpop.eup %4232  ;;  %3082 = vst [vmem:[%s5484_s11 + $0x10] sm:$0xff] %v3074_v11  ;;  %v3072_v40 = vsel %vm3023_vm4, %v4231_v38, %v2991_v59 }
0x2615   :  { %v4235_v41 = vpop.eup %4234  ;;  %3080 = vst [vmem:[%s5484_s11] sm:$0xff] %v3072_v40  ;;  %v3075_v42 = vsel %vm3023_vm4, %v4233_v39, %v3002_v61 }
0x2616   :  { %3083 = vst [vmem:[%s5484_s11 + $0x18] sm:$0xff] %v3075_v42  ;;  %v3073_v44 = vsel %vm3023_vm4, %v4235_v41, %v2994_v0 }
0x2617   :  { %3081 = vst [vmem:[%s5484_s11 + $0x8] sm:$0xff] %v3073_v44 }
0x261a   :  { %v4237_v45 = vpop.eup %4236 }
0x261b   :  { %v4239_v46 = vpop.eup %4238  ;;  %v3078_v35 = vsel %vm3023_vm4, %v4237_v45, %v3015_v63 }
0x261c   :  { %v4241_v10 = vpop.eup %4240  ;;  %3086 = vst [vmem:[%s5484_s11 + $0x30] sm:$0xff] %v3078_v35  ;;  %v3076_v43 = vsel %vm3023_vm4, %v4239_v46, %v3007_v7 }
0x261d   :  { %v4243_v12 = vpop.eup %4242  ;;  %3084 = vst [vmem:[%s5484_s11 + $0x20] sm:$0xff] %v3076_v43  ;;  %v3079_v47 = vsel %vm3023_vm4, %v4241_v10, %v3018_v13 }
0x261e   :  { %3087 = vst [vmem:[%s5484_s11 + $0x38] sm:$0xff] %v3079_v47  ;;  %v3077_v49 = vsel %vm3023_vm4, %v4243_v12, %v3010_v21 }
0x261f   :  { %3085 = vst [vmem:[%s5484_s11 + $0x28] sm:$0xff] %v3077_v49 }
0x2620   :  { %3092 = vsyncpa [#allocation3], 1 }
0x2621   :  { %3093 = vsyncpa [#allocation5], 1 }
0x2622   :  { %3094 = vsyncpa [#allocation8], 1 }
0x2623   :  { %3095 = vsyncpa [#allocation11], 1 }

</bundles_post_ra>
